<compile_context>
chip_gen: v7x
topology: tpu7x:2x2x1
jax: 0.10.0
libtpu: 0.0.40
codegen_flags: <defaults>
</compile_context>

<pallas_src>
import functools

import jax
import jax.numpy as jnp
from jax import lax
from jax.experimental import pallas as pl
from jax.experimental.pallas import tpu as pltpu

D = 32                 # self.d_shape == out_channels == propagate_dimensions
S = 3                  # space_dimensions
EPS_BN = 1e-5          # nn.BatchNorm1d default eps
SLAB_W = 4 * D         # packed per-node slab: [xbn(32) | h_l(32) | s_l pad(32) | 0(32)]
VMEM_LIMIT = 32 * 1024 * 1024


def _elu(x):
    # ELU(alpha=1): x if x > 0 else exp(x) - 1
    return jnp.where(x > 0, x, jnp.exp(jnp.minimum(x, 0.0)) - 1.0)


# ----------------------------- Pallas kernels -------------------------------

def _pre_mlp_kernel(x_ref, wA_ref, h_ref, stats_ref, *, cin):
    """pre_gravnet: Linear(Cin,32)->ELU->Linear(32,32)->ELU  (row-tiled).

    Also emits per-tile BatchNorm partial sums [sum(h); sum(h*h)] so the global
    BN1 statistics never require XLA to re-read h from HBM.
    """
    x = x_ref[...]
    wA = wA_ref[...]
    w1 = wA[0:cin, :]
    w2 = wA[cin:cin + D, :]
    b1 = wA[cin + D:cin + D + 1, :]
    b2 = wA[cin + D + 1:cin + D + 2, :]
    h = _elu(jnp.dot(x, w1, preferred_element_type=jnp.float32) + b1)
    h = _elu(jnp.dot(h, w2, preferred_element_type=jnp.float32) + b2)
    h_ref[...] = h
    s = jnp.sum(h, axis=0, keepdims=True)
    q = jnp.sum(h * h, axis=0, keepdims=True)
    stats_ref[0] = jnp.concatenate([s, q], axis=0)


def _embed_kernel(h_ref, wB_ref, vB_ref, slab_ref):
    """Apply BatchNorm1 (global stats precomputed) + lin_h + lin_s.

    Output is one lane-dense (tile, 128) slab [xbn | h_l | s_l padded to 32 | 0]
    written with a single unmasked 128-lane store.
    wB rows 0..31 = [w_h | w_s zero-padded to 32 cols]; row 32 = [b_h | 0].
    vB rows = [bn_mean; bn_inv_std].
    """
    h = h_ref[...]
    vB = vB_ref[...]
    xbn = (h - vB[0:1, :]) * vB[1:2, :]
    wB = wB_ref[...]
    proj = jnp.dot(xbn, wB[0:D, :], preferred_element_type=jnp.float32) + wB[D:D + 1, :]
    slab_ref[...] = jnp.concatenate([xbn, proj, jnp.zeros_like(xbn)], axis=1)


def _dist_kernel(slr_ref, slcT_ref, negd2_ref, *, tr, tc):
    """-||s_i - s_j||^2 per (row_tile, col_tile), self-loops masked to -1e30.

    Direct difference (no s2+s2'-2*gram) -> no catastrophic cancellation for
    the near-neighbor distances that decide the top-k selection.
    """
    slr = slr_ref[...]          # (tr, 3)
    slc = slcT_ref[...]         # (3, tc)
    acc = jnp.zeros((tr, tc), jnp.float32)
    for d in range(S):
        diff = slr[:, d:d + 1] - slc[d:d + 1, :]
        acc = acc + diff * diff
    ri = pl.program_id(0) * tr + lax.broadcasted_iota(jnp.int32, (tr, tc), 0)
    ci = pl.program_id(1) * tc + lax.broadcasted_iota(jnp.int32, (tr, tc), 1)
    negd2_ref[...] = jnp.where(ri == ci, jnp.float32(-1e30), -acc)


def _agg_post_kernel(slab_ref, msg_ref, wC_ref, t_ref, stats_ref, *, k):
    """k-neighbor mean/max aggregation + lin + post_gravnet MLP (row-tiled).

    msg_ref is neighbor-major (k, tile, 32): msg_ref[j] is a clean leading-axis
    slab, and aggregation is a running sum / running max (pure VPU, no (N,N,32)
    intermediate). Also emits per-tile BN2 partial sums.
    """
    slab = slab_ref[...]
    xbn = slab[:, 0:D]
    slp = slab[:, 2 * D:3 * D]          # s_l padded to 32 (extra cols exactly 0)

    m0 = msg_ref[0]
    msum = m0
    mmax = m0
    for j in range(1, k):               # k is small & static -> unrolled VPU loop
        mj = msg_ref[j]
        msum = msum + mj
        mmax = jnp.maximum(mmax, mj)
    mean_agg = msum * (1.0 / k)

    wC = wC_ref[...]
    Wm, Wx, Wc = wC[0:D], wC[D:2 * D], wC[2 * D:3 * D]
    Wg, Ws, Wxi = wC[3 * D:4 * D], wC[4 * D:5 * D], wC[5 * D:6 * D]
    W2 = wC[6 * D:7 * D]
    bl = wC[7 * D:7 * D + 1]
    b1 = wC[7 * D + 1:7 * D + 2]
    b2 = wC[7 * D + 2:7 * D + 3]

    dot = lambda a, b: jnp.dot(a, b, preferred_element_type=jnp.float32)
    # lin(cat([mean, max, xbn]))
    xgn = dot(mean_agg, Wm) + dot(mmax, Wx) + dot(xbn, Wc) + bl
    # post_gravnet(cat([xgn, s_l, xbn]))
    t = _elu(dot(xgn, Wg) + dot(slp, Ws) + dot(xbn, Wxi) + b1)
    t = _elu(dot(t, W2) + b2)
    t_ref[...] = t
    s = jnp.sum(t, axis=0, keepdims=True)
    q = jnp.sum(t * t, axis=0, keepdims=True)
    stats_ref[0] = jnp.concatenate([s, q], axis=0)


# ----------------------------- wrapper ---------------------------------------

def _pick_row_tile(n):
    for c in (1024, 512, 256, 128, 64, 32, 16, 8):
        if n % c == 0:
            return c
    return n


def _pick_col_tile(n):
    # lane-dim tiles must be a multiple of 128 or the full width
    for c in (1024, 512, 256, 128):
        if n % c == 0:
            return c
    return n


def _bn_stats(stats, n):
    """Finish BN stats from per-tile partial sums: biased mean/var over nodes."""
    s = jnp.sum(stats[:, 0, :], axis=0)
    q = jnp.sum(stats[:, 1, :], axis=0)
    mu = s / n
    var = jnp.maximum(q / n - mu * mu, 0.0)
    return mu, var


def gravnet_block_forward(x, params, k):
    """Full GravNetBlock forward. Returns (out (N,32), s_l (N,3))."""
    N, cin = x.shape
    TR = _pick_row_tile(N)
    TC = _pick_col_tile(N)
    nr, nc = N // TR, N // TC
    f32 = jnp.float32

    cp_row = pltpu.CompilerParams(dimension_semantics=("parallel",),
                                  vmem_limit_bytes=VMEM_LIMIT)

    # --- stage A: pre_gravnet MLP + BN1 partial stats (row-tiled, parallel) ---
    h, statsA = pl.pallas_call(
        functools.partial(_pre_mlp_kernel, cin=cin),
        grid=(nr,),
        in_specs=[pl.BlockSpec((TR, cin), lambda i: (i, 0)),
                  pl.BlockSpec(params["wA"].shape, lambda i: (0, 0))],
        out_specs=[pl.BlockSpec((TR, D), lambda i: (i, 0)),
                   pl.BlockSpec((1, 2, D), lambda i: (i, 0, 0))],
        out_shape=(jax.ShapeDtypeStruct((N, D), f32),
                   jax.ShapeDtypeStruct((nr, 2, D), f32)),
        compiler_params=cp_row,
    )(x, params["wA"])

    mu1, var1 = _bn_stats(statsA, N)
    vB = jnp.stack([mu1, lax.rsqrt(var1 + EPS_BN)], axis=0)   # (2, 32)

    # --- stage B1: BN apply + lin_h + lin_s -> packed lane-dense slab ---
    slab = pl.pallas_call(
        _embed_kernel,
        grid=(nr,),
        in_specs=[pl.BlockSpec((TR, D), lambda i: (i, 0)),
                  pl.BlockSpec(params["wB"].shape, lambda i: (0, 0)),
                  pl.BlockSpec((2, D), lambda i: (0, 0))],
        out_specs=pl.BlockSpec((TR, SLAB_W), lambda i: (i, 0)),
        out_shape=jax.ShapeDtypeStruct((N, SLAB_W), f32),
        compiler_params=cp_row,
    )(h, params["wB"], vB)

    sl = slab[:, 2 * D:2 * D + S]          # (N, 3)
    hl = slab[:, D:2 * D]                  # (N, 32)
    sl_T = sl.T                            # (3, N)

    # --- stage B2: -||s_i - s_j||^2 tiles (self-loops masked), streamed to HBM ---
    neg_d2 = pl.pallas_call(
        functools.partial(_dist_kernel, tr=TR, tc=TC),
        grid=(nr, nc),
        in_specs=[pl.BlockSpec((TR, S), lambda i, j: (i, 0)),
                  pl.BlockSpec((S, TC), lambda i, j: (0, j))],
        out_specs=pl.BlockSpec((TR, TC), lambda i, j: (i, j)),
        out_shape=jax.ShapeDtypeStruct((N, N), f32),
        compiler_params=pltpu.CompilerParams(
            dimension_semantics=("parallel", "parallel"),
            vmem_limit_bytes=VMEM_LIMIT),
    )(sl, sl_T)

    # kNN selection + neighbor gather + edge messages (neighbor-major layout).
    # TODO(synk): exact kNN top-k selection has no clean Pallas TPU equivalent;
    # use the TPU-optimized approx_max_k + XLA gather (tiny: N*k rows) instead.
    vals, idx = lax.approx_max_k(neg_d2, k)                # (N, k), vals = -d2
    pot_t = jnp.exp(vals).T[:, :, None]                    # (k, N, 1) potentials
    msg_t = pot_t * jnp.take(hl, idx.T, axis=0)            # (k, N, 32) messages

    # --- stage C: aggregation + lin + post_gravnet + BN2 partial stats ---
    t, statsC = pl.pallas_call(
        functools.partial(_agg_post_kernel, k=k),
        grid=(nr,),
        in_specs=[pl.BlockSpec((TR, SLAB_W), lambda i: (i, 0)),
                  pl.BlockSpec((k, TR, D), lambda i: (0, i, 0)),
                  pl.BlockSpec(params["wC"].shape, lambda i: (0, 0))],
        out_specs=[pl.BlockSpec((TR, D), lambda i: (i, 0)),
                   pl.BlockSpec((1, 2, D), lambda i: (i, 0, 0))],
        out_shape=(jax.ShapeDtypeStruct((N, D), f32),
                   jax.ShapeDtypeStruct((nr, 2, D), f32)),
        compiler_params=cp_row,
    )(slab, msg_t, params["wC"])

    # BatchNorm2: global stats from per-tile partials; tiny fused elementwise apply.
    mu2, var2 = _bn_stats(statsC, N)
    out = (t - mu2) * lax.rsqrt(var2 + EPS_BN)
    return out, sl


# ----------------------------- parameter init --------------------------------

def _xavier(key, fan_in, fan_out):
    bound = (6.0 / (fan_in + fan_out)) ** 0.5
    return jax.random.uniform(key, (fan_in, fan_out), jnp.float32, -bound, bound)


def init_params(key, in_channels):
    ks = jax.random.split(key, 7)
    zeros = lambda r, c: jnp.zeros((r, c), jnp.float32)

    # pre_gravnet slab: rows [w_pre1(Cin) | w_pre2(32) | b_pre1(1) | b_pre2(1)]
    wA = jnp.concatenate([_xavier(ks[0], in_channels, D), _xavier(ks[1], D, D),
                          zeros(1, D), zeros(1, D)], axis=0)

    # lin_h (with bias) / lin_s (no bias); wB rows 0..31 = [w_h | w_s padded to 32],
    # row 32 = [b_h | 0]
    w_h = _xavier(ks[2], D, D)
    w_s = _xavier(ks[3], D, S)
    w_top = jnp.concatenate(
        [w_h, jnp.concatenate([w_s, zeros(D, D - S)], axis=1)], axis=1)   # (32, 64)
    b_row = jnp.concatenate([zeros(1, D), zeros(1, D)], axis=1)           # b_h = 0
    wB = jnp.concatenate([w_top, b_row], axis=0)                          # (33, 64)

    # GravNetConv lin: Linear(32+2*32, 32); rows split [mean | max | x]
    w_lin = _xavier(ks[4], 3 * D, D)
    # post_gravnet first Linear(32+3+32, 32); rows split [xgn | gncoords | x_input]
    w_p1 = _xavier(ks[5], D + S + D, D)
    w_p1_s_pad = jnp.concatenate([w_p1[D:D + S], zeros(D - S, D)], axis=0)
    w_p2 = _xavier(ks[6], D, D)

    wC = jnp.concatenate([
        w_lin[0:D], w_lin[D:2 * D], w_lin[2 * D:3 * D],          # lin split
        w_p1[0:D], w_p1_s_pad, w_p1[D + S:2 * D + S],            # post_gravnet[0] split
        w_p2,                                                     # post_gravnet[2]
        zeros(1, D), zeros(1, D), zeros(1, D),                    # b_lin, b_p1, b_p2
    ], axis=0)                                                    # (7*32 + 3, 32)

    return {"wA": wA, "wB": wB, "wC": wC}


# ----------------------------- main -------------------------------------------

if __name__ == "__main__":
    key = jax.random.PRNGKey(0)
    k_x, k_p = jax.random.split(key)

    N = 64            # number of point-cloud nodes (single graph), multiple of 8
    IN_CHANNELS = 16  # input feature channels
    K = 8             # kNN neighbors (small for the test; module default is 40)

    x = jax.random.normal(k_x, (N, IN_CHANNELS), dtype=jnp.float32)
    params = init_params(k_p, IN_CHANNELS)

    fwd = jax.jit(functools.partial(gravnet_block_forward, k=K))
    out, s_l = fwd(x, params)
    out = jax.block_until_ready(out)
    s_l = jax.block_until_ready(s_l)

    assert out.shape == (N, D) and s_l.shape == (N, S)
    assert bool(jnp.all(jnp.isfinite(out))) and bool(jnp.all(jnp.isfinite(s_l)))
    print("KERNEL_OK")
</pallas_src>

<mosaic_0001>
module attributes {stable_mosaic.version = 11 : i64} {
  func.func @_pre_mlp_kernel(%arg0: i32, %arg1: memref<64x16xf32, #tpu.memory_space<vmem>>, %arg2: memref<50x32xf32, #tpu.memory_space<vmem>>, %arg3: memref<64x32xf32, #tpu.memory_space<vmem>>, %arg4: memref<1x2x32xf32, #tpu.memory_space<vmem>>) attributes {dimension_semantics = [#tpu.dimension_semantics<parallel>], iteration_bounds = array<i64: 1>, scalar_prefetch = 0 : i64, scratch_operands = 0 : i64, tpu.core_type = #tpu.core_type<tc>, window_params = [{transform_indices = @transform_0, window_bounds = array<i64: 64, 16>}, {pipeline_mode = #tpu.pipeline_mode<synchronous>, transform_indices = @transform_1, window_bounds = array<i64: 50, 32>}, {transform_indices = @transform_2, window_bounds = array<i64: 64, 32>}, {transform_indices = @transform_3, window_bounds = array<i64: 1, 2, 32>}]} {
    %c0 = arith.constant 0 : index
    %c0_0 = arith.constant 0 : index
    %0 = vector.load %arg1[%c0, %c0_0] : memref<64x16xf32, #tpu.memory_space<vmem>>, vector<64x16xf32>
    %c0_1 = arith.constant 0 : index
    %c0_2 = arith.constant 0 : index
    %1 = vector.load %arg2[%c0_1, %c0_2] : memref<50x32xf32, #tpu.memory_space<vmem>>, vector<50x32xf32>
    %2 = vector.extract_strided_slice %1 {offsets = [0, 0], sizes = [16, 32], strides = [1, 1]} : vector<50x32xf32> to vector<16x32xf32>
    %3 = vector.extract_strided_slice %1 {offsets = [16, 0], sizes = [32, 32], strides = [1, 1]} : vector<50x32xf32> to vector<32x32xf32>
    %4 = vector.extract_strided_slice %1 {offsets = [48, 0], sizes = [1, 32], strides = [1, 1]} : vector<50x32xf32> to vector<1x32xf32>
    %5 = vector.extract_strided_slice %1 {offsets = [49, 0], sizes = [1, 32], strides = [1, 1]} : vector<50x32xf32> to vector<1x32xf32>
    %cst = arith.constant dense<0.000000e+00> : vector<64x32xf32>
    %6 = tpu.matmul %0, %2, %cst {dimension_numbers = #tpu.dot_dimension_numbers<[1], [0], [0], [1], [0, 0, 1, 1], [], []>} : vector<64x16xf32>, vector<16x32xf32>, vector<64x32xf32> -> vector<64x32xf32>
    %7 = vector.broadcast %4 : vector<1x32xf32> to vector<64x32xf32>
    %8 = arith.addf %6, %7 : vector<64x32xf32>
    %cst_3 = arith.constant 0.000000e+00 : f32
    %9 = vector.broadcast %cst_3 : f32 to vector<64x32xf32>
    %10 = arith.cmpf ogt, %8, %9 : vector<64x32xf32>
    %cst_4 = arith.constant 0.000000e+00 : f32
    %11 = vector.broadcast %cst_4 : f32 to vector<64x32xf32>
    %12 = arith.minimumf %8, %11 : vector<64x32xf32>
    %13 = math.exp %12 : vector<64x32xf32>
    %cst_5 = arith.constant 1.000000e+00 : f32
    %14 = vector.broadcast %cst_5 : f32 to vector<64x32xf32>
    %15 = arith.subf %13, %14 : vector<64x32xf32>
    %16 = arith.select %10, %8, %15 : vector<64x32xi1>, vector<64x32xf32>
    %cst_6 = arith.constant dense<0.000000e+00> : vector<64x32xf32>
    %17 = tpu.matmul %16, %3, %cst_6 {dimension_numbers = #tpu.dot_dimension_numbers<[1], [0], [0], [1], [0, 0, 1, 1], [], []>} : vector<64x32xf32>, vector<32x32xf32>, vector<64x32xf32> -> vector<64x32xf32>
    %18 = vector.broadcast %5 : vector<1x32xf32> to vector<64x32xf32>
    %19 = arith.addf %17, %18 : vector<64x32xf32>
    %cst_7 = arith.constant 0.000000e+00 : f32
    %20 = vector.broadcast %cst_7 : f32 to vector<64x32xf32>
    %21 = arith.cmpf ogt, %19, %20 : vector<64x32xf32>
    %cst_8 = arith.constant 0.000000e+00 : f32
    %22 = vector.broadcast %cst_8 : f32 to vector<64x32xf32>
    %23 = arith.minimumf %19, %22 : vector<64x32xf32>
    %24 = math.exp %23 : vector<64x32xf32>
    %cst_9 = arith.constant 1.000000e+00 : f32
    %25 = vector.broadcast %cst_9 : f32 to vector<64x32xf32>
    %26 = arith.subf %24, %25 : vector<64x32xf32>
    %27 = arith.select %21, %19, %26 : vector<64x32xi1>, vector<64x32xf32>
    %c0_10 = arith.constant 0 : index
    %c0_11 = arith.constant 0 : index
    %28 = vector.load %arg3[%c0_10, %c0_11] : memref<64x32xf32, #tpu.memory_space<vmem>>, vector<64x32xf32>
    tpu.vector_store %arg3[%c0_10, %c0_11], %27 {strides = array<i32>} : memref<64x32xf32, #tpu.memory_space<vmem>>, vector<64x32xf32>,
    %cst_12 = arith.constant dense<0.000000e+00> : vector<32xf32>
    %29 = vector.multi_reduction <add>, %27, %cst_12 [0] : vector<64x32xf32> to vector<32xf32>
    %30 = vector.shape_cast %29 : vector<32xf32> to vector<1x32xf32>
    %31 = arith.mulf %27, %27 : vector<64x32xf32>
    %cst_13 = arith.constant dense<0.000000e+00> : vector<32xf32>
    %32 = vector.multi_reduction <add>, %31, %cst_13 [0] : vector<64x32xf32> to vector<32xf32>
    %33 = vector.shape_cast %32 : vector<32xf32> to vector<1x32xf32>
    %34 = tpu.concatenate %30, %33 in 0 : vector<1x32xf32>, vector<1x32xf32> -> vector<2x32xf32>
    %c0_14 = arith.constant 0 : index
    %c0_15 = arith.constant 0 : index
    %c0_16 = arith.constant 0 : index
    %35 = vector.load %arg4[%c0_14, %c0_15, %c0_16] : memref<1x2x32xf32, #tpu.memory_space<vmem>>, vector<1x2x32xf32>
    %36 = vector.shape_cast %35 : vector<1x2x32xf32> to vector<2x32xf32>
    %37 = vector.shape_cast %34 : vector<2x32xf32> to vector<1x2x32xf32>
    tpu.vector_store %arg4[%c0_14, %c0_15, %c0_16], %37 {strides = array<i32>} : memref<1x2x32xf32, #tpu.memory_space<vmem>>, vector<1x2x32xf32>,
    return
  }
  func.func @transform_0(%arg0: i32) -> (i32, i32) {
    %c0_i32 = arith.constant 0 : i32
    %c0_i32_0 = arith.constant 0 : i32
    return %arg0, %c0_i32 : i32, i32
  }
  func.func @transform_1(%arg0: i32) -> (i32, i32) {
    %c0_i32 = arith.constant 0 : i32
    %c0_i32_0 = arith.constant 0 : i32
    %c0_i32_1 = arith.constant 0 : i32
    return %c0_i32, %c0_i32_0 : i32, i32
  }
  func.func @transform_2(%arg0: i32) -> (i32, i32) {
    %c0_i32 = arith.constant 0 : i32
    %c0_i32_0 = arith.constant 0 : i32
    return %arg0, %c0_i32 : i32, i32
  }
  func.func @transform_3(%arg0: i32) -> (i32, i32, i32) {
    %c0_i32 = arith.constant 0 : i32
    %c0_i32_0 = arith.constant 0 : i32
    %c0_i32_1 = arith.constant 0 : i32
    return %arg0, %c0_i32, %c0_i32_0 : i32, i32, i32
  }
}

module attributes {stable_mosaic.version = 11 : i64} {
  func.func @_embed_kernel(%arg0: i32, %arg1: memref<64x32xf32, #tpu.memory_space<vmem>>, %arg2: memref<33x64xf32, #tpu.memory_space<vmem>>, %arg3: memref<2x32xf32, #tpu.memory_space<vmem>>, %arg4: memref<64x128xf32, #tpu.memory_space<vmem>>) attributes {dimension_semantics = [#tpu.dimension_semantics<parallel>], iteration_bounds = array<i64: 1>, scalar_prefetch = 0 : i64, scratch_operands = 0 : i64, tpu.core_type = #tpu.core_type<tc>, window_params = [{transform_indices = @transform_0, window_bounds = array<i64: 64, 32>}, {pipeline_mode = #tpu.pipeline_mode<synchronous>, transform_indices = @transform_1, window_bounds = array<i64: 33, 64>}, {pipeline_mode = #tpu.pipeline_mode<synchronous>, transform_indices = @transform_2, window_bounds = array<i64: 2, 32>}, {transform_indices = @transform_3, window_bounds = array<i64: 64, 128>}]} {
    %c0 = arith.constant 0 : index
    %c0_0 = arith.constant 0 : index
    %0 = vector.load %arg1[%c0, %c0_0] : memref<64x32xf32, #tpu.memory_space<vmem>>, vector<64x32xf32>
    %c0_1 = arith.constant 0 : index
    %c0_2 = arith.constant 0 : index
    %1 = vector.load %arg3[%c0_1, %c0_2] : memref<2x32xf32, #tpu.memory_space<vmem>>, vector<2x32xf32>
    %2 = vector.extract_strided_slice %1 {offsets = [0, 0], sizes = [1, 32], strides = [1, 1]} : vector<2x32xf32> to vector<1x32xf32>
    %3 = vector.broadcast %2 : vector<1x32xf32> to vector<64x32xf32>
    %4 = arith.subf %0, %3 : vector<64x32xf32>
    %5 = vector.extract_strided_slice %1 {offsets = [1, 0], sizes = [1, 32], strides = [1, 1]} : vector<2x32xf32> to vector<1x32xf32>
    %6 = vector.broadcast %5 : vector<1x32xf32> to vector<64x32xf32>
    %7 = arith.mulf %4, %6 : vector<64x32xf32>
    %c0_3 = arith.constant 0 : index
    %c0_4 = arith.constant 0 : index
    %8 = vector.load %arg2[%c0_3, %c0_4] : memref<33x64xf32, #tpu.memory_space<vmem>>, vector<33x64xf32>
    %9 = vector.extract_strided_slice %8 {offsets = [0, 0], sizes = [32, 64], strides = [1, 1]} : vector<33x64xf32> to vector<32x64xf32>
    %cst = arith.constant dense<0.000000e+00> : vector<64x64xf32>
    %10 = tpu.matmul %7, %9, %cst {dimension_numbers = #tpu.dot_dimension_numbers<[1], [0], [0], [1], [0, 0, 1, 1], [], []>} : vector<64x32xf32>, vector<32x64xf32>, vector<64x64xf32> -> vector<64x64xf32>
    %11 = vector.extract_strided_slice %8 {offsets = [32, 0], sizes = [1, 64], strides = [1, 1]} : vector<33x64xf32> to vector<1x64xf32>
    %12 = vector.broadcast %11 : vector<1x64xf32> to vector<64x64xf32>
    %13 = arith.addf %10, %12 : vector<64x64xf32>
    %cst_5 = arith.constant 0.000000e+00 : f32
    %14 = vector.broadcast %cst_5 : f32 to vector<64x32xf32>
    %15 = tpu.concatenate %7, %13, %14 in 1 : vector<64x32xf32>, vector<64x64xf32>, vector<64x32xf32> -> vector<64x128xf32>
    %c0_6 = arith.constant 0 : index
    %c0_7 = arith.constant 0 : index
    %16 = vector.load %arg4[%c0_6, %c0_7] : memref<64x128xf32, #tpu.memory_space<vmem>>, vector<64x128xf32>
    tpu.vector_store %arg4[%c0_6, %c0_7], %15 {strides = array<i32>} : memref<64x128xf32, #tpu.memory_space<vmem>>, vector<64x128xf32>,
    return
  }
  func.func @transform_0(%arg0: i32) -> (i32, i32) {
    %c0_i32 = arith.constant 0 : i32
    %c0_i32_0 = arith.constant 0 : i32
    return %arg0, %c0_i32 : i32, i32
  }
  func.func @transform_1(%arg0: i32) -> (i32, i32) {
    %c0_i32 = arith.constant 0 : i32
    %c0_i32_0 = arith.constant 0 : i32
    %c0_i32_1 = arith.constant 0 : i32
    return %c0_i32, %c0_i32_0 : i32, i32
  }
  func.func @transform_2(%arg0: i32) -> (i32, i32) {
    %c0_i32 = arith.constant 0 : i32
    %c0_i32_0 = arith.constant 0 : i32
    %c0_i32_1 = arith.constant 0 : i32
    return %c0_i32, %c0_i32_0 : i32, i32
  }
  func.func @transform_3(%arg0: i32) -> (i32, i32) {
    %c0_i32 = arith.constant 0 : i32
    %c0_i32_0 = arith.constant 0 : i32
    return %arg0, %c0_i32 : i32, i32
  }
}

module attributes {stable_mosaic.version = 11 : i64} {
  func.func @_dist_kernel(%arg0: i32, %arg1: i32, %arg2: memref<64x3xf32, #tpu.memory_space<vmem>>, %arg3: memref<3x64xf32, #tpu.memory_space<vmem>>, %arg4: memref<64x64xf32, #tpu.memory_space<vmem>>) attributes {dimension_semantics = [#tpu.dimension_semantics<parallel>, #tpu.dimension_semantics<parallel>], iteration_bounds = array<i64: 1, 1>, scalar_prefetch = 0 : i64, scratch_operands = 0 : i64, tpu.core_type = #tpu.core_type<tc>, window_params = [{transform_indices = @transform_0, window_bounds = array<i64: 64, 3>}, {transform_indices = @transform_1, window_bounds = array<i64: 3, 64>}, {transform_indices = @transform_2, window_bounds = array<i64: 64, 64>}]} {
    %c0 = arith.constant 0 : index
    %c0_0 = arith.constant 0 : index
    %0 = vector.load %arg2[%c0, %c0_0] : memref<64x3xf32, #tpu.memory_space<vmem>>, vector<64x3xf32>
    %c0_1 = arith.constant 0 : index
    %c0_2 = arith.constant 0 : index
    %1 = vector.load %arg3[%c0_1, %c0_2] : memref<3x64xf32, #tpu.memory_space<vmem>>, vector<3x64xf32>
    %cst = arith.constant 0.000000e+00 : f32
    %2 = vector.broadcast %cst : f32 to vector<64x64xf32>
    %3 = vector.extract_strided_slice %0 {offsets = [0, 0], sizes = [64, 1], strides = [1, 1]} : vector<64x3xf32> to vector<64x1xf32>
    %4 = vector.extract_strided_slice %1 {offsets = [0, 0], sizes = [1, 64], strides = [1, 1]} : vector<3x64xf32> to vector<1x64xf32>
    %5 = vector.broadcast %3 : vector<64x1xf32> to vector<64x64xf32>
    %6 = vector.broadcast %4 : vector<1x64xf32> to vector<64x64xf32>
    %7 = arith.subf %5, %6 : vector<64x64xf32>
    %8 = arith.mulf %7, %7 : vector<64x64xf32>
    %9 = arith.addf %2, %8 : vector<64x64xf32>
    %10 = vector.extract_strided_slice %0 {offsets = [0, 1], sizes = [64, 1], strides = [1, 1]} : vector<64x3xf32> to vector<64x1xf32>
    %11 = vector.extract_strided_slice %1 {offsets = [1, 0], sizes = [1, 64], strides = [1, 1]} : vector<3x64xf32> to vector<1x64xf32>
    %12 = vector.broadcast %10 : vector<64x1xf32> to vector<64x64xf32>
    %13 = vector.broadcast %11 : vector<1x64xf32> to vector<64x64xf32>
    %14 = arith.subf %12, %13 : vector<64x64xf32>
    %15 = arith.mulf %14, %14 : vector<64x64xf32>
    %16 = arith.addf %9, %15 : vector<64x64xf32>
    %17 = vector.extract_strided_slice %0 {offsets = [0, 2], sizes = [64, 1], strides = [1, 1]} : vector<64x3xf32> to vector<64x1xf32>
    %18 = vector.extract_strided_slice %1 {offsets = [2, 0], sizes = [1, 64], strides = [1, 1]} : vector<3x64xf32> to vector<1x64xf32>
    %19 = vector.broadcast %17 : vector<64x1xf32> to vector<64x64xf32>
    %20 = vector.broadcast %18 : vector<1x64xf32> to vector<64x64xf32>
    %21 = arith.subf %19, %20 : vector<64x64xf32>
    %22 = arith.mulf %21, %21 : vector<64x64xf32>
    %23 = arith.addf %16, %22 : vector<64x64xf32>
    %c64_i32 = arith.constant 64 : i32
    %24 = arith.muli %arg0, %c64_i32 : i32
    %25 = tpu.iota {dimensions = array<i32: 0>} : vector<64x64xi32>
    %26 = vector.broadcast %24 : i32 to vector<64x64xi32>
    %27 = arith.addi %26, %25 : vector<64x64xi32>
    %c64_i32_3 = arith.constant 64 : i32
    %28 = arith.muli %arg1, %c64_i32_3 : i32
    %29 = tpu.iota {dimensions = array<i32: 1>} : vector<64x64xi32>
    %30 = vector.broadcast %28 : i32 to vector<64x64xi32>
    %31 = arith.addi %30, %29 : vector<64x64xi32>
    %32 = arith.cmpi eq, %27, %31 : vector<64x64xi32>
    %cst_4 = arith.constant 0.000000e+00 : f32
    %33 = vector.broadcast %cst_4 : f32 to vector<64x64xf32>
    %34 = arith.subf %33, %23 : vector<64x64xf32>
    %cst_5 = arith.constant -1.000000e+30 : f32
    %35 = vector.broadcast %cst_5 : f32 to vector<64x64xf32>
    %36 = arith.select %32, %35, %34 : vector<64x64xi1>, vector<64x64xf32>
    %c0_6 = arith.constant 0 : index
    %c0_7 = arith.constant 0 : index
    %37 = vector.load %arg4[%c0_6, %c0_7] : memref<64x64xf32, #tpu.memory_space<vmem>>, vector<64x64xf32>
    tpu.vector_store %arg4[%c0_6, %c0_7], %36 {strides = array<i32>} : memref<64x64xf32, #tpu.memory_space<vmem>>, vector<64x64xf32>,
    return
  }
  func.func @transform_0(%arg0: i32, %arg1: i32) -> (i32, i32) {
    %c0_i32 = arith.constant 0 : i32
    %c0_i32_0 = arith.constant 0 : i32
    return %arg0, %c0_i32 : i32, i32
  }
  func.func @transform_1(%arg0: i32, %arg1: i32) -> (i32, i32) {
    %c0_i32 = arith.constant 0 : i32
    %c0_i32_0 = arith.constant 0 : i32
    return %c0_i32, %arg1 : i32, i32
  }
  func.func @transform_2(%arg0: i32, %arg1: i32) -> (i32, i32) {
    %c0_i32 = arith.constant 0 : i32
    return %arg0, %arg1 : i32, i32
  }
}

module attributes {stable_mosaic.version = 11 : i64} {
  func.func @_agg_post_kernel(%arg0: i32, %arg1: memref<64x128xf32, #tpu.memory_space<vmem>>, %arg2: memref<8x64x32xf32, #tpu.memory_space<vmem>>, %arg3: memref<227x32xf32, #tpu.memory_space<vmem>>, %arg4: memref<64x32xf32, #tpu.memory_space<vmem>>, %arg5: memref<1x2x32xf32, #tpu.memory_space<vmem>>) attributes {dimension_semantics = [#tpu.dimension_semantics<parallel>], iteration_bounds = array<i64: 1>, scalar_prefetch = 0 : i64, scratch_operands = 0 : i64, tpu.core_type = #tpu.core_type<tc>, window_params = [{transform_indices = @transform_0, window_bounds = array<i64: 64, 128>}, {transform_indices = @transform_1, window_bounds = array<i64: 8, 64, 32>}, {pipeline_mode = #tpu.pipeline_mode<synchronous>, transform_indices = @transform_2, window_bounds = array<i64: 227, 32>}, {transform_indices = @transform_3, window_bounds = array<i64: 64, 32>}, {transform_indices = @transform_4, window_bounds = array<i64: 1, 2, 32>}]} {
    %c0 = arith.constant 0 : index
    %c0_0 = arith.constant 0 : index
    %0 = vector.load %arg1[%c0, %c0_0] : memref<64x128xf32, #tpu.memory_space<vmem>>, vector<64x128xf32>
    %1 = vector.extract_strided_slice %0 {offsets = [0, 0], sizes = [64, 32], strides = [1, 1]} : vector<64x128xf32> to vector<64x32xf32>
    %2 = vector.extract_strided_slice %0 {offsets = [0, 64], sizes = [64, 32], strides = [1, 1]} : vector<64x128xf32> to vector<64x32xf32>
    %c0_1 = arith.constant 0 : index
    %c0_2 = arith.constant 0 : index
    %c0_3 = arith.constant 0 : index
    %3 = vector.load %arg2[%c0_1, %c0_2, %c0_3] : memref<8x64x32xf32, #tpu.memory_space<vmem>>, vector<1x64x32xf32>
    %4 = vector.shape_cast %3 : vector<1x64x32xf32> to vector<64x32xf32>
    %c1 = arith.constant 1 : index
    %c0_4 = arith.constant 0 : index
    %c0_5 = arith.constant 0 : index
    %5 = vector.load %arg2[%c1, %c0_4, %c0_5] : memref<8x64x32xf32, #tpu.memory_space<vmem>>, vector<1x64x32xf32>
    %6 = vector.shape_cast %5 : vector<1x64x32xf32> to vector<64x32xf32>
    %7 = arith.addf %4, %6 : vector<64x32xf32>
    %8 = arith.maximumf %4, %6 : vector<64x32xf32>
    %c2 = arith.constant 2 : index
    %c0_6 = arith.constant 0 : index
    %c0_7 = arith.constant 0 : index
    %9 = vector.load %arg2[%c2, %c0_6, %c0_7] : memref<8x64x32xf32, #tpu.memory_space<vmem>>, vector<1x64x32xf32>
    %10 = vector.shape_cast %9 : vector<1x64x32xf32> to vector<64x32xf32>
    %11 = arith.addf %7, %10 : vector<64x32xf32>
    %12 = arith.maximumf %8, %10 : vector<64x32xf32>
    %c3 = arith.constant 3 : index
    %c0_8 = arith.constant 0 : index
    %c0_9 = arith.constant 0 : index
    %13 = vector.load %arg2[%c3, %c0_8, %c0_9] : memref<8x64x32xf32, #tpu.memory_space<vmem>>, vector<1x64x32xf32>
    %14 = vector.shape_cast %13 : vector<1x64x32xf32> to vector<64x32xf32>
    %15 = arith.addf %11, %14 : vector<64x32xf32>
    %16 = arith.maximumf %12, %14 : vector<64x32xf32>
    %c4 = arith.constant 4 : index
    %c0_10 = arith.constant 0 : index
    %c0_11 = arith.constant 0 : index
    %17 = vector.load %arg2[%c4, %c0_10, %c0_11] : memref<8x64x32xf32, #tpu.memory_space<vmem>>, vector<1x64x32xf32>
    %18 = vector.shape_cast %17 : vector<1x64x32xf32> to vector<64x32xf32>
    %19 = arith.addf %15, %18 : vector<64x32xf32>
    %20 = arith.maximumf %16, %18 : vector<64x32xf32>
    %c5 = arith.constant 5 : index
    %c0_12 = arith.constant 0 : index
    %c0_13 = arith.constant 0 : index
    %21 = vector.load %arg2[%c5, %c0_12, %c0_13] : memref<8x64x32xf32, #tpu.memory_space<vmem>>, vector<1x64x32xf32>
    %22 = vector.shape_cast %21 : vector<1x64x32xf32> to vector<64x32xf32>
    %23 = arith.addf %19, %22 : vector<64x32xf32>
    %24 = arith.maximumf %20, %22 : vector<64x32xf32>
    %c6 = arith.constant 6 : index
    %c0_14 = arith.constant 0 : index
    %c0_15 = arith.constant 0 : index
    %25 = vector.load %arg2[%c6, %c0_14, %c0_15] : memref<8x64x32xf32, #tpu.memory_space<vmem>>, vector<1x64x32xf32>
    %26 = vector.shape_cast %25 : vector<1x64x32xf32> to vector<64x32xf32>
    %27 = arith.addf %23, %26 : vector<64x32xf32>
    %28 = arith.maximumf %24, %26 : vector<64x32xf32>
    %c7 = arith.constant 7 : index
    %c0_16 = arith.constant 0 : index
    %c0_17 = arith.constant 0 : index
    %29 = vector.load %arg2[%c7, %c0_16, %c0_17] : memref<8x64x32xf32, #tpu.memory_space<vmem>>, vector<1x64x32xf32>
    %30 = vector.shape_cast %29 : vector<1x64x32xf32> to vector<64x32xf32>
    %31 = arith.addf %27, %30 : vector<64x32xf32>
    %32 = arith.maximumf %28, %30 : vector<64x32xf32>
    %cst = arith.constant 1.250000e-01 : f32
    %33 = vector.broadcast %cst : f32 to vector<64x32xf32>
    %34 = arith.mulf %31, %33 : vector<64x32xf32>
    %c0_18 = arith.constant 0 : index
    %c0_19 = arith.constant 0 : index
    %35 = vector.load %arg3[%c0_18, %c0_19] : memref<227x32xf32, #tpu.memory_space<vmem>>, vector<227x32xf32>
    %36 = vector.extract_strided_slice %35 {offsets = [0, 0], sizes = [32, 32], strides = [1, 1]} : vector<227x32xf32> to vector<32x32xf32>
    %37 = vector.extract_strided_slice %35 {offsets = [32, 0], sizes = [32, 32], strides = [1, 1]} : vector<227x32xf32> to vector<32x32xf32>
    %38 = vector.extract_strided_slice %35 {offsets = [64, 0], sizes = [32, 32], strides = [1, 1]} : vector<227x32xf32> to vector<32x32xf32>
    %39 = vector.extract_strided_slice %35 {offsets = [96, 0], sizes = [32, 32], strides = [1, 1]} : vector<227x32xf32> to vector<32x32xf32>
    %40 = vector.extract_strided_slice %35 {offsets = [128, 0], sizes = [32, 32], strides = [1, 1]} : vector<227x32xf32> to vector<32x32xf32>
    %41 = vector.extract_strided_slice %35 {offsets = [160, 0], sizes = [32, 32], strides = [1, 1]} : vector<227x32xf32> to vector<32x32xf32>
    %42 = vector.extract_strided_slice %35 {offsets = [192, 0], sizes = [32, 32], strides = [1, 1]} : vector<227x32xf32> to vector<32x32xf32>
    %43 = vector.extract_strided_slice %35 {offsets = [224, 0], sizes = [1, 32], strides = [1, 1]} : vector<227x32xf32> to vector<1x32xf32>
    %44 = vector.extract_strided_slice %35 {offsets = [225, 0], sizes = [1, 32], strides = [1, 1]} : vector<227x32xf32> to vector<1x32xf32>
    %45 = vector.extract_strided_slice %35 {offsets = [226, 0], sizes = [1, 32], strides = [1, 1]} : vector<227x32xf32> to vector<1x32xf32>
    %cst_20 = arith.constant dense<0.000000e+00> : vector<64x32xf32>
    %46 = tpu.matmul %34, %36, %cst_20 {dimension_numbers = #tpu.dot_dimension_numbers<[1], [0], [0], [1], [0, 0, 1, 1], [], []>} : vector<64x32xf32>, vector<32x32xf32>, vector<64x32xf32> -> vector<64x32xf32>
    %cst_21 = arith.constant dense<0.000000e+00> : vector<64x32xf32>
    %47 = tpu.matmul %32, %37, %cst_21 {dimension_numbers = #tpu.dot_dimension_numbers<[1], [0], [0], [1], [0, 0, 1, 1], [], []>} : vector<64x32xf32>, vector<32x32xf32>, vector<64x32xf32> -> vector<64x32xf32>
    %48 = arith.addf %46, %47 : vector<64x32xf32>
    %cst_22 = arith.constant dense<0.000000e+00> : vector<64x32xf32>
    %49 = tpu.matmul %1, %38, %cst_22 {dimension_numbers = #tpu.dot_dimension_numbers<[1], [0], [0], [1], [0, 0, 1, 1], [], []>} : vector<64x32xf32>, vector<32x32xf32>, vector<64x32xf32> -> vector<64x32xf32>
    %50 = arith.addf %48, %49 : vector<64x32xf32>
    %51 = vector.broadcast %43 : vector<1x32xf32> to vector<64x32xf32>
    %52 = arith.addf %50, %51 : vector<64x32xf32>
    %cst_23 = arith.constant dense<0.000000e+00> : vector<64x32xf32>
    %53 = tpu.matmul %52, %39, %cst_23 {dimension_numbers = #tpu.dot_dimension_numbers<[1], [0], [0], [1], [0, 0, 1, 1], [], []>} : vector<64x32xf32>, vector<32x32xf32>, vector<64x32xf32> -> vector<64x32xf32>
    %cst_24 = arith.constant dense<0.000000e+00> : vector<64x32xf32>
    %54 = tpu.matmul %2, %40, %cst_24 {dimension_numbers = #tpu.dot_dimension_numbers<[1], [0], [0], [1], [0, 0, 1, 1], [], []>} : vector<64x32xf32>, vector<32x32xf32>, vector<64x32xf32> -> vector<64x32xf32>
    %55 = arith.addf %53, %54 : vector<64x32xf32>
    %cst_25 = arith.constant dense<0.000000e+00> : vector<64x32xf32>
    %56 = tpu.matmul %1, %41, %cst_25 {dimension_numbers = #tpu.dot_dimension_numbers<[1], [0], [0], [1], [0, 0, 1, 1], [], []>} : vector<64x32xf32>, vector<32x32xf32>, vector<64x32xf32> -> vector<64x32xf32>
    %57 = arith.addf %55, %56 : vector<64x32xf32>
    %58 = vector.broadcast %44 : vector<1x32xf32> to vector<64x32xf32>
    %59 = arith.addf %57, %58 : vector<64x32xf32>
    %cst_26 = arith.constant 0.000000e+00 : f32
    %60 = vector.broadcast %cst_26 : f32 to vector<64x32xf32>
    %61 = arith.cmpf ogt, %59, %60 : vector<64x32xf32>
    %cst_27 = arith.constant 0.000000e+00 : f32
    %62 = vector.broadcast %cst_27 : f32 to vector<64x32xf32>
    %63 = arith.minimumf %59, %62 : vector<64x32xf32>
    %64 = math.exp %63 : vector<64x32xf32>
    %cst_28 = arith.constant 1.000000e+00 : f32
    %65 = vector.broadcast %cst_28 : f32 to vector<64x32xf32>
    %66 = arith.subf %64, %65 : vector<64x32xf32>
    %67 = arith.select %61, %59, %66 : vector<64x32xi1>, vector<64x32xf32>
    %cst_29 = arith.constant dense<0.000000e+00> : vector<64x32xf32>
    %68 = tpu.matmul %67, %42, %cst_29 {dimension_numbers = #tpu.dot_dimension_numbers<[1], [0], [0], [1], [0, 0, 1, 1], [], []>} : vector<64x32xf32>, vector<32x32xf32>, vector<64x32xf32> -> vector<64x32xf32>
    %69 = vector.broadcast %45 : vector<1x32xf32> to vector<64x32xf32>
    %70 = arith.addf %68, %69 : vector<64x32xf32>
    %cst_30 = arith.constant 0.000000e+00 : f32
    %71 = vector.broadcast %cst_30 : f32 to vector<64x32xf32>
    %72 = arith.cmpf ogt, %70, %71 : vector<64x32xf32>
    %cst_31 = arith.constant 0.000000e+00 : f32
    %73 = vector.broadcast %cst_31 : f32 to vector<64x32xf32>
    %74 = arith.minimumf %70, %73 : vector<64x32xf32>
    %75 = math.exp %74 : vector<64x32xf32>
    %cst_32 = arith.constant 1.000000e+00 : f32
    %76 = vector.broadcast %cst_32 : f32 to vector<64x32xf32>
    %77 = arith.subf %75, %76 : vector<64x32xf32>
    %78 = arith.select %72, %70, %77 : vector<64x32xi1>, vector<64x32xf32>
    %c0_33 = arith.constant 0 : index
    %c0_34 = arith.constant 0 : index
    %79 = vector.load %arg4[%c0_33, %c0_34] : memref<64x32xf32, #tpu.memory_space<vmem>>, vector<64x32xf32>
    tpu.vector_store %arg4[%c0_33, %c0_34], %78 {strides = array<i32>} : memref<64x32xf32, #tpu.memory_space<vmem>>, vector<64x32xf32>,
    %cst_35 = arith.constant dense<0.000000e+00> : vector<32xf32>
    %80 = vector.multi_reduction <add>, %78, %cst_35 [0] : vector<64x32xf32> to vector<32xf32>
    %81 = vector.shape_cast %80 : vector<32xf32> to vector<1x32xf32>
    %82 = arith.mulf %78, %78 : vector<64x32xf32>
    %cst_36 = arith.constant dense<0.000000e+00> : vector<32xf32>
    %83 = vector.multi_reduction <add>, %82, %cst_36 [0] : vector<64x32xf32> to vector<32xf32>
    %84 = vector.shape_cast %83 : vector<32xf32> to vector<1x32xf32>
    %85 = tpu.concatenate %81, %84 in 0 : vector<1x32xf32>, vector<1x32xf32> -> vector<2x32xf32>
    %c0_37 = arith.constant 0 : index
    %c0_38 = arith.constant 0 : index
    %c0_39 = arith.constant 0 : index
    %86 = vector.load %arg5[%c0_37, %c0_38, %c0_39] : memref<1x2x32xf32, #tpu.memory_space<vmem>>, vector<1x2x32xf32>
    %87 = vector.shape_cast %86 : vector<1x2x32xf32> to vector<2x32xf32>
    %88 = vector.shape_cast %85 : vector<2x32xf32> to vector<1x2x32xf32>
    tpu.vector_store %arg5[%c0_37, %c0_38, %c0_39], %88 {strides = array<i32>} : memref<1x2x32xf32, #tpu.memory_space<vmem>>, vector<1x2x32xf32>,
    return
  }
  func.func @transform_0(%arg0: i32) -> (i32, i32) {
    %c0_i32 = arith.constant 0 : i32
    %c0_i32_0 = arith.constant 0 : i32
    return %arg0, %c0_i32 : i32, i32
  }
  func.func @transform_1(%arg0: i32) -> (i32, i32, i32) {
    %c0_i32 = arith.constant 0 : i32
    %c0_i32_0 = arith.constant 0 : i32
    %c0_i32_1 = arith.constant 0 : i32
    return %c0_i32, %arg0, %c0_i32_0 : i32, i32, i32
  }
  func.func @transform_2(%arg0: i32) -> (i32, i32) {
    %c0_i32 = arith.constant 0 : i32
    %c0_i32_0 = arith.constant 0 : i32
    %c0_i32_1 = arith.constant 0 : i32
    return %c0_i32, %c0_i32_0 : i32, i32
  }
  func.func @transform_3(%arg0: i32) -> (i32, i32) {
    %c0_i32 = arith.constant 0 : i32
    %c0_i32_0 = arith.constant 0 : i32
    return %arg0, %c0_i32 : i32, i32
  }
  func.func @transform_4(%arg0: i32) -> (i32, i32, i32) {
    %c0_i32 = arith.constant 0 : i32
    %c0_i32_0 = arith.constant 0 : i32
    %c0_i32_1 = arith.constant 0 : i32
    return %arg0, %c0_i32, %c0_i32_0 : i32, i32, i32
  }
}

</mosaic_0001>

<bundles_post_ra>
// kernel: approx_top_k.22
= control target key start
LH: loop header
LB: loop body
LE: loop exit
PB: predicated region body
PF: predicated region fallthrough
CT: control target
= control target key end

     0   :  { %v125_v3 = vlaneseq  ;;  %s7187_s0 = inlined_call_operand.vmem [shape: f32[64,64], index: 0, kind: input, shape index: {}]   ;;  %s7188_s1 = inlined_call_operand.vmem [shape: s32[64,64], index: 1, kind: input, shape index: {}]   ;;  %s7189_s2 = inlined_call_operand.vmem [shape: f32[64,64], index: 2, kind: output, shape index: {0}]   ;;  %s7190_s3 = inlined_call_operand.vmem [shape: s32[64,64], index: 3, kind: output, shape index: {1}]  }
   0x1   :  { %v46_v0 = vld [vmem:[%s7187_s0] sm:$0xff]  ;;  %v48_v1 = vld [vmem:[%s7187_s0 + $0x8] sm:$0xff]  ;;  %v5117_v2 = vld [vmem:[%s7187_s0 + $0x10] sm:$0xff] }
   0x2   :  { %47 = vst [vmem:[#allocation0] sm:$0xff] %v46_v0  ;;  %49 = vst [vmem:[#allocation0 + $0x8] sm:$0xff] %v48_v1  ;;  %v5123_v4 = vld [vmem:[%s7187_s0 + $0x18] sm:$0xff]  ;;  %v5128_v5 = vld [vmem:[%s7187_s0 + $0x20] sm:$0xff]  ;;  %v5151_v10 = vshrl.u32 %v125_v3, 7 }
   0x3   :  { %51 = vst [vmem:[#allocation0 + $0x10] sm:$0xff] %v5117_v2  ;;  %v5133_v6 = vld [vmem:[%s7187_s0 + $0x28] sm:$0xff]  ;;  %53 = vst [vmem:[#allocation0 + $0x18] sm:$0xff] %v5123_v4  ;;  %v5141_v7 = vld [vmem:[%s7187_s0 + $0x30] sm:$0xff] }
   0x4   :  { %55 = vst [vmem:[#allocation0 + $0x20] sm:$0xff] %v5128_v5  ;;  %57 = vst [vmem:[#allocation0 + $0x28] sm:$0xff] %v5133_v6  ;;  %v5146_v8 = vld [vmem:[%s7187_s0 + $0x38] sm:$0xff]  ;;  %v106_v9 = vld [vmem:[%s7188_s1] sm:$0xff]  ;;  %v127_v17 = vand.u32 1, %v5151_v10  ;;  %v387_v20 = vand.u32 2, %v5151_v10 }
   0x5   :  { %59 = vst [vmem:[#allocation0 + $0x30] sm:$0xff] %v5141_v7  ;;  %61 = vst [vmem:[#allocation0 + $0x38] sm:$0xff] %v5146_v8  ;;  %v108_v11 = vld [vmem:[%s7188_s1 + $0x8] sm:$0xff]  ;;  %v110_v12 = vld [vmem:[%s7188_s1 + $0x10] sm:$0xff]  ;;  %v907_v21 = vand.u32 4, %v5151_v10 }
   0x6   :  { %107 = vst [vmem:[#allocation2] sm:$0xff] %v106_v9  ;;  %v5164_v13 = vld [vmem:[%s7188_s1 + $0x18] sm:$0xff]  ;;  %109 = vst [vmem:[#allocation2 + $0x8] sm:$0xff] %v108_v11  ;;  %v5170_v14 = vld [vmem:[%s7188_s1 + $0x20] sm:$0xff]  ;;  %vm5192_vm0 = vcmp.eq.s32.totalorder %v127_v17, 0  ;;  %vm5262_vm13 = vcmp.eq.s32.totalorder %v387_v20, 0 }
   0x7   :  { %111 = vst [vmem:[#allocation2 + $0x10] sm:$0xff] %v110_v12  ;;  %113 = vst [vmem:[#allocation2 + $0x18] sm:$0xff] %v5164_v13  ;;  %v5175_v15 = vld [vmem:[%s7188_s1 + $0x28] sm:$0xff]  ;;  %v5180_v16 = vld [vmem:[%s7188_s1 + $0x30] sm:$0xff] }
   0x8   :  { %115 = vst [vmem:[#allocation2 + $0x20] sm:$0xff] %v5170_v14  ;;  %117 = vst [vmem:[#allocation2 + $0x28] sm:$0xff] %v5175_v15  ;;  %v5189_v18 = vld [vmem:[%s7188_s1 + $0x38] sm:$0xff] }
   0x9   :  { %119 = vst [vmem:[#allocation2 + $0x30] sm:$0xff] %v5180_v16  ;;  %121 = vst [vmem:[#allocation2 + $0x38] sm:$0xff] %v5189_v18  ;;  %v132_v22 = vld.sshfl [vmem:[#allocation0] sm:$0xff pattern:$0x67452301] }
   0xa   :  { %v164_v23 = vld.sshfl [vmem:[#allocation0 + $0x8] sm:$0xff pattern:$0x67452301]  ;;  %vm139_vm1 = vcmp.gt.f32.partialorder %v132_v22, %v46_v0  ;;  %vm144_vm2 = vcmp.gt.f32.partialorder %v46_v0, %v132_v22  ;;  %v196_v24 = vld.sshfl [vmem:[#allocation0 + $0x10] sm:$0xff pattern:$0x67452301] }
   0xb   :  { %vm171_vm3 = vcmp.gt.f32.partialorder %v164_v23, %v48_v1  ;;  %vm176_vm4 = vcmp.gt.f32.partialorder %v48_v1, %v164_v23  ;;  %v149_v26 = vsel %vm139_vm1, %v132_v22, %v46_v0  ;;  %v150_v27 = vsel %vm144_vm2, %v132_v22, %v46_v0  ;;  %v228_v30 = vld.sshfl [vmem:[#allocation0 + $0x18] sm:$0xff pattern:$0x67452301]  ;;  %v260_v44 = vld.sshfl [vmem:[#allocation0 + $0x20] sm:$0xff pattern:$0x67452301] }
   0xc   :  { %v181_v28 = vsel %vm171_vm3, %v164_v23, %v48_v1  ;;  %v182_v29 = vsel %vm176_vm4, %v164_v23, %v48_v1  ;;  %v5202_v31 = vsel %vm5192_vm0, %v149_v26, %v150_v27  ;;  %vm203_vm5 = vcmp.gt.f32.partialorder %v196_v24, %v5117_v2  ;;  %v292_v52 = vld.sshfl [vmem:[#allocation0 + $0x28] sm:$0xff pattern:$0x67452301]  ;;  %v324_v60 = vld.sshfl [vmem:[#allocation0 + $0x30] sm:$0xff pattern:$0x67452301] }
   0xd   :  { %v136_v25 = vld.sshfl [vmem:[#allocation2] sm:$0xff pattern:$0x67452301]  ;;  %v168_v34 = vld.sshfl [vmem:[#allocation2 + $0x8] sm:$0xff pattern:$0x67452301]  ;;  %v5206_v35 = vsel %vm5192_vm0, %v181_v28, %v182_v29  ;;  %vm208_vm6 = vcmp.gt.f32.partialorder %v5117_v2, %v196_v24  ;;  %v213_v41 = vsel %vm203_vm5, %v196_v24, %v5117_v2  ;;  %vm235_vm7 = vcmp.gt.f32.partialorder %v228_v30, %v5123_v4 }
   0xe   :  { %v155_v32 = vsel %vm139_vm1, %v136_v25, %v106_v9  ;;  %v156_v33 = vsel %vm144_vm2, %v136_v25, %v106_v9  ;;  %v200_v36 = vld.sshfl [vmem:[#allocation2 + $0x10] sm:$0xff pattern:$0x67452301]  ;;  %154 = vst [vmem:[#allocation1] sm:$0xff] %v5202_v31  ;;  %186 = vst [vmem:[#allocation1 + $0x8] sm:$0xff] %v5206_v35  ;;  %v187_v38 = vsel %vm171_vm3, %v168_v34, %v108_v11 }
   0xf   :  { %v5211_v37 = vsel %vm5192_vm0, %v155_v32, %v156_v33  ;;  %v188_v39 = vsel %vm176_vm4, %v168_v34, %v108_v11  ;;  %v219_v42 = vsel %vm203_vm5, %v200_v36, %v110_v12  ;;  %v232_v43 = vld.sshfl [vmem:[#allocation2 + $0x18] sm:$0xff pattern:$0x67452301]  ;;  %v214_v45 = vsel %vm208_vm6, %v196_v24, %v5117_v2  ;;  %v264_v47 = vld.sshfl [vmem:[#allocation2 + $0x20] sm:$0xff pattern:$0x67452301] }
  0x10   :  { %160 = vst [vmem:[#allocation3] sm:$0xff] %v5211_v37  ;;  %v5220_v40 = vsel %vm5192_vm0, %v187_v38, %v188_v39  ;;  %v220_v46 = vsel %vm208_vm6, %v200_v36, %v110_v12  ;;  %vm240_vm8 = vcmp.gt.f32.partialorder %v5123_v4, %v228_v30  ;;  %v5230_v48 = vsel %vm5192_vm0, %v213_v41, %v214_v45  ;;  %v296_v59 = vld.sshfl [vmem:[#allocation2 + $0x28] sm:$0xff pattern:$0x67452301] }
  0x11   :  { %192 = vst [vmem:[#allocation3 + $0x8] sm:$0xff] %v5220_v40  ;;  %v5234_v49 = vsel %vm5192_vm0, %v219_v42, %v220_v46  ;;  %v245_v50 = vsel %vm235_vm7, %v228_v30, %v5123_v4  ;;  %v246_v51 = vsel %vm240_vm8, %v228_v30, %v5123_v4  ;;  %218 = vst [vmem:[#allocation1 + $0x10] sm:$0xff] %v5230_v48  ;;  %v328_v63 = vld.sshfl [vmem:[#allocation2 + $0x30] sm:$0xff pattern:$0x67452301] }
  0x12   :  { %224 = vst [vmem:[#allocation3 + $0x10] sm:$0xff] %v5234_v49  ;;  %v5242_v53 = vsel %vm5192_vm0, %v245_v50, %v246_v51  ;;  %v251_v54 = vsel %vm235_vm7, %v232_v43, %v5164_v13  ;;  %v252_v55 = vsel %vm240_vm8, %v232_v43, %v5164_v13  ;;  %vm267_vm9 = vcmp.gt.f32.partialorder %v260_v44, %v5128_v5 }
  0x13   :  { %250 = vst [vmem:[#allocation1 + $0x18] sm:$0xff] %v5242_v53  ;;  %v5250_v56 = vsel %vm5192_vm0, %v251_v54, %v252_v55  ;;  %vm272_vm10 = vcmp.gt.f32.partialorder %v5128_v5, %v260_v44  ;;  %v277_v57 = vsel %vm267_vm9, %v260_v44, %v5128_v5  ;;  %v283_v58 = vsel %vm267_vm9, %v264_v47, %v5170_v14 }
  0x14   :  { %256 = vst [vmem:[#allocation3 + $0x18] sm:$0xff] %v5250_v56  ;;  %v278_v61 = vsel %vm272_vm10, %v260_v44, %v5128_v5  ;;  %v284_v62 = vsel %vm272_vm10, %v264_v47, %v5170_v14  ;;  %vm299_vm11 = vcmp.gt.f32.partialorder %v292_v52, %v5133_v6  ;;  %vm304_vm12 = vcmp.gt.f32.partialorder %v5133_v6, %v292_v52  ;;  %v356_v5 = vld.sshfl [vmem:[#allocation0 + $0x38] sm:$0xff pattern:$0x67452301] }
  0x15   :  { %v5268_v1 = vsel %vm5192_vm0, %v277_v57, %v278_v61  ;;  %v5272_v2 = vsel %vm5192_vm0, %v283_v58, %v284_v62  ;;  %v309_v3 = vsel %vm299_vm11, %v292_v52, %v5133_v6  ;;  %v310_v4 = vsel %vm304_vm12, %v292_v52, %v5133_v6  ;;  %v392_v17 = vld.sshfl [vmem:[#allocation1] sm:$0xff pattern:$0x45670123]  ;;  %v424_v25 = vld.sshfl [vmem:[#allocation1 + $0x8] sm:$0xff pattern:$0x45670123] }
  0x16   :  { %282 = vst [vmem:[#allocation1 + $0x20] sm:$0xff] %v5268_v1  ;;  %288 = vst [vmem:[#allocation3 + $0x20] sm:$0xff] %v5272_v2  ;;  %v5280_v6 = vsel %vm5192_vm0, %v309_v3, %v310_v4  ;;  %v315_v9 = vsel %vm299_vm11, %v296_v59, %v5175_v15  ;;  %v316_v11 = vsel %vm304_vm12, %v296_v59, %v5175_v15  ;;  %v360_v15 = vld.sshfl [vmem:[#allocation2 + $0x38] sm:$0xff pattern:$0x67452301] }
  0x17   :  { %vm331_vm14 = vcmp.gt.f32.partialorder %v324_v60, %v5141_v7  ;;  %314 = vst [vmem:[#allocation1 + $0x28] sm:$0xff] %v5280_v6  ;;  %v5288_v12 = vsel %vm5192_vm0, %v315_v9, %v316_v11  ;;  %vm336_vm15 = vcmp.gt.f32.partialorder %v5141_v7, %v324_v60  ;;  %vm363_vm1 = vcmp.gt.f32.partialorder %v356_v5, %v5146_v8  ;;  %v396_v20 = vld.sshfl [vmem:[#allocation3] sm:$0xff pattern:$0x45670123] }
  0x18   :  { %v341_v13 = vsel %vm331_vm14, %v324_v60, %v5141_v7  ;;  %v347_v14 = vsel %vm331_vm14, %v328_v63, %v5180_v16  ;;  %320 = vst [vmem:[#allocation3 + $0x28] sm:$0xff] %v5288_v12  ;;  %v342_v7 = vsel %vm336_vm15, %v324_v60, %v5141_v7  ;;  %v348_v16 = vsel %vm336_vm15, %v328_v63, %v5180_v16  ;;  %v428_v32 = vld.sshfl [vmem:[#allocation3 + $0x8] sm:$0xff pattern:$0x45670123] }
  0x19   :  { %vm368_vm2 = vcmp.gt.f32.partialorder %v5146_v8, %v356_v5  ;;  %v5300_v22 = vsel %vm5192_vm0, %v341_v13, %v342_v7  ;;  %v5304_v23 = vsel %vm5192_vm0, %v347_v14, %v348_v16  ;;  %v373_v24 = vsel %vm363_vm1, %v356_v5, %v5146_v8  ;;  %v456_v33 = vld.sshfl [vmem:[#allocation1 + $0x10] sm:$0xff pattern:$0x45670123] }
  0x1a   :  { %v374_v8 = vsel %vm368_vm2, %v356_v5, %v5146_v8  ;;  %346 = vst [vmem:[#allocation1 + $0x30] sm:$0xff] %v5300_v22  ;;  %352 = vst [vmem:[#allocation3 + $0x30] sm:$0xff] %v5304_v23  ;;  %v379_v27 = vsel %vm363_vm1, %v360_v15, %v5189_v18  ;;  %v380_v18 = vsel %vm368_vm2, %v360_v15, %v5189_v18  ;;  %v460_v36 = vld.sshfl [vmem:[#allocation3 + $0x10] sm:$0xff pattern:$0x45670123] }
  0x1b   :  { %v5312_v26 = vsel %vm5192_vm0, %v373_v24, %v374_v8  ;;  %vm399_vm3 = vcmp.gt.f32.partialorder %v392_v17, %v5202_v31  ;;  %v5320_v28 = vsel %vm5192_vm0, %v379_v27, %v380_v18  ;;  %vm404_vm4 = vcmp.gt.f32.partialorder %v5202_v31, %v392_v17  ;;  %v488_v41 = vld.sshfl [vmem:[#allocation1 + $0x18] sm:$0xff pattern:$0x45670123] }
  0x1c   :  { %378 = vst [vmem:[#allocation1 + $0x38] sm:$0xff] %v5312_v26  ;;  %v409_v29 = vsel %vm399_vm3, %v392_v17, %v5202_v31  ;;  %v415_v30 = vsel %vm399_vm3, %v396_v20, %v5211_v37  ;;  %384 = vst [vmem:[#allocation3 + $0x38] sm:$0xff] %v5320_v28  ;;  %v410_v31 = vsel %vm404_vm4, %v392_v17, %v5202_v31  ;;  %v492_v47 = vld.sshfl [vmem:[#allocation3 + $0x18] sm:$0xff pattern:$0x45670123] }
  0x1d   :  { %v416_v34 = vsel %vm404_vm4, %v396_v20, %v5211_v37  ;;  %vm431_vm5 = vcmp.gt.f32.partialorder %v424_v25, %v5206_v35  ;;  %vm436_vm6 = vcmp.gt.f32.partialorder %v5206_v35, %v424_v25  ;;  %v5332_v37 = vsel %vm5262_vm13, %v409_v29, %v410_v31  ;;  %v520_v50 = vld.sshfl [vmem:[#allocation1 + $0x20] sm:$0xff pattern:$0x45670123] }
  0x1e   :  { %v5336_v38 = vsel %vm5262_vm13, %v415_v30, %v416_v34  ;;  %v441_v39 = vsel %vm431_vm5, %v424_v25, %v5206_v35  ;;  %v442_v35 = vsel %vm436_vm6, %v424_v25, %v5206_v35  ;;  %414 = vst [vmem:[#allocation1] sm:$0xff] %v5332_v37  ;;  %v447_v43 = vsel %vm431_vm5, %v428_v32, %v5220_v40  ;;  %v524_v51 = vld.sshfl [vmem:[#allocation3 + $0x20] sm:$0xff pattern:$0x45670123] }
  0x1f   :  { %420 = vst [vmem:[#allocation3] sm:$0xff] %v5336_v38  ;;  %v5344_v42 = vsel %vm5262_vm13, %v441_v39, %v442_v35  ;;  %v448_v40 = vsel %vm436_vm6, %v428_v32, %v5220_v40  ;;  %vm463_vm7 = vcmp.gt.f32.partialorder %v456_v33, %v5230_v48  ;;  %vm468_vm8 = vcmp.gt.f32.partialorder %v5230_v48, %v456_v33  ;;  %v552_v57 = vld.sshfl [vmem:[#allocation1 + $0x28] sm:$0xff pattern:$0x45670123] }
  0x20   :  { %446 = vst [vmem:[#allocation1 + $0x8] sm:$0xff] %v5344_v42  ;;  %v5352_v44 = vsel %vm5262_vm13, %v447_v43, %v448_v40  ;;  %v473_v45 = vsel %vm463_vm7, %v456_v33, %v5230_v48  ;;  %v479_v46 = vsel %vm463_vm7, %v460_v36, %v5234_v49  ;;  %v474_v48 = vsel %vm468_vm8, %v456_v33, %v5230_v48  ;;  %v556_v63 = vld.sshfl [vmem:[#allocation3 + $0x28] sm:$0xff pattern:$0x45670123] }
  0x21   :  { %452 = vst [vmem:[#allocation3 + $0x8] sm:$0xff] %v5352_v44  ;;  %v480_v49 = vsel %vm468_vm8, %v460_v36, %v5234_v49  ;;  %vm495_vm9 = vcmp.gt.f32.partialorder %v488_v41, %v5242_v53  ;;  %vm500_vm10 = vcmp.gt.f32.partialorder %v5242_v53, %v488_v41  ;;  %v5364_v52 = vsel %vm5262_vm13, %v473_v45, %v474_v48  ;;  %v584_v3 = vld.sshfl [vmem:[#allocation1 + $0x30] sm:$0xff pattern:$0x45670123] }
  0x22   :  { %v5368_v54 = vsel %vm5262_vm13, %v479_v46, %v480_v49  ;;  %v505_v55 = vsel %vm495_vm9, %v488_v41, %v5242_v53  ;;  %v506_v53 = vsel %vm500_vm10, %v488_v41, %v5242_v53  ;;  %478 = vst [vmem:[#allocation1 + $0x10] sm:$0xff] %v5364_v52  ;;  %v511_v59 = vsel %vm495_vm9, %v492_v47, %v5250_v56  ;;  %v588_v4 = vld.sshfl [vmem:[#allocation3 + $0x30] sm:$0xff pattern:$0x45670123] }
  0x23   :  { %484 = vst [vmem:[#allocation3 + $0x10] sm:$0xff] %v5368_v54  ;;  %v5376_v58 = vsel %vm5262_vm13, %v505_v55, %v506_v53  ;;  %v512_v56 = vsel %vm500_vm10, %v492_v47, %v5250_v56  ;;  %vm527_vm11 = vcmp.gt.f32.partialorder %v520_v50, %v5268_v1  ;;  %vm532_vm12 = vcmp.gt.f32.partialorder %v5268_v1, %v520_v50  ;;  %v616_v13 = vld.sshfl [vmem:[#allocation1 + $0x38] sm:$0xff pattern:$0x45670123] }
  0x24   :  { %510 = vst [vmem:[#allocation1 + $0x18] sm:$0xff] %v5376_v58  ;;  %v5384_v60 = vsel %vm5262_vm13, %v511_v59, %v512_v56  ;;  %v537_v61 = vsel %vm527_vm11, %v520_v50, %v5268_v1  ;;  %v543_v62 = vsel %vm527_vm11, %v524_v51, %v5272_v2  ;;  %v538_v1 = vsel %vm532_vm12, %v520_v50, %v5268_v1  ;;  %v620_v20 = vld.sshfl [vmem:[#allocation3 + $0x38] sm:$0xff pattern:$0x45670123] }
  0x25   :  { %516 = vst [vmem:[#allocation3 + $0x18] sm:$0xff] %v5384_v60  ;;  %v544_v2 = vsel %vm532_vm12, %v524_v51, %v5272_v2  ;;  %vm559_vm14 = vcmp.gt.f32.partialorder %v552_v57, %v5280_v6  ;;  %vm564_vm15 = vcmp.gt.f32.partialorder %v5280_v6, %v552_v57  ;;  %v5396_v5 = vsel %vm5262_vm13, %v537_v61, %v538_v1  ;;  %v652_v24 = vld.sshfl [vmem:[#allocation1] sm:$0xff pattern:$0x67452301] }
  0x26   :  { %v5400_v9 = vsel %vm5262_vm13, %v543_v62, %v544_v2  ;;  %v569_v11 = vsel %vm559_vm14, %v552_v57, %v5280_v6  ;;  %v570_v6 = vsel %vm564_vm15, %v552_v57, %v5280_v6  ;;  %542 = vst [vmem:[#allocation1 + $0x20] sm:$0xff] %v5396_v5  ;;  %v575_v15 = vsel %vm559_vm14, %v556_v63, %v5288_v12  ;;  %v656_v8 = vld.sshfl [vmem:[#allocation3] sm:$0xff pattern:$0x67452301] }
  0x27   :  { %548 = vst [vmem:[#allocation3 + $0x20] sm:$0xff] %v5400_v9  ;;  %v5408_v14 = vsel %vm5262_vm13, %v569_v11, %v570_v6  ;;  %v576_v12 = vsel %vm564_vm15, %v556_v63, %v5288_v12  ;;  %vm591_vm1 = vcmp.gt.f32.partialorder %v584_v3, %v5300_v22  ;;  %vm596_vm2 = vcmp.gt.f32.partialorder %v5300_v22, %v584_v3  ;;  %v684_v29 = vld.sshfl [vmem:[#allocation1 + $0x8] sm:$0xff pattern:$0x67452301] }
  0x28   :  { %574 = vst [vmem:[#allocation1 + $0x28] sm:$0xff] %v5408_v14  ;;  %v5416_v17 = vsel %vm5262_vm13, %v575_v15, %v576_v12  ;;  %v601_v7 = vsel %vm591_vm1, %v584_v3, %v5300_v22  ;;  %v607_v16 = vsel %vm591_vm1, %v588_v4, %v5304_v23  ;;  %v602_v22 = vsel %vm596_vm2, %v584_v3, %v5300_v22  ;;  %v688_v36 = vld.sshfl [vmem:[#allocation3 + $0x8] sm:$0xff pattern:$0x67452301] }
  0x29   :  { %580 = vst [vmem:[#allocation3 + $0x28] sm:$0xff] %v5416_v17  ;;  %v608_v23 = vsel %vm596_vm2, %v588_v4, %v5304_v23  ;;  %vm623_vm3 = vcmp.gt.f32.partialorder %v616_v13, %v5312_v26  ;;  %vm628_vm4 = vcmp.gt.f32.partialorder %v5312_v26, %v616_v13  ;;  %v5428_v25 = vsel %vm5262_vm13, %v601_v7, %v602_v22  ;;  %v716_v39 = vld.sshfl [vmem:[#allocation1 + $0x10] sm:$0xff pattern:$0x67452301] }
  0x2a   :  { %v5432_v27 = vsel %vm5262_vm13, %v607_v16, %v608_v23  ;;  %v633_v18 = vsel %vm623_vm3, %v616_v13, %v5312_v26  ;;  %v634_v26 = vsel %vm628_vm4, %v616_v13, %v5312_v26  ;;  %606 = vst [vmem:[#allocation1 + $0x30] sm:$0xff] %v5428_v25  ;;  %v639_v32 = vsel %vm623_vm3, %v620_v20, %v5320_v28  ;;  %v720_v35 = vld.sshfl [vmem:[#allocation3 + $0x10] sm:$0xff pattern:$0x67452301] }
  0x2b   :  { %612 = vst [vmem:[#allocation3 + $0x30] sm:$0xff] %v5432_v27  ;;  %v5440_v30 = vsel %vm5262_vm13, %v633_v18, %v634_v26  ;;  %v640_v28 = vsel %vm628_vm4, %v620_v20, %v5320_v28  ;;  %vm659_vm5 = vcmp.gt.f32.partialorder %v652_v24, %v5332_v37  ;;  %vm664_vm6 = vcmp.gt.f32.partialorder %v5332_v37, %v652_v24  ;;  %v748_v45 = vld.sshfl [vmem:[#allocation1 + $0x18] sm:$0xff pattern:$0x67452301] }
  0x2c   :  { %638 = vst [vmem:[#allocation1 + $0x38] sm:$0xff] %v5440_v30  ;;  %v5448_v33 = vsel %vm5262_vm13, %v639_v32, %v640_v28  ;;  %v669_v31 = vsel %vm659_vm5, %v652_v24, %v5332_v37  ;;  %v675_v34 = vsel %vm659_vm5, %v656_v8, %v5336_v38  ;;  %v670_v37 = vsel %vm664_vm6, %v652_v24, %v5332_v37  ;;  %v752_v51 = vld.sshfl [vmem:[#allocation3 + $0x18] sm:$0xff pattern:$0x67452301] }
  0x2d   :  { %644 = vst [vmem:[#allocation3 + $0x38] sm:$0xff] %v5448_v33  ;;  %v676_v38 = vsel %vm664_vm6, %v656_v8, %v5336_v38  ;;  %vm691_vm7 = vcmp.gt.f32.partialorder %v684_v29, %v5344_v42  ;;  %vm696_vm8 = vcmp.gt.f32.partialorder %v5344_v42, %v684_v29  ;;  %v5460_v41 = vsel %vm5192_vm0, %v669_v31, %v670_v37  ;;  %v780_v55 = vld.sshfl [vmem:[#allocation1 + $0x20] sm:$0xff pattern:$0x67452301] }
  0x2e   :  { %v5464_v43 = vsel %vm5192_vm0, %v675_v34, %v676_v38  ;;  %v701_v40 = vsel %vm691_vm7, %v684_v29, %v5344_v42  ;;  %v702_v42 = vsel %vm696_vm8, %v684_v29, %v5344_v42  ;;  %674 = vst [vmem:[#allocation1] sm:$0xff] %v5460_v41  ;;  %v707_v47 = vsel %vm691_vm7, %v688_v36, %v5352_v44  ;;  %v784_v53 = vld.sshfl [vmem:[#allocation3 + $0x20] sm:$0xff pattern:$0x67452301] }
  0x2f   :  { %680 = vst [vmem:[#allocation3] sm:$0xff] %v5464_v43  ;;  %v5472_v46 = vsel %vm5192_vm0, %v701_v40, %v702_v42  ;;  %v708_v44 = vsel %vm696_vm8, %v688_v36, %v5352_v44  ;;  %vm723_vm9 = vcmp.gt.f32.partialorder %v716_v39, %v5364_v52  ;;  %vm728_vm10 = vcmp.gt.f32.partialorder %v5364_v52, %v716_v39  ;;  %v812_v61 = vld.sshfl [vmem:[#allocation1 + $0x28] sm:$0xff pattern:$0x67452301] }
  0x30   :  { %706 = vst [vmem:[#allocation1 + $0x8] sm:$0xff] %v5472_v46  ;;  %v5480_v50 = vsel %vm5192_vm0, %v707_v47, %v708_v44  ;;  %v733_v48 = vsel %vm723_vm9, %v716_v39, %v5364_v52  ;;  %v739_v49 = vsel %vm723_vm9, %v720_v35, %v5368_v54  ;;  %v734_v52 = vsel %vm728_vm10, %v716_v39, %v5364_v52  ;;  %v816_v4 = vld.sshfl [vmem:[#allocation3 + $0x28] sm:$0xff pattern:$0x67452301] }
  0x31   :  { %712 = vst [vmem:[#allocation3 + $0x8] sm:$0xff] %v5480_v50  ;;  %v740_v54 = vsel %vm728_vm10, %v720_v35, %v5368_v54  ;;  %vm755_vm11 = vcmp.gt.f32.partialorder %v748_v45, %v5376_v58  ;;  %vm760_vm12 = vcmp.gt.f32.partialorder %v5376_v58, %v748_v45  ;;  %v5492_v57 = vsel %vm5192_vm0, %v733_v48, %v734_v52  ;;  %v844_v11 = vld.sshfl [vmem:[#allocation1 + $0x30] sm:$0xff pattern:$0x67452301] }
  0x32   :  { %v5496_v59 = vsel %vm5192_vm0, %v739_v49, %v740_v54  ;;  %v765_v56 = vsel %vm755_vm11, %v748_v45, %v5376_v58  ;;  %v766_v58 = vsel %vm760_vm12, %v748_v45, %v5376_v58  ;;  %738 = vst [vmem:[#allocation1 + $0x10] sm:$0xff] %v5492_v57  ;;  %v771_v63 = vsel %vm755_vm11, %v752_v51, %v5384_v60  ;;  %v848_v6 = vld.sshfl [vmem:[#allocation3 + $0x30] sm:$0xff pattern:$0x67452301] }
  0x33   :  { %744 = vst [vmem:[#allocation3 + $0x10] sm:$0xff] %v5496_v59  ;;  %v5504_v62 = vsel %vm5192_vm0, %v765_v56, %v766_v58  ;;  %v772_v60 = vsel %vm760_vm12, %v752_v51, %v5384_v60  ;;  %vm787_vm14 = vcmp.gt.f32.partialorder %v780_v55, %v5396_v5  ;;  %vm792_vm15 = vcmp.gt.f32.partialorder %v5396_v5, %v780_v55  ;;  %v876_v12 = vld.sshfl [vmem:[#allocation1 + $0x38] sm:$0xff pattern:$0x67452301] }
  0x34   :  { %770 = vst [vmem:[#allocation1 + $0x18] sm:$0xff] %v5504_v62  ;;  %v5512_v3 = vsel %vm5192_vm0, %v771_v63, %v772_v60  ;;  %v797_v1 = vsel %vm787_vm14, %v780_v55, %v5396_v5  ;;  %v803_v2 = vsel %vm787_vm14, %v784_v53, %v5400_v9  ;;  %v798_v5 = vsel %vm792_vm15, %v780_v55, %v5396_v5  ;;  %v880_v23 = vld.sshfl [vmem:[#allocation3 + $0x38] sm:$0xff pattern:$0x67452301] }
  0x35   :  { %776 = vst [vmem:[#allocation3 + $0x18] sm:$0xff] %v5512_v3  ;;  %v804_v9 = vsel %vm792_vm15, %v784_v53, %v5400_v9  ;;  %vm819_vm1 = vcmp.gt.f32.partialorder %v812_v61, %v5408_v14  ;;  %vm824_vm2 = vcmp.gt.f32.partialorder %v5408_v14, %v812_v61  ;;  %vm5524_vm3 = vcmp.eq.s32.totalorder %v907_v21, 0  ;;  %v912_v8 = vld.sshfl [vmem:[#allocation1] sm:$0xff pattern:$0x1234567] }
  0x36   :  { %v5530_v21 = vsel %vm5192_vm0, %v797_v1, %v798_v5  ;;  %v5534_v13 = vsel %vm5192_vm0, %v803_v2, %v804_v9  ;;  %v829_v15 = vsel %vm819_vm1, %v812_v61, %v5408_v14  ;;  %v830_v14 = vsel %vm824_vm2, %v812_v61, %v5408_v14  ;;  %v916_v18 = vld.sshfl [vmem:[#allocation3] sm:$0xff pattern:$0x1234567] }
  0x37   :  { %802 = vst [vmem:[#allocation1 + $0x20] sm:$0xff] %v5530_v21  ;;  %808 = vst [vmem:[#allocation3 + $0x20] sm:$0xff] %v5534_v13  ;;  %v5542_v7 = vsel %vm5192_vm0, %v829_v15, %v830_v14  ;;  %v835_v16 = vsel %vm819_vm1, %v816_v4, %v5416_v17  ;;  %v836_v17 = vsel %vm824_vm2, %v816_v4, %v5416_v17  ;;  %v944_v28 = vld.sshfl [vmem:[#allocation1 + $0x8] sm:$0xff pattern:$0x1234567] }
  0x38   :  { %vm851_vm4 = vcmp.gt.f32.partialorder %v844_v11, %v5428_v25  ;;  %834 = vst [vmem:[#allocation1 + $0x28] sm:$0xff] %v5542_v7  ;;  %v5550_v20 = vsel %vm5192_vm0, %v835_v16, %v836_v17  ;;  %vm856_vm5 = vcmp.gt.f32.partialorder %v5428_v25, %v844_v11  ;;  %vm883_vm6 = vcmp.gt.f32.partialorder %v876_v12, %v5440_v30  ;;  %v948_v38 = vld.sshfl [vmem:[#allocation3 + $0x8] sm:$0xff pattern:$0x1234567] }
  0x39   :  { %v861_v24 = vsel %vm851_vm4, %v844_v11, %v5428_v25  ;;  %v867_v22 = vsel %vm851_vm4, %v848_v6, %v5432_v27  ;;  %840 = vst [vmem:[#allocation3 + $0x28] sm:$0xff] %v5550_v20  ;;  %v862_v25 = vsel %vm856_vm5, %v844_v11, %v5428_v25  ;;  %v868_v27 = vsel %vm856_vm5, %v848_v6, %v5432_v27  ;;  %v976_v35 = vld.sshfl [vmem:[#allocation1 + $0x10] sm:$0xff pattern:$0x1234567] }
  0x3a   :  { %vm888_vm7 = vcmp.gt.f32.partialorder %v5440_v30, %v876_v12  ;;  %v5562_v26 = vsel %vm5192_vm0, %v861_v24, %v862_v25  ;;  %v5566_v29 = vsel %vm5192_vm0, %v867_v22, %v868_v27  ;;  %v893_v32 = vsel %vm883_vm6, %v876_v12, %v5440_v30  ;;  %v980_v40 = vld.sshfl [vmem:[#allocation3 + $0x10] sm:$0xff pattern:$0x1234567] }
  0x3b   :  { %v894_v30 = vsel %vm888_vm7, %v876_v12, %v5440_v30  ;;  %866 = vst [vmem:[#allocation1 + $0x30] sm:$0xff] %v5562_v26  ;;  %872 = vst [vmem:[#allocation3 + $0x30] sm:$0xff] %v5566_v29  ;;  %v899_v34 = vsel %vm883_vm6, %v880_v23, %v5448_v33  ;;  %v900_v33 = vsel %vm888_vm7, %v880_v23, %v5448_v33  ;;  %v1008_v44 = vld.sshfl [vmem:[#allocation1 + $0x18] sm:$0xff pattern:$0x1234567] }
  0x3c   :  { %v5574_v31 = vsel %vm5192_vm0, %v893_v32, %v894_v30  ;;  %vm919_vm8 = vcmp.gt.f32.partialorder %v912_v8, %v5460_v41  ;;  %v5582_v36 = vsel %vm5192_vm0, %v899_v34, %v900_v33  ;;  %vm924_vm9 = vcmp.gt.f32.partialorder %v5460_v41, %v912_v8  ;;  %v1012_v54 = vld.sshfl [vmem:[#allocation3 + $0x18] sm:$0xff pattern:$0x1234567] }
  0x3d   :  { %898 = vst [vmem:[#allocation1 + $0x38] sm:$0xff] %v5574_v31  ;;  %v929_v39 = vsel %vm919_vm8, %v912_v8, %v5460_v41  ;;  %v935_v37 = vsel %vm919_vm8, %v916_v18, %v5464_v43  ;;  %904 = vst [vmem:[#allocation3 + $0x38] sm:$0xff] %v5582_v36  ;;  %v930_v41 = vsel %vm924_vm9, %v912_v8, %v5460_v41 }
  0x3e   :  { %v936_v43 = vsel %vm924_vm9, %v916_v18, %v5464_v43  ;;  %vm951_vm10 = vcmp.gt.f32.partialorder %v944_v28, %v5472_v46  ;;  %vm956_vm11 = vcmp.gt.f32.partialorder %v5472_v46, %v944_v28  ;;  %v5594_v42 = vsel %vm5524_vm3, %v929_v39, %v930_v41  ;;  %v1040_v53 = vld.sshfl [vmem:[#allocation1 + $0x20] sm:$0xff pattern:$0x1234567] }
  0x3f   :  { %v5598_v45 = vsel %vm5524_vm3, %v935_v37, %v936_v43  ;;  %v961_v47 = vsel %vm951_vm10, %v944_v28, %v5472_v46  ;;  %v962_v46 = vsel %vm956_vm11, %v944_v28, %v5472_v46  ;;  %934 = vst [vmem:[#allocation1] sm:$0xff] %v5594_v42  ;;  %v967_v49 = vsel %vm951_vm10, %v948_v38, %v5480_v50  ;;  %v1044_v56 = vld.sshfl [vmem:[#allocation3 + $0x20] sm:$0xff pattern:$0x1234567] }
  0x40   :  { %940 = vst [vmem:[#allocation3] sm:$0xff] %v5598_v45  ;;  %v5606_v48 = vsel %vm5524_vm3, %v961_v47, %v962_v46  ;;  %v968_v50 = vsel %vm956_vm11, %v948_v38, %v5480_v50  ;;  %vm983_vm12 = vcmp.gt.f32.partialorder %v976_v35, %v5492_v57  ;;  %vm988_vm14 = vcmp.gt.f32.partialorder %v5492_v57, %v976_v35  ;;  %v1072_v60 = vld.sshfl [vmem:[#allocation1 + $0x28] sm:$0xff pattern:$0x1234567] }
  0x41   :  { %966 = vst [vmem:[#allocation1 + $0x8] sm:$0xff] %v5606_v48  ;;  %v5614_v51 = vsel %vm5524_vm3, %v967_v49, %v968_v50  ;;  %v993_v55 = vsel %vm983_vm12, %v976_v35, %v5492_v57  ;;  %v999_v52 = vsel %vm983_vm12, %v980_v40, %v5496_v59  ;;  %v994_v57 = vsel %vm988_vm14, %v976_v35, %v5492_v57  ;;  %v1076_v9 = vld.sshfl [vmem:[#allocation3 + $0x28] sm:$0xff pattern:$0x1234567] }
  0x42   :  { %972 = vst [vmem:[#allocation3 + $0x8] sm:$0xff] %v5614_v51  ;;  %v1000_v59 = vsel %vm988_vm14, %v980_v40, %v5496_v59  ;;  %vm1015_vm15 = vcmp.gt.f32.partialorder %v1008_v44, %v5504_v62  ;;  %vm1020_vm1 = vcmp.gt.f32.partialorder %v5504_v62, %v1008_v44  ;;  %v5626_v58 = vsel %vm5524_vm3, %v993_v55, %v994_v57  ;;  %v1104_v6 = vld.sshfl [vmem:[#allocation1 + $0x30] sm:$0xff pattern:$0x1234567] }
  0x43   :  { %v5630_v61 = vsel %vm5524_vm3, %v999_v52, %v1000_v59  ;;  %v1025_v63 = vsel %vm1015_vm15, %v1008_v44, %v5504_v62  ;;  %v1026_v62 = vsel %vm1020_vm1, %v1008_v44, %v5504_v62  ;;  %998 = vst [vmem:[#allocation1 + $0x10] sm:$0xff] %v5626_v58  ;;  %v1031_v2 = vsel %vm1015_vm15, %v1012_v54, %v5512_v3  ;;  %v1108_v15 = vld.sshfl [vmem:[#allocation3 + $0x30] sm:$0xff pattern:$0x1234567] }
  0x44   :  { %1004 = vst [vmem:[#allocation3 + $0x10] sm:$0xff] %v5630_v61  ;;  %v5638_v1 = vsel %vm5524_vm3, %v1025_v63, %v1026_v62  ;;  %v1032_v3 = vsel %vm1020_vm1, %v1012_v54, %v5512_v3  ;;  %vm1047_vm2 = vcmp.gt.f32.partialorder %v1040_v53, %v5530_v21  ;;  %vm1052_vm4 = vcmp.gt.f32.partialorder %v5530_v21, %v1040_v53  ;;  %v1136_v17 = vld.sshfl [vmem:[#allocation1 + $0x38] sm:$0xff pattern:$0x1234567] }
  0x45   :  { %1030 = vst [vmem:[#allocation1 + $0x18] sm:$0xff] %v5638_v1  ;;  %v5646_v4 = vsel %vm5524_vm3, %v1031_v2, %v1032_v3  ;;  %v1057_v11 = vsel %vm1047_vm2, %v1040_v53, %v5530_v21  ;;  %v1063_v5 = vsel %vm1047_vm2, %v1044_v56, %v5534_v13  ;;  %v1058_v21 = vsel %vm1052_vm4, %v1040_v53, %v5530_v21  ;;  %v1140_v27 = vld.sshfl [vmem:[#allocation3 + $0x38] sm:$0xff pattern:$0x1234567] }
  0x46   :  { %1036 = vst [vmem:[#allocation3 + $0x18] sm:$0xff] %v5646_v4  ;;  %v1064_v13 = vsel %vm1052_vm4, %v1044_v56, %v5534_v13  ;;  %vm1079_vm5 = vcmp.gt.f32.partialorder %v1072_v60, %v5542_v7  ;;  %vm1084_vm6 = vcmp.gt.f32.partialorder %v5542_v7, %v1072_v60  ;;  %v5658_v14 = vsel %vm5524_vm3, %v1057_v11, %v1058_v21  ;;  %v1172_v18 = vld.sshfl [vmem:[#allocation1] sm:$0xff pattern:$0x54761032] }
  0x47   :  { %v5662_v12 = vsel %vm5524_vm3, %v1063_v5, %v1064_v13  ;;  %v1089_v16 = vsel %vm1079_vm5, %v1072_v60, %v5542_v7  ;;  %v1090_v7 = vsel %vm1084_vm6, %v1072_v60, %v5542_v7  ;;  %1062 = vst [vmem:[#allocation1 + $0x20] sm:$0xff] %v5658_v14  ;;  %v1095_v22 = vsel %vm1079_vm5, %v1076_v9, %v5550_v20  ;;  %v1176_v32 = vld.sshfl [vmem:[#allocation3] sm:$0xff pattern:$0x54761032] }
  0x48   :  { %1068 = vst [vmem:[#allocation3 + $0x20] sm:$0xff] %v5662_v12  ;;  %v5670_v24 = vsel %vm5524_vm3, %v1089_v16, %v1090_v7  ;;  %v1096_v20 = vsel %vm1084_vm6, %v1076_v9, %v5550_v20  ;;  %vm1111_vm7 = vcmp.gt.f32.partialorder %v1104_v6, %v5562_v26  ;;  %vm1116_vm8 = vcmp.gt.f32.partialorder %v5562_v26, %v1104_v6  ;;  %v1204_v33 = vld.sshfl [vmem:[#allocation1 + $0x8] sm:$0xff pattern:$0x54761032] }
  0x49   :  { %1094 = vst [vmem:[#allocation1 + $0x28] sm:$0xff] %v5670_v24  ;;  %v5678_v23 = vsel %vm5524_vm3, %v1095_v22, %v1096_v20  ;;  %v1121_v8 = vsel %vm1111_vm7, %v1104_v6, %v5562_v26  ;;  %v1127_v25 = vsel %vm1111_vm7, %v1108_v15, %v5566_v29  ;;  %v1122_v26 = vsel %vm1116_vm8, %v1104_v6, %v5562_v26  ;;  %v1208_v43 = vld.sshfl [vmem:[#allocation3 + $0x8] sm:$0xff pattern:$0x54761032] }
  0x4a   :  { %1100 = vst [vmem:[#allocation3 + $0x28] sm:$0xff] %v5678_v23  ;;  %v1128_v29 = vsel %vm1116_vm8, %v1108_v15, %v5566_v29  ;;  %vm1143_vm9 = vcmp.gt.f32.partialorder %v1136_v17, %v5574_v31  ;;  %vm1148_vm10 = vcmp.gt.f32.partialorder %v5574_v31, %v1136_v17  ;;  %v5690_v30 = vsel %vm5524_vm3, %v1121_v8, %v1122_v26  ;;  %v1236_v40 = vld.sshfl [vmem:[#allocation1 + $0x10] sm:$0xff pattern:$0x54761032] }
  0x4b   :  { %v5694_v28 = vsel %vm5524_vm3, %v1127_v25, %v1128_v29  ;;  %v1153_v34 = vsel %vm1143_vm9, %v1136_v17, %v5574_v31  ;;  %v1154_v31 = vsel %vm1148_vm10, %v1136_v17, %v5574_v31  ;;  %1126 = vst [vmem:[#allocation1 + $0x30] sm:$0xff] %v5690_v30  ;;  %v1159_v37 = vsel %vm1143_vm9, %v1140_v27, %v5582_v36  ;;  %v1240_v47 = vld.sshfl [vmem:[#allocation3 + $0x10] sm:$0xff pattern:$0x54761032] }
  0x4c   :  { %1132 = vst [vmem:[#allocation3 + $0x30] sm:$0xff] %v5694_v28  ;;  %v5702_v39 = vsel %vm5524_vm3, %v1153_v34, %v1154_v31  ;;  %v1160_v36 = vsel %vm1148_vm10, %v1140_v27, %v5582_v36  ;;  %vm1179_vm11 = vcmp.gt.f32.partialorder %v1172_v18, %v5594_v42  ;;  %vm1184_vm12 = vcmp.gt.f32.partialorder %v5594_v42, %v1172_v18  ;;  %v1268_v50 = vld.sshfl [vmem:[#allocation1 + $0x18] sm:$0xff pattern:$0x54761032] }
  0x4d   :  { %1158 = vst [vmem:[#allocation1 + $0x38] sm:$0xff] %v5702_v39  ;;  %v5710_v38 = vsel %vm5524_vm3, %v1159_v37, %v1160_v36  ;;  %v1189_v35 = vsel %vm1179_vm11, %v1172_v18, %v5594_v42  ;;  %v1195_v41 = vsel %vm1179_vm11, %v1176_v32, %v5598_v45  ;;  %v1190_v42 = vsel %vm1184_vm12, %v1172_v18, %v5594_v42  ;;  %v1272_v59 = vld.sshfl [vmem:[#allocation3 + $0x18] sm:$0xff pattern:$0x54761032] }
  0x4e   :  { %1164 = vst [vmem:[#allocation3 + $0x38] sm:$0xff] %v5710_v38  ;;  %v1196_v45 = vsel %vm1184_vm12, %v1176_v32, %v5598_v45  ;;  %vm1211_vm14 = vcmp.gt.f32.partialorder %v1204_v33, %v5606_v48  ;;  %vm1216_vm15 = vcmp.gt.f32.partialorder %v5606_v48, %v1204_v33  ;;  %v5722_v46 = vsel %vm5262_vm13, %v1189_v35, %v1190_v42  ;;  %v1300_v56 = vld.sshfl [vmem:[#allocation1 + $0x20] sm:$0xff pattern:$0x54761032] }
  0x4f   :  { %v5726_v44 = vsel %vm5262_vm13, %v1195_v41, %v1196_v45  ;;  %v1221_v49 = vsel %vm1211_vm14, %v1204_v33, %v5606_v48  ;;  %v1222_v48 = vsel %vm1216_vm15, %v1204_v33, %v5606_v48  ;;  %1194 = vst [vmem:[#allocation1] sm:$0xff] %v5722_v46  ;;  %v1227_v52 = vsel %vm1211_vm14, %v1208_v43, %v5614_v51  ;;  %v1304_v63 = vld.sshfl [vmem:[#allocation3 + $0x20] sm:$0xff pattern:$0x54761032] }
  0x50   :  { %1200 = vst [vmem:[#allocation3] sm:$0xff] %v5726_v44  ;;  %v5734_v55 = vsel %vm5262_vm13, %v1221_v49, %v1222_v48  ;;  %v1228_v51 = vsel %vm1216_vm15, %v1208_v43, %v5614_v51  ;;  %vm1243_vm1 = vcmp.gt.f32.partialorder %v1236_v40, %v5626_v58  ;;  %vm1248_vm2 = vcmp.gt.f32.partialorder %v5626_v58, %v1236_v40  ;;  %v1332_v3 = vld.sshfl [vmem:[#allocation1 + $0x28] sm:$0xff pattern:$0x54761032] }
  0x51   :  { %1226 = vst [vmem:[#allocation1 + $0x8] sm:$0xff] %v5734_v55  ;;  %v5742_v54 = vsel %vm5262_vm13, %v1227_v52, %v1228_v51  ;;  %v1253_v53 = vsel %vm1243_vm1, %v1236_v40, %v5626_v58  ;;  %v1259_v57 = vsel %vm1243_vm1, %v1240_v47, %v5630_v61  ;;  %v1254_v58 = vsel %vm1248_vm2, %v1236_v40, %v5626_v58  ;;  %v1336_v13 = vld.sshfl [vmem:[#allocation3 + $0x28] sm:$0xff pattern:$0x54761032] }
  0x52   :  { %1232 = vst [vmem:[#allocation3 + $0x8] sm:$0xff] %v5742_v54  ;;  %v1260_v61 = vsel %vm1248_vm2, %v1240_v47, %v5630_v61  ;;  %vm1275_vm4 = vcmp.gt.f32.partialorder %v1268_v50, %v5638_v1  ;;  %vm1280_vm5 = vcmp.gt.f32.partialorder %v5638_v1, %v1268_v50  ;;  %v5754_v62 = vsel %vm5262_vm13, %v1253_v53, %v1254_v58  ;;  %v1364_v15 = vld.sshfl [vmem:[#allocation1 + $0x30] sm:$0xff pattern:$0x54761032] }
  0x53   :  { %v5758_v60 = vsel %vm5262_vm13, %v1259_v57, %v1260_v61  ;;  %v1285_v2 = vsel %vm1275_vm4, %v1268_v50, %v5638_v1  ;;  %v1286_v1 = vsel %vm1280_vm5, %v1268_v50, %v5638_v1  ;;  %1258 = vst [vmem:[#allocation1 + $0x10] sm:$0xff] %v5754_v62  ;;  %v1291_v5 = vsel %vm1275_vm4, %v1272_v59, %v5646_v4  ;;  %v1368_v16 = vld.sshfl [vmem:[#allocation3 + $0x30] sm:$0xff pattern:$0x54761032] }
  0x54   :  { %1264 = vst [vmem:[#allocation3 + $0x10] sm:$0xff] %v5758_v60  ;;  %v5766_v11 = vsel %vm5262_vm13, %v1285_v2, %v1286_v1  ;;  %v1292_v4 = vsel %vm1280_vm5, %v1272_v59, %v5646_v4  ;;  %vm1307_vm6 = vcmp.gt.f32.partialorder %v1300_v56, %v5658_v14  ;;  %vm1312_vm7 = vcmp.gt.f32.partialorder %v5658_v14, %v1300_v56  ;;  %v1396_v20 = vld.sshfl [vmem:[#allocation1 + $0x38] sm:$0xff pattern:$0x54761032] }
  0x55   :  { %1290 = vst [vmem:[#allocation1 + $0x18] sm:$0xff] %v5766_v11  ;;  %v5774_v9 = vsel %vm5262_vm13, %v1291_v5, %v1292_v4  ;;  %v1317_v6 = vsel %vm1307_vm6, %v1300_v56, %v5658_v14  ;;  %v1323_v21 = vsel %vm1307_vm6, %v1304_v63, %v5662_v12  ;;  %v1318_v14 = vsel %vm1312_vm7, %v1300_v56, %v5658_v14  ;;  %v1400_v29 = vld.sshfl [vmem:[#allocation3 + $0x38] sm:$0xff pattern:$0x54761032] }
  0x56   :  { %1296 = vst [vmem:[#allocation3 + $0x18] sm:$0xff] %v5774_v9  ;;  %v1324_v12 = vsel %vm1312_vm7, %v1304_v63, %v5662_v12  ;;  %vm1339_vm8 = vcmp.gt.f32.partialorder %v1332_v3, %v5670_v24  ;;  %vm1344_vm9 = vcmp.gt.f32.partialorder %v5670_v24, %v1332_v3  ;;  %v5786_v7 = vsel %vm5262_vm13, %v1317_v6, %v1318_v14 }
  0x57   :  { %v5790_v17 = vsel %vm5262_vm13, %v1323_v21, %v1324_v12  ;;  %v1349_v22 = vsel %vm1339_vm8, %v1332_v3, %v5670_v24  ;;  %v1350_v24 = vsel %vm1344_vm9, %v1332_v3, %v5670_v24  ;;  %1322 = vst [vmem:[#allocation1 + $0x20] sm:$0xff] %v5786_v7  ;;  %v1355_v25 = vsel %vm1339_vm8, %v1336_v13, %v5678_v23  ;;  %v1436_v42 = vld.sshfl [vmem:[#allocation3] sm:$0xff pattern:$0x67452301] }
  0x58   :  { %1328 = vst [vmem:[#allocation3 + $0x20] sm:$0xff] %v5790_v17  ;;  %v5798_v8 = vsel %vm5262_vm13, %v1349_v22, %v1350_v24  ;;  %v1356_v23 = vsel %vm1344_vm9, %v1336_v13, %v5678_v23  ;;  %vm1371_vm10 = vcmp.gt.f32.partialorder %v1364_v15, %v5690_v30  ;;  %vm1376_vm11 = vcmp.gt.f32.partialorder %v5690_v30, %v1364_v15  ;;  %v1464_v37 = vld.sshfl [vmem:[#allocation1 + $0x8] sm:$0xff pattern:$0x67452301] }
  0x59   :  { %1354 = vst [vmem:[#allocation1 + $0x28] sm:$0xff] %v5798_v8  ;;  %v5806_v27 = vsel %vm5262_vm13, %v1355_v25, %v1356_v23  ;;  %v1381_v18 = vsel %vm1371_vm10, %v1364_v15, %v5690_v30  ;;  %v1387_v26 = vsel %vm1371_vm10, %v1368_v16, %v5694_v28  ;;  %v1382_v32 = vsel %vm1376_vm11, %v1364_v15, %v5690_v30  ;;  %v1468_v43 = vld.sshfl [vmem:[#allocation3 + $0x8] sm:$0xff pattern:$0x67452301] }
  0x5a   :  { %1360 = vst [vmem:[#allocation3 + $0x28] sm:$0xff] %v5806_v27  ;;  %v1388_v30 = vsel %vm1376_vm11, %v1368_v16, %v5694_v28  ;;  %vm1403_vm12 = vcmp.gt.f32.partialorder %v1396_v20, %v5702_v39  ;;  %vm1408_vm14 = vcmp.gt.f32.partialorder %v5702_v39, %v1396_v20  ;;  %v5818_v28 = vsel %vm5262_vm13, %v1381_v18, %v1382_v32  ;;  %v1496_v40 = vld.sshfl [vmem:[#allocation1 + $0x10] sm:$0xff pattern:$0x67452301] }
  0x5b   :  { %v5822_v34 = vsel %vm5262_vm13, %v1387_v26, %v1388_v30  ;;  %v1413_v31 = vsel %vm1403_vm12, %v1396_v20, %v5702_v39  ;;  %v1414_v33 = vsel %vm1408_vm14, %v1396_v20, %v5702_v39  ;;  %v1432_v39 = vld.sshfl [vmem:[#allocation1] sm:$0xff pattern:$0x67452301]  ;;  %1386 = vst [vmem:[#allocation1 + $0x30] sm:$0xff] %v5818_v28  ;;  %v1419_v35 = vsel %vm1403_vm12, %v1400_v29, %v5710_v38 }
  0x5c   :  { %1392 = vst [vmem:[#allocation3 + $0x30] sm:$0xff] %v5822_v34  ;;  %v5830_v36 = vsel %vm5262_vm13, %v1413_v31, %v1414_v33  ;;  %v1420_v38 = vsel %vm1408_vm14, %v1400_v29, %v5710_v38  ;;  %vm1439_vm15 = vcmp.gt.f32.partialorder %v1432_v39, %v5722_v46  ;;  %vm1444_vm1 = vcmp.gt.f32.partialorder %v5722_v46, %v1432_v39  ;;  %v1528_v49 = vld.sshfl [vmem:[#allocation1 + $0x18] sm:$0xff pattern:$0x67452301] }
  0x5d   :  { %1418 = vst [vmem:[#allocation1 + $0x38] sm:$0xff] %v5830_v36  ;;  %v5837_v41 = vsel %vm5262_vm13, %v1419_v35, %v1420_v38  ;;  %vm1471_vm2 = vcmp.gt.f32.partialorder %v1464_v37, %v5734_v55  ;;  %vm1476_vm4 = vcmp.gt.f32.partialorder %v5734_v55, %v1464_v37  ;;  %v1500_v52 = vld.sshfl [vmem:[#allocation3 + $0x10] sm:$0xff pattern:$0x67452301]  ;;  %vm1503_vm5 = vcmp.gt.f32.partialorder %v1496_v40, %v5754_v62 }
  0x5e   :  { %1424 = vst [vmem:[#allocation3 + $0x38] sm:$0xff] %v5837_v41  ;;  %v1481_v45 = vsel %vm1471_vm2, %v1464_v37, %v5734_v55  ;;  %v1482_v47 = vsel %vm1476_vm4, %v1464_v37, %v5734_v55  ;;  %v1487_v50 = vsel %vm1471_vm2, %v1468_v43, %v5742_v54  ;;  %v1488_v55 = vsel %vm1476_vm4, %v1468_v43, %v5742_v54  ;;  %v1532_v59 = vld.sshfl [vmem:[#allocation3 + $0x18] sm:$0xff pattern:$0x67452301] }
  0x5f   :  { %v1483_v48 = vsel %vm5192_vm0, %v1481_v45, %v1482_v47  ;;  %v1449_v51 = vsel %vm1439_vm15, %v1432_v39, %v5722_v46  ;;  %v1450_v54 = vsel %vm1444_vm1, %v1432_v39, %v5722_v46  ;;  %v1455_v53 = vsel %vm1439_vm15, %v1436_v42, %v5726_v44  ;;  %v1560_v56 = vld.sshfl [vmem:[#allocation1 + $0x20] sm:$0xff pattern:$0x67452301] }
  0x60   :  { %1486 = vst [vmem:[#allocation1 + $0x8] sm:$0xff] %v1483_v48  ;;  %v1489_v57 = vsel %vm5192_vm0, %v1487_v50, %v1488_v55  ;;  %v1456_v46 = vsel %vm1444_vm1, %v1436_v42, %v5726_v44  ;;  %vm1508_vm6 = vcmp.gt.f32.partialorder %v5754_v62, %v1496_v40  ;;  %vm1535_vm7 = vcmp.gt.f32.partialorder %v1528_v49, %v5766_v11  ;;  %v1564_v2 = vld.sshfl [vmem:[#allocation3 + $0x20] sm:$0xff pattern:$0x67452301] }
  0x61   :  { %1492 = vst [vmem:[#allocation3 + $0x8] sm:$0xff] %v1489_v57  ;;  %vm1540_vm8 = vcmp.gt.f32.partialorder %v5766_v11, %v1528_v49  ;;  %v1513_v44 = vsel %vm1503_vm5, %v1496_v40, %v5754_v62  ;;  %v1519_v58 = vsel %vm1503_vm5, %v1500_v52, %v5758_v60  ;;  %v1545_v61 = vsel %vm1535_vm7, %v1528_v49, %v5766_v11  ;;  %v1592_v1 = vld.sshfl [vmem:[#allocation1 + $0x28] sm:$0xff pattern:$0x67452301] }
  0x62   :  { %v1546_v63 = vsel %vm1540_vm8, %v1528_v49, %v5766_v11  ;;  %v1551_v11 = vsel %vm1535_vm7, %v1532_v59, %v5774_v9  ;;  %v1552_v5 = vsel %vm1540_vm8, %v1532_v59, %v5774_v9  ;;  %vm1567_vm9 = vcmp.gt.f32.partialorder %v1560_v56, %v5786_v7  ;;  %v1596_v9 = vld.sshfl [vmem:[#allocation3 + $0x28] sm:$0xff pattern:$0x67452301]  ;;  %v1624_v20 = vld.sshfl [vmem:[#allocation1 + $0x30] sm:$0xff pattern:$0x67452301] }
  0x63   :  { %v1547_v3 = vsel %vm5192_vm0, %v1545_v61, %v1546_v63  ;;  %v1514_v62 = vsel %vm1508_vm6, %v1496_v40, %v5754_v62  ;;  %v1520_v60 = vsel %vm1508_vm6, %v1500_v52, %v5758_v60  ;;  %v1553_v4 = vsel %vm5192_vm0, %v1551_v11, %v1552_v5  ;;  %v1628_v38 = vld.sshfl [vmem:[#allocation3 + $0x30] sm:$0xff pattern:$0x67452301] }
  0x64   :  { %1550 = vst [vmem:[#allocation1 + $0x18] sm:$0xff] %v1547_v3  ;;  %vm1572_vm10 = vcmp.gt.f32.partialorder %v5786_v7, %v1560_v56  ;;  %1556 = vst [vmem:[#allocation3 + $0x18] sm:$0xff] %v1553_v4  ;;  %v1577_v6 = vsel %vm1567_vm9, %v1560_v56, %v5786_v7  ;;  %v1583_v21 = vsel %vm1567_vm9, %v1564_v2, %v5790_v17  ;;  %v1656_v16 = vld.sshfl [vmem:[#allocation1 + $0x38] sm:$0xff pattern:$0x67452301] }
  0x65   :  { %vm1599_vm11 = vcmp.gt.f32.partialorder %v1592_v1, %v5798_v8  ;;  %vm1604_vm12 = vcmp.gt.f32.partialorder %v5798_v8, %v1592_v1  ;;  %v1578_v13 = vsel %vm1572_vm10, %v1560_v56, %v5786_v7  ;;  %v1584_v15 = vsel %vm1572_vm10, %v1564_v2, %v5790_v17  ;;  %v1660_v18 = vld.sshfl [vmem:[#allocation3 + $0x38] sm:$0xff pattern:$0x67452301] }
  0x66   :  { %v1609_v14 = vsel %vm1599_vm11, %v1592_v1, %v5798_v8  ;;  %v1610_v12 = vsel %vm1604_vm12, %v1592_v1, %v5798_v8  ;;  %v1451_v7 = vsel %vm5192_vm0, %v1449_v51, %v1450_v54  ;;  %v1615_v22 = vsel %vm1599_vm11, %v1596_v9, %v5806_v27 }
  0x67   :  { %v1611_v17 = vsel %vm5192_vm0, %v1609_v14, %v1610_v12  ;;  %v1616_v24 = vsel %vm1604_vm12, %v1596_v9, %v5806_v27  ;;  %v1457_v8 = vsel %vm5192_vm0, %v1455_v53, %v1456_v46  ;;  %v1515_v25 = vsel %vm5192_vm0, %v1513_v44, %v1514_v62  ;;  %v1692_v26 = vld [vmem:[#allocation1 + $0xf] ss:$-1 sm:$0xff] }
  0x68   :  { %v1521_v23 = vsel %vm5192_vm0, %v1519_v58, %v1520_v60  ;;  %1614 = vst [vmem:[#allocation1 + $0x28] sm:$0xff] %v1611_v17  ;;  %v1617_v27 = vsel %vm5192_vm0, %v1615_v22, %v1616_v24  ;;  %v1579_v29 = vsel %vm5192_vm0, %v1577_v6, %v1578_v13  ;;  %v1585_v32 = vsel %vm5192_vm0, %v1583_v21, %v1584_v15  ;;  %v1699_v30 = vld [vmem:[#allocation3 + $0xf] ss:$-1 sm:$0xff] }
  0x69   :  { %1620 = vst [vmem:[#allocation3 + $0x28] sm:$0xff] %v1617_v27  ;;  %vm1663_vm14 = vcmp.gt.f32.partialorder %v1656_v16, %v5830_v36  ;;  %vm1668_vm15 = vcmp.gt.f32.partialorder %v5830_v36, %v1656_v16  ;;  %vm1631_vm1 = vcmp.gt.f32.partialorder %v1624_v20, %v5818_v28  ;;  %vm1636_vm2 = vcmp.gt.f32.partialorder %v5818_v28, %v1624_v20 }
  0x6a   :  { %v1673_v31 = vsel %vm1663_vm14, %v1656_v16, %v5830_v36  ;;  %v1674_v33 = vsel %vm1668_vm15, %v1656_v16, %v5830_v36  ;;  %v1679_v37 = vsel %vm1663_vm14, %v1660_v18, %v5837_v41  ;;  %v1680_v36 = vsel %vm1668_vm15, %v1660_v18, %v5837_v41 }
  0x6b   :  { %v1675_v39 = vsel %vm5192_vm0, %v1673_v31, %v1674_v33  ;;  %vm1702_vm4 = vcmp.gt.f32.partialorder %v1692_v26, %v1451_v7  ;;  %v1730_v35 = vld [vmem:[#allocation1 + $0x1f] ss:$-1 sm:$0xff]  ;;  %v1681_v41 = vsel %vm5192_vm0, %v1679_v37, %v1680_v36  ;;  %v1641_v47 = vsel %vm1631_vm1, %v1624_v20, %v5818_v28 }
  0x6c   :  { %1678 = vst [vmem:[#allocation1 + $0x38] sm:$0xff] %v1675_v39  ;;  %v1707_v43 = vsel %vm1702_vm4, %v1692_v26, %v1451_v7  ;;  %v1708_v40 = vsel %vm1702_vm4, %v1451_v7, %v1692_v26  ;;  %v1715_v42 = vsel %vm1702_vm4, %v1699_v30, %v1457_v8  ;;  %v1737_v45 = vld [vmem:[#allocation3 + $0x1f] ss:$-1 sm:$0xff]  ;;  %v1642_v49 = vsel %vm1636_vm2, %v1624_v20, %v5818_v28 }
  0x6d   :  { %1684 = vst [vmem:[#allocation3 + $0x38] sm:$0xff] %v1681_v41  ;;  %1711 = vst [vmem:[#allocation1] sm:$0xff] %v1707_v43  ;;  %v1716_v48 = vsel %vm1702_vm4, %v1457_v8, %v1699_v30  ;;  %vm1740_vm5 = vcmp.gt.f32.partialorder %v1730_v35, %v1515_v25  ;;  %v1647_v54 = vsel %vm1631_vm1, %v1628_v38, %v5822_v34 }
  0x6e   :  { %1714 = vst [vmem:[#allocation1 + $0xf] ss:$-1 sm:$0xff] %v1708_v40  ;;  %1719 = vst [vmem:[#allocation3] sm:$0xff] %v1715_v42  ;;  %v5922_v50 = vsel %vm1740_vm5, %v1730_v35, %v1515_v25  ;;  %v1746_v55 = vsel %vm1740_vm5, %v1515_v25, %v1730_v35  ;;  %v5924_v52 = vsel %vm1740_vm5, %v1737_v45, %v1521_v23 }
  0x6f   :  { %1722 = vst [vmem:[#allocation3 + $0xf] ss:$-1 sm:$0xff] %v1716_v48  ;;  %v1754_v51 = vsel %vm1740_vm5, %v1521_v23, %v1737_v45  ;;  %v1648_v28 = vsel %vm1636_vm2, %v1628_v38, %v5822_v34  ;;  %1749 = vst [vmem:[#allocation1 + $0x10] sm:$0xff] %v5922_v50  ;;  %v1768_v34 = vld [vmem:[#allocation1 + $0x2f] ss:$-1 sm:$0xff]  ;;  %v1643_v53 = vsel %vm5192_vm0, %v1641_v47, %v1642_v49 }
  0x70   :  { %1752 = vst [vmem:[#allocation1 + $0x1f] ss:$-1 sm:$0xff] %v1746_v55  ;;  %1757 = vst [vmem:[#allocation3 + $0x10] sm:$0xff] %v5924_v52  ;;  %v1775_v57 = vld [vmem:[#allocation3 + $0x2f] ss:$-1 sm:$0xff]  ;;  %vm1778_vm6 = vcmp.gt.f32.partialorder %v1768_v34, %v1579_v29  ;;  %v1649_v58 = vsel %vm5192_vm0, %v1647_v54, %v1648_v28 }
  0x71   :  { %1760 = vst [vmem:[#allocation3 + $0x1f] ss:$-1 sm:$0xff] %v1754_v51  ;;  %v5936_v59 = vsel %vm1778_vm6, %v1768_v34, %v1579_v29  ;;  %v1784_v56 = vsel %vm1778_vm6, %v1579_v29, %v1768_v34  ;;  %v5938_v46 = vsel %vm1778_vm6, %v1775_v57, %v1585_v32  ;;  %v1792_v44 = vsel %vm1778_vm6, %v1585_v32, %v1775_v57 }
  0x72   :  { %1787 = vst [vmem:[#allocation1 + $0x20] sm:$0xff] %v5936_v59  ;;  %1790 = vst [vmem:[#allocation1 + $0x2f] ss:$-1 sm:$0xff] %v1784_v56 }
  0x73   :  { %1795 = vst [vmem:[#allocation3 + $0x20] sm:$0xff] %v5938_v46  ;;  %1798 = vst [vmem:[#allocation3 + $0x2f] ss:$-1 sm:$0xff] %v1792_v44  ;;  %v1806_v61 = vld [vmem:[#allocation1 + $0x3f] ss:$-1 sm:$0xff] }
  0x74   :  { %v1813_v63 = vld [vmem:[#allocation3 + $0x3f] ss:$-1 sm:$0xff]  ;;  %vm1816_vm7 = vcmp.gt.f32.partialorder %v1806_v61, %v1643_v53  ;;  %v1844_v2 = vld.sshfl [vmem:[#allocation1] sm:$0xff pattern:$0x32107654] }
  0x75   :  { %v1875_v1 = vld [vmem:[#allocation1 + $0x8] sm:$0xff]  ;;  %v5944_v3 = vsel %vm1816_vm7, %v1806_v61, %v1643_v53  ;;  %v1822_v11 = vsel %vm1816_vm7, %v1643_v53, %v1806_v61  ;;  %v5946_v5 = vsel %vm1816_vm7, %v1813_v63, %v1649_v58  ;;  %v1830_v62 = vsel %vm1816_vm7, %v1649_v58, %v1813_v63  ;;  %v1848_v60 = vld.sshfl [vmem:[#allocation3] sm:$0xff pattern:$0x32107654] }
  0x76   :  { %v1876_v4 = vld.sshfl [vmem:[#allocation1 + $0x8] sm:$0xff pattern:$0x32107654]  ;;  %1825 = vst [vmem:[#allocation1 + $0x30] sm:$0xff] %v5944_v3  ;;  %1828 = vst [vmem:[#allocation1 + $0x3f] ss:$-1 sm:$0xff] %v1822_v11  ;;  %vm1851_vm8 = vcmp.gt.f32.partialorder %v1844_v2, %v1707_v43  ;;  %vm1856_vm9 = vcmp.gt.f32.partialorder %v1707_v43, %v1844_v2 }
  0x77   :  { %1833 = vst [vmem:[#allocation3 + $0x30] sm:$0xff] %v5946_v5  ;;  %1836 = vst [vmem:[#allocation3 + $0x3f] ss:$-1 sm:$0xff] %v1830_v62  ;;  %v1879_v9 = vld [vmem:[#allocation3 + $0x8] sm:$0xff]  ;;  %vm1883_vm10 = vcmp.gt.f32.partialorder %v1876_v4, %v1875_v1  ;;  %vm1888_vm11 = vcmp.gt.f32.partialorder %v1875_v1, %v1876_v4  ;;  %v1861_v21 = vsel %vm1851_vm8, %v1844_v2, %v1707_v43  ;;  %v1939_v20 = vld [vmem:[#allocation1 + $0x18] sm:$0xff] }
  0x78   :  { %v1880_v6 = vld.sshfl [vmem:[#allocation3 + $0x8] sm:$0xff pattern:$0x32107654]  ;;  %v1862_v13 = vsel %vm1856_vm9, %v1844_v2, %v1707_v43  ;;  %v1867_v15 = vsel %vm1851_vm8, %v1848_v60, %v1715_v42  ;;  %v1868_v14 = vsel %vm1856_vm9, %v1848_v60, %v1715_v42  ;;  %v1908_v12 = vld.sshfl [vmem:[#allocation1 + $0x10] sm:$0xff pattern:$0x32107654]  ;;  %v1893_v22 = vsel %vm1883_vm10, %v1876_v4, %v1875_v1 }
  0x79   :  { %v1912_v16 = vld.sshfl [vmem:[#allocation3 + $0x10] sm:$0xff pattern:$0x32107654]  ;;  %v5952_v7 = vsel %vm5524_vm3, %v1861_v21, %v1862_v13  ;;  %v5956_v17 = vsel %vm5524_vm3, %v1867_v15, %v1868_v14  ;;  %v1894_v24 = vsel %vm1888_vm11, %v1876_v4, %v1875_v1  ;;  %v1940_v8 = vld.sshfl [vmem:[#allocation1 + $0x18] sm:$0xff pattern:$0x32107654]  ;;  %v1899_v23 = vsel %vm1883_vm10, %v1880_v6, %v1879_v9 }
  0x7a   :  { %1866 = vst [vmem:[#allocation1] sm:$0xff] %v5952_v7  ;;  %1872 = vst [vmem:[#allocation3] sm:$0xff] %v5956_v17  ;;  %v5964_v25 = vsel %vm5524_vm3, %v1893_v22, %v1894_v24  ;;  %v1900_v27 = vsel %vm1888_vm11, %v1880_v6, %v1879_v9  ;;  %vm1915_vm12 = vcmp.gt.f32.partialorder %v1908_v12, %v5922_v50  ;;  %v1943_v18 = vld [vmem:[#allocation3 + $0x18] sm:$0xff]  ;;  %v1972_v31 = vld.sshfl [vmem:[#allocation1 + $0x20] sm:$0xff pattern:$0x32107654] }
  0x7b   :  { %1898 = vst [vmem:[#allocation1 + $0x8] sm:$0xff] %v5964_v25  ;;  %v5972_v26 = vsel %vm5524_vm3, %v1899_v23, %v1900_v27  ;;  %vm1920_vm14 = vcmp.gt.f32.partialorder %v5922_v50, %v1908_v12  ;;  %v1925_v29 = vsel %vm1915_vm12, %v1908_v12, %v5922_v50  ;;  %v1931_v32 = vsel %vm1915_vm12, %v1912_v16, %v5924_v52  ;;  %v1944_v30 = vld.sshfl [vmem:[#allocation3 + $0x18] sm:$0xff pattern:$0x32107654]  ;;  %v2003_v43 = vld [vmem:[#allocation1 + $0x28] sm:$0xff] }
  0x7c   :  { %1904 = vst [vmem:[#allocation3 + $0x8] sm:$0xff] %v5972_v26  ;;  %v1926_v33 = vsel %vm1920_vm14, %v1908_v12, %v5922_v50  ;;  %v1932_v39 = vsel %vm1920_vm14, %v1912_v16, %v5924_v52  ;;  %vm1947_vm15 = vcmp.gt.f32.partialorder %v1940_v8, %v1939_v20  ;;  %vm1952_vm1 = vcmp.gt.f32.partialorder %v1939_v20, %v1940_v8  ;;  %v1976_v37 = vld.sshfl [vmem:[#allocation3 + $0x20] sm:$0xff pattern:$0x32107654]  ;;  %v2007_v49 = vld [vmem:[#allocation3 + $0x28] sm:$0xff] }
  0x7d   :  { %v5982_v36 = vsel %vm5524_vm3, %v1925_v29, %v1926_v33  ;;  %v5986_v35 = vsel %vm5524_vm3, %v1931_v32, %v1932_v39  ;;  %v1957_v38 = vsel %vm1947_vm15, %v1940_v8, %v1939_v20  ;;  %v1958_v41 = vsel %vm1952_vm1, %v1940_v8, %v1939_v20  ;;  %v2004_v40 = vld.sshfl [vmem:[#allocation1 + $0x28] sm:$0xff pattern:$0x32107654]  ;;  %v2036_v51 = vld.sshfl [vmem:[#allocation1 + $0x30] sm:$0xff pattern:$0x32107654] }
  0x7e   :  { %1930 = vst [vmem:[#allocation1 + $0x10] sm:$0xff] %v5982_v36  ;;  %1936 = vst [vmem:[#allocation3 + $0x10] sm:$0xff] %v5986_v35  ;;  %v5992_v42 = vsel %vm5524_vm3, %v1957_v38, %v1958_v41  ;;  %v1963_v45 = vsel %vm1947_vm15, %v1944_v30, %v1943_v18  ;;  %v1964_v47 = vsel %vm1952_vm1, %v1944_v30, %v1943_v18  ;;  %v2008_v52 = vld.sshfl [vmem:[#allocation3 + $0x28] sm:$0xff pattern:$0x32107654]  ;;  %v2071_v2 = vld [vmem:[#allocation3 + $0x38] sm:$0xff] }
  0x7f   :  { %vm1979_vm2 = vcmp.gt.f32.partialorder %v1972_v31, %v5936_v59  ;;  %1962 = vst [vmem:[#allocation1 + $0x18] sm:$0xff] %v5992_v42  ;;  %v5998_v48 = vsel %vm5524_vm3, %v1963_v45, %v1964_v47  ;;  %vm1984_vm4 = vcmp.gt.f32.partialorder %v5936_v59, %v1972_v31  ;;  %vm2011_vm5 = vcmp.gt.f32.partialorder %v2004_v40, %v2003_v43  ;;  %v2040_v34 = vld.sshfl [vmem:[#allocation3 + $0x30] sm:$0xff pattern:$0x32107654] }
  0x80   :  { %v1989_v50 = vsel %vm1979_vm2, %v1972_v31, %v5936_v59  ;;  %v1995_v55 = vsel %vm1979_vm2, %v1976_v37, %v5938_v46  ;;  %1968 = vst [vmem:[#allocation3 + $0x18] sm:$0xff] %v5998_v48  ;;  %v1990_v54 = vsel %vm1984_vm4, %v1972_v31, %v5936_v59  ;;  %v1996_v28 = vsel %vm1984_vm4, %v1976_v37, %v5938_v46  ;;  %v2067_v46 = vld [vmem:[#allocation1 + $0x38] sm:$0xff] }
  0x81   :  { %vm2016_vm6 = vcmp.gt.f32.partialorder %v2003_v43, %v2004_v40  ;;  %v6008_v53 = vsel %vm5524_vm3, %v1989_v50, %v1990_v54  ;;  %v6012_v57 = vsel %vm5524_vm3, %v1995_v55, %v1996_v28  ;;  %v2021_v59 = vsel %vm2011_vm5, %v2004_v40, %v2003_v43  ;;  %v2068_v44 = vld.sshfl [vmem:[#allocation1 + $0x38] sm:$0xff pattern:$0x32107654]  ;;  %v2104_v4 = vld.sshfl [vmem:[#allocation1] sm:$0xff pattern:$0x54761032] }
  0x82   :  { %v2022_v56 = vsel %vm2016_vm6, %v2004_v40, %v2003_v43  ;;  %1994 = vst [vmem:[#allocation1 + $0x20] sm:$0xff] %v6008_v53  ;;  %2000 = vst [vmem:[#allocation3 + $0x20] sm:$0xff] %v6012_v57  ;;  %v2027_v61 = vsel %vm2011_vm5, %v2008_v52, %v2007_v49  ;;  %v2028_v63 = vsel %vm2016_vm6, %v2008_v52, %v2007_v49  ;;  %v2072_v60 = vld.sshfl [vmem:[#allocation3 + $0x38] sm:$0xff pattern:$0x32107654] }
  0x83   :  { %v6018_v58 = vsel %vm5524_vm3, %v2021_v59, %v2022_v56  ;;  %vm2043_vm7 = vcmp.gt.f32.partialorder %v2036_v51, %v5944_v3  ;;  %v6024_v1 = vsel %vm5524_vm3, %v2027_v61, %v2028_v63  ;;  %vm2048_vm8 = vcmp.gt.f32.partialorder %v5944_v3, %v2036_v51  ;;  %v2108_v9 = vld.sshfl [vmem:[#allocation3] sm:$0xff pattern:$0x54761032]  ;;  %v2136_v14 = vld.sshfl [vmem:[#allocation1 + $0x8] sm:$0xff pattern:$0x54761032] }
  0x84   :  { %2026 = vst [vmem:[#allocation1 + $0x28] sm:$0xff] %v6018_v58  ;;  %v2053_v11 = vsel %vm2043_vm7, %v2036_v51, %v5944_v3  ;;  %v2059_v62 = vsel %vm2043_vm7, %v2040_v34, %v5946_v5  ;;  %2032 = vst [vmem:[#allocation3 + $0x28] sm:$0xff] %v6024_v1  ;;  %v2054_v3 = vsel %vm2048_vm8, %v2036_v51, %v5944_v3  ;;  %v2140_v23 = vld.sshfl [vmem:[#allocation3 + $0x8] sm:$0xff pattern:$0x54761032] }
  0x85   :  { %v2060_v5 = vsel %vm2048_vm8, %v2040_v34, %v5946_v5  ;;  %vm2075_vm9 = vcmp.gt.f32.partialorder %v2068_v44, %v2067_v46  ;;  %vm2080_vm10 = vcmp.gt.f32.partialorder %v2067_v46, %v2068_v44  ;;  %v6034_v6 = vsel %vm5524_vm3, %v2053_v11, %v2054_v3  ;;  %v2168_v27 = vld.sshfl [vmem:[#allocation1 + $0x10] sm:$0xff pattern:$0x54761032] }
  0x86   :  { %v6038_v21 = vsel %vm5524_vm3, %v2059_v62, %v2060_v5  ;;  %v2085_v13 = vsel %vm2075_vm9, %v2068_v44, %v2067_v46  ;;  %v2086_v15 = vsel %vm2080_vm10, %v2068_v44, %v2067_v46  ;;  %2058 = vst [vmem:[#allocation1 + $0x30] sm:$0xff] %v6034_v6  ;;  %v2091_v16 = vsel %vm2075_vm9, %v2072_v60, %v2071_v2  ;;  %v2172_v18 = vld.sshfl [vmem:[#allocation3 + $0x10] sm:$0xff pattern:$0x54761032] }
  0x87   :  { %2064 = vst [vmem:[#allocation3 + $0x30] sm:$0xff] %v6038_v21  ;;  %v6044_v12 = vsel %vm5524_vm3, %v2085_v13, %v2086_v15  ;;  %v2092_v22 = vsel %vm2080_vm10, %v2072_v60, %v2071_v2  ;;  %vm2111_vm11 = vcmp.gt.f32.partialorder %v2104_v4, %v5952_v7  ;;  %vm2116_vm12 = vcmp.gt.f32.partialorder %v5952_v7, %v2104_v4  ;;  %v2200_v31 = vld.sshfl [vmem:[#allocation1 + $0x18] sm:$0xff pattern:$0x54761032] }
  0x88   :  { %2090 = vst [vmem:[#allocation1 + $0x38] sm:$0xff] %v6044_v12  ;;  %v6050_v24 = vsel %vm5524_vm3, %v2091_v16, %v2092_v22  ;;  %v2121_v20 = vsel %vm2111_vm11, %v2104_v4, %v5952_v7  ;;  %v2127_v8 = vsel %vm2111_vm11, %v2108_v9, %v5956_v17  ;;  %v2122_v7 = vsel %vm2116_vm12, %v2104_v4, %v5952_v7  ;;  %v2204_v43 = vld.sshfl [vmem:[#allocation3 + $0x18] sm:$0xff pattern:$0x54761032] }
  0x89   :  { %2096 = vst [vmem:[#allocation3 + $0x38] sm:$0xff] %v6050_v24  ;;  %v2128_v17 = vsel %vm2116_vm12, %v2108_v9, %v5956_v17  ;;  %vm2143_vm14 = vcmp.gt.f32.partialorder %v2136_v14, %v5964_v25  ;;  %vm2148_vm15 = vcmp.gt.f32.partialorder %v5964_v25, %v2136_v14  ;;  %v6062_v29 = vsel %vm5262_vm13, %v2121_v20, %v2122_v7  ;;  %v2232_v40 = vld.sshfl [vmem:[#allocation1 + $0x20] sm:$0xff pattern:$0x54761032] }
  0x8a   :  { %v6066_v32 = vsel %vm5262_vm13, %v2127_v8, %v2128_v17  ;;  %v2153_v30 = vsel %vm2143_vm14, %v2136_v14, %v5964_v25  ;;  %v2154_v25 = vsel %vm2148_vm15, %v2136_v14, %v5964_v25  ;;  %2126 = vst [vmem:[#allocation1] sm:$0xff] %v6062_v29  ;;  %v2159_v39 = vsel %vm2143_vm14, %v2140_v23, %v5972_v26  ;;  %v2236_v45 = vld.sshfl [vmem:[#allocation3 + $0x20] sm:$0xff pattern:$0x54761032] }
  0x8b   :  { %2132 = vst [vmem:[#allocation3] sm:$0xff] %v6066_v32  ;;  %v6074_v33 = vsel %vm5262_vm13, %v2153_v30, %v2154_v25  ;;  %v2160_v26 = vsel %vm2148_vm15, %v2140_v23, %v5972_v26  ;;  %vm2175_vm1 = vcmp.gt.f32.partialorder %v2168_v27, %v5982_v36  ;;  %vm2180_vm2 = vcmp.gt.f32.partialorder %v5982_v36, %v2168_v27  ;;  %v2264_v55 = vld.sshfl [vmem:[#allocation1 + $0x28] sm:$0xff pattern:$0x54761032] }
  0x8c   :  { %2158 = vst [vmem:[#allocation1 + $0x8] sm:$0xff] %v6074_v33  ;;  %v6082_v37 = vsel %vm5262_vm13, %v2159_v39, %v2160_v26  ;;  %v2185_v38 = vsel %vm2175_vm1, %v2168_v27, %v5982_v36  ;;  %v2191_v41 = vsel %vm2175_vm1, %v2172_v18, %v5986_v35  ;;  %v2186_v36 = vsel %vm2180_vm2, %v2168_v27, %v5982_v36  ;;  %v2268_v59 = vld.sshfl [vmem:[#allocation3 + $0x28] sm:$0xff pattern:$0x54761032] }
  0x8d   :  { %2164 = vst [vmem:[#allocation3 + $0x8] sm:$0xff] %v6082_v37  ;;  %v2192_v35 = vsel %vm2180_vm2, %v2172_v18, %v5986_v35  ;;  %vm2207_vm4 = vcmp.gt.f32.partialorder %v2200_v31, %v5992_v42  ;;  %vm2212_vm5 = vcmp.gt.f32.partialorder %v5992_v42, %v2200_v31  ;;  %v6094_v47 = vsel %vm5262_vm13, %v2185_v38, %v2186_v36  ;;  %v2296_v56 = vld.sshfl [vmem:[#allocation1 + $0x30] sm:$0xff pattern:$0x54761032] }
  0x8e   :  { %v6098_v49 = vsel %vm5262_vm13, %v2191_v41, %v2192_v35  ;;  %v2217_v50 = vsel %vm2207_vm4, %v2200_v31, %v5992_v42  ;;  %v2218_v42 = vsel %vm2212_vm5, %v2200_v31, %v5992_v42  ;;  %2190 = vst [vmem:[#allocation1 + $0x10] sm:$0xff] %v6094_v47  ;;  %v2223_v51 = vsel %vm2207_vm4, %v2204_v43, %v5998_v48  ;;  %v2300_v46 = vld.sshfl [vmem:[#allocation3 + $0x30] sm:$0xff pattern:$0x54761032] }
  0x8f   :  { %2196 = vst [vmem:[#allocation3 + $0x10] sm:$0xff] %v6098_v49  ;;  %v6106_v52 = vsel %vm5262_vm13, %v2217_v50, %v2218_v42  ;;  %v2224_v48 = vsel %vm2212_vm5, %v2204_v43, %v5998_v48  ;;  %vm2239_vm6 = vcmp.gt.f32.partialorder %v2232_v40, %v6008_v53  ;;  %vm2244_vm7 = vcmp.gt.f32.partialorder %v6008_v53, %v2232_v40  ;;  %v2328_v2 = vld.sshfl [vmem:[#allocation1 + $0x38] sm:$0xff pattern:$0x54761032] }
  0x90   :  { %2222 = vst [vmem:[#allocation1 + $0x18] sm:$0xff] %v6106_v52  ;;  %v6114_v54 = vsel %vm5262_vm13, %v2223_v51, %v2224_v48  ;;  %v2249_v28 = vsel %vm2239_vm6, %v2232_v40, %v6008_v53  ;;  %v2255_v34 = vsel %vm2239_vm6, %v2236_v45, %v6012_v57  ;;  %v2250_v53 = vsel %vm2244_vm7, %v2232_v40, %v6008_v53  ;;  %v2332_v5 = vld.sshfl [vmem:[#allocation3 + $0x38] sm:$0xff pattern:$0x54761032] }
  0x91   :  { %2228 = vst [vmem:[#allocation3 + $0x18] sm:$0xff] %v6114_v54  ;;  %v2256_v57 = vsel %vm2244_vm7, %v2236_v45, %v6012_v57  ;;  %vm2271_vm8 = vcmp.gt.f32.partialorder %v2264_v55, %v6018_v58  ;;  %vm2276_vm9 = vcmp.gt.f32.partialorder %v6018_v58, %v2264_v55  ;;  %v6126_v44 = vsel %vm5262_vm13, %v2249_v28, %v2250_v53  ;;  %v2364_v9 = vld.sshfl [vmem:[#allocation1] sm:$0xff pattern:$0x67452301] }
  0x92   :  { %v6130_v61 = vsel %vm5262_vm13, %v2255_v34, %v2256_v57  ;;  %v2281_v63 = vsel %vm2271_vm8, %v2264_v55, %v6018_v58  ;;  %v2282_v58 = vsel %vm2276_vm9, %v2264_v55, %v6018_v58  ;;  %2254 = vst [vmem:[#allocation1 + $0x20] sm:$0xff] %v6126_v44  ;;  %v2287_v62 = vsel %vm2271_vm8, %v2268_v59, %v6024_v1  ;;  %v2368_v8 = vld.sshfl [vmem:[#allocation3] sm:$0xff pattern:$0x67452301] }
  0x93   :  { %2260 = vst [vmem:[#allocation3 + $0x20] sm:$0xff] %v6130_v61  ;;  %v6138_v11 = vsel %vm5262_vm13, %v2281_v63, %v2282_v58  ;;  %v2288_v1 = vsel %vm2276_vm9, %v2268_v59, %v6024_v1  ;;  %vm2303_vm10 = vcmp.gt.f32.partialorder %v2296_v56, %v6034_v6  ;;  %vm2308_vm11 = vcmp.gt.f32.partialorder %v6034_v6, %v2296_v56  ;;  %v2396_v16 = vld.sshfl [vmem:[#allocation1 + $0x8] sm:$0xff pattern:$0x67452301] }
  0x94   :  { %2286 = vst [vmem:[#allocation1 + $0x28] sm:$0xff] %v6138_v11  ;;  %v6146_v60 = vsel %vm5262_vm13, %v2287_v62, %v2288_v1  ;;  %v2313_v4 = vsel %vm2303_vm10, %v2296_v56, %v6034_v6  ;;  %v2319_v3 = vsel %vm2303_vm10, %v2300_v46, %v6038_v21  ;;  %v2314_v6 = vsel %vm2308_vm11, %v2296_v56, %v6034_v6  ;;  %v2400_v27 = vld.sshfl [vmem:[#allocation3 + $0x8] sm:$0xff pattern:$0x67452301] }
  0x95   :  { %2292 = vst [vmem:[#allocation3 + $0x28] sm:$0xff] %v6146_v60  ;;  %v2320_v21 = vsel %vm2308_vm11, %v2300_v46, %v6038_v21  ;;  %vm2335_vm12 = vcmp.gt.f32.partialorder %v2328_v2, %v6044_v12  ;;  %vm2340_vm14 = vcmp.gt.f32.partialorder %v6044_v12, %v2328_v2  ;;  %v6158_v13 = vsel %vm5262_vm13, %v2313_v4, %v2314_v6  ;;  %v2428_v7 = vld.sshfl [vmem:[#allocation1 + $0x10] sm:$0xff pattern:$0x67452301] }
  0x96   :  { %v6162_v15 = vsel %vm5262_vm13, %v2319_v3, %v2320_v21  ;;  %v2345_v14 = vsel %vm2335_vm12, %v2328_v2, %v6044_v12  ;;  %v2346_v12 = vsel %vm2340_vm14, %v2328_v2, %v6044_v12  ;;  %2318 = vst [vmem:[#allocation1 + $0x30] sm:$0xff] %v6158_v13  ;;  %v2351_v20 = vsel %vm2335_vm12, %v2332_v5, %v6050_v24  ;;  %v2432_v17 = vld.sshfl [vmem:[#allocation3 + $0x10] sm:$0xff pattern:$0x67452301] }
  0x97   :  { %2324 = vst [vmem:[#allocation3 + $0x30] sm:$0xff] %v6162_v15  ;;  %v6170_v22 = vsel %vm5262_vm13, %v2345_v14, %v2346_v12  ;;  %v2352_v24 = vsel %vm2340_vm14, %v2332_v5, %v6050_v24  ;;  %vm2371_vm15 = vcmp.gt.f32.partialorder %v2364_v9, %v6062_v29  ;;  %vm2376_vm1 = vcmp.gt.f32.partialorder %v6062_v29, %v2364_v9  ;;  %v2460_v25 = vld.sshfl [vmem:[#allocation1 + $0x18] sm:$0xff pattern:$0x67452301] }
  0x98   :  { %2350 = vst [vmem:[#allocation1 + $0x38] sm:$0xff] %v6170_v22  ;;  %v6178_v23 = vsel %vm5262_vm13, %v2351_v20, %v2352_v24  ;;  %vm2403_vm2 = vcmp.gt.f32.partialorder %v2396_v16, %v6074_v33  ;;  %vm2408_vm4 = vcmp.gt.f32.partialorder %v6074_v33, %v2396_v16  ;;  %v2381_v18 = vsel %vm2371_vm15, %v2364_v9, %v6062_v29  ;;  %v2464_v41 = vld.sshfl [vmem:[#allocation3 + $0x18] sm:$0xff pattern:$0x67452301] }
  0x99   :  { %2356 = vst [vmem:[#allocation3 + $0x38] sm:$0xff] %v6178_v23  ;;  %v2382_v29 = vsel %vm2376_vm1, %v2364_v9, %v6062_v29  ;;  %v2387_v30 = vsel %vm2371_vm15, %v2368_v8, %v6066_v32  ;;  %v2388_v32 = vsel %vm2376_vm1, %v2368_v8, %v6066_v32  ;;  %v2413_v31 = vsel %vm2403_vm2, %v2396_v16, %v6074_v33  ;;  %v6196_v43 = vld.sshfl [vmem:[#allocation1 + $0x20] sm:$0xff pattern:$0x67452301] }
  0x9a   :  { %v2414_v33 = vsel %vm2408_vm4, %v2396_v16, %v6074_v33  ;;  %v2419_v39 = vsel %vm2403_vm2, %v2400_v27, %v6082_v37  ;;  %vm2435_vm5 = vcmp.gt.f32.partialorder %v2428_v7, %v6094_v47  ;;  %v2420_v26 = vsel %vm2408_vm4, %v2400_v27, %v6082_v37  ;;  %v2496_v48 = vld.sshfl [vmem:[#allocation3 + $0x20] sm:$0xff pattern:$0x67452301] }
  0x9b   :  { %vm2440_vm6 = vcmp.gt.f32.partialorder %v6094_v47, %v2428_v7  ;;  %v2445_v37 = vsel %vm2435_vm5, %v2428_v7, %v6094_v47  ;;  %v2451_v38 = vsel %vm2435_vm5, %v2432_v17, %v6098_v49  ;;  %vm2467_vm7 = vcmp.gt.f32.partialorder %v2460_v25, %v6106_v52  ;;  %v6208_v50 = vld.sshfl [vmem:[#allocation1 + $0x28] sm:$0xff pattern:$0x67452301] }
  0x9c   :  { %v2446_v40 = vsel %vm2440_vm6, %v2428_v7, %v6094_v47  ;;  %v2452_v36 = vsel %vm2440_vm6, %v2432_v17, %v6098_v49  ;;  %vm2472_vm8 = vcmp.gt.f32.partialorder %v6106_v52, %v2460_v25  ;;  %v2477_v47 = vsel %vm2467_vm7, %v2460_v25, %v6106_v52  ;;  %v2528_v17 = vld.sshfl [vmem:[#allocation3 + $0x28] sm:$0xff pattern:$0x67452301] }
  0x9d   :  { %v2447_v35 = vsel %vm5192_vm0, %v2445_v37, %v2446_v40  ;;  %v2453_v45 = vsel %vm5192_vm0, %v2451_v38, %v2452_v36  ;;  %v2478_v49 = vsel %vm2472_vm8, %v2460_v25, %v6106_v52  ;;  %v2483_v55 = vsel %vm2467_vm7, %v2464_v41, %v6114_v54 }
  0x9e   :  { %2450 = vst [vmem:[#allocation1 + $0x10] sm:$0xff] %v2447_v35  ;;  %2456 = vst [vmem:[#allocation3 + $0x10] sm:$0xff] %v2453_v45  ;;  %v2479_v42 = vsel %vm5192_vm0, %v2477_v47, %v2478_v49  ;;  %v2484_v52 = vsel %vm2472_vm8, %v2464_v41, %v6114_v54  ;;  %vm2499_vm9 = vcmp.gt.f32.partialorder %v6196_v43, %v6126_v44  ;;  %v2556_v54 = vld.sshfl [vmem:[#allocation1 + $0x30] sm:$0xff pattern:$0x67452301] }
  0x9f   :  { %2482 = vst [vmem:[#allocation1 + $0x18] sm:$0xff] %v2479_v42  ;;  %v2485_v51 = vsel %vm5192_vm0, %v2483_v55, %v2484_v52  ;;  %vm2504_vm10 = vcmp.gt.f32.partialorder %v6126_v44, %v6196_v43  ;;  %v2383_v28 = vsel %vm5192_vm0, %v2381_v18, %v2382_v29  ;;  %vm2531_vm11 = vcmp.gt.f32.partialorder %v6208_v50, %v6138_v11  ;;  %v2560_v34 = vld.sshfl [vmem:[#allocation3 + $0x30] sm:$0xff pattern:$0x67452301] }
  0xa0   :  { %2488 = vst [vmem:[#allocation3 + $0x18] sm:$0xff] %v2485_v51  ;;  %vm2536_vm12 = vcmp.gt.f32.partialorder %v6138_v11, %v6208_v50  ;;  %v2389_v59 = vsel %vm5192_vm0, %v2387_v30, %v2388_v32  ;;  %v2415_v56 = vsel %vm5192_vm0, %v2413_v31, %v2414_v33  ;;  %v2421_v53 = vsel %vm5192_vm0, %v2419_v39, %v2420_v26  ;;  %v2588_v46 = vld.sshfl [vmem:[#allocation1 + $0x38] sm:$0xff pattern:$0x67452301] }
  0xa1   :  { %v2509_v57 = vsel %vm2499_vm9, %v6196_v43, %v6126_v44  ;;  %v2510_v63 = vsel %vm2504_vm10, %v6196_v43, %v6126_v44  ;;  %v2515_v58 = vsel %vm2499_vm9, %v2496_v48, %v6130_v61  ;;  %v2541_v2 = vsel %vm2531_vm11, %v6208_v50, %v6138_v11  ;;  %v2592_v3 = vld.sshfl [vmem:[#allocation3 + $0x38] sm:$0xff pattern:$0x67452301] }
  0xa2   :  { %vm2563_vm14 = vcmp.gt.f32.partialorder %v2556_v54, %v6158_v13  ;;  %v2542_v62 = vsel %vm2536_vm12, %v6208_v50, %v6138_v11  ;;  %vm2568_vm15 = vcmp.gt.f32.partialorder %v6158_v13, %v2556_v54  ;;  %vm2595_vm1 = vcmp.gt.f32.partialorder %v2588_v46, %v6170_v22 }
  0xa3   :  { %v2573_v1 = vsel %vm2563_vm14, %v2556_v54, %v6158_v13  ;;  %v2579_v4 = vsel %vm2563_vm14, %v2560_v34, %v6162_v15  ;;  %v2574_v5 = vsel %vm2568_vm15, %v2556_v54, %v6158_v13  ;;  %v2580_v9 = vsel %vm2568_vm15, %v2560_v34, %v6162_v15 }
  0xa4   :  { %vm2600_vm2 = vcmp.gt.f32.partialorder %v6170_v22, %v2588_v46  ;;  %v2575_v6 = vsel %vm5192_vm0, %v2573_v1, %v2574_v5  ;;  %v2581_v21 = vsel %vm5192_vm0, %v2579_v4, %v2580_v9  ;;  %v2605_v13 = vsel %vm2595_vm1, %v2588_v46, %v6170_v22 }
  0xa5   :  { %v2606_v15 = vsel %vm2600_vm2, %v2588_v46, %v6170_v22  ;;  %v2662_v14 = vld [vmem:[#allocation1 + $0x17] ss:$-1 sm:$0xff]  ;;  %2578 = vst [vmem:[#allocation1 + $0x30] sm:$0xff] %v2575_v6  ;;  %2584 = vst [vmem:[#allocation3 + $0x30] sm:$0xff] %v2581_v21  ;;  %v2611_v16 = vsel %vm2595_vm1, %v2592_v3, %v6178_v23  ;;  %v2612_v22 = vsel %vm2600_vm2, %v2592_v3, %v6178_v23 }
  0xa6   :  { %v2607_v12 = vsel %vm5192_vm0, %v2605_v13, %v2606_v15  ;;  %v2624_v20 = vld [vmem:[#allocation1 + $0x1f] ss:$-1 sm:$0xff]  ;;  %v2669_v24 = vld [vmem:[#allocation3 + $0x17] ss:$-1 sm:$0xff]  ;;  %vm2672_vm4 = vcmp.gt.f32.partialorder %v2662_v14, %v2415_v56  ;;  %v2613_v8 = vsel %vm5192_vm0, %v2611_v16, %v2612_v22  ;;  %v2516_v44 = vsel %vm2504_vm10, %v2496_v48, %v6130_v61 }
  0xa7   :  { %2610 = vst [vmem:[#allocation1 + $0x38] sm:$0xff] %v2607_v12  ;;  %v2631_v23 = vld [vmem:[#allocation3 + $0x1f] ss:$-1 sm:$0xff]  ;;  %vm2634_vm5 = vcmp.gt.f32.partialorder %v2624_v20, %v2383_v28  ;;  %v2677_v27 = vsel %vm2672_vm4, %v2662_v14, %v2415_v56  ;;  %v2678_v7 = vsel %vm2672_vm4, %v2415_v56, %v2662_v14  ;;  %2616 = vst [vmem:[#allocation3 + $0x38] sm:$0xff] %v2613_v8 }
  0xa8   :  { %v2639_v18 = vsel %vm2634_vm5, %v2624_v20, %v2383_v28  ;;  %v2640_v29 = vsel %vm2634_vm5, %v2383_v28, %v2624_v20  ;;  %v2647_v30 = vsel %vm2634_vm5, %v2631_v23, %v2389_v59  ;;  %v2648_v32 = vsel %vm2634_vm5, %v2389_v59, %v2631_v23  ;;  %2684 = vst [vmem:[#allocation1 + $0x17] ss:$-1 sm:$0xff] %v2678_v7 }
  0xa9   :  { %2646 = vst [vmem:[#allocation1 + $0x1f] ss:$-1 sm:$0xff] %v2640_v29  ;;  %2654 = vst [vmem:[#allocation3 + $0x1f] ss:$-1 sm:$0xff] %v2648_v32  ;;  %v2685_v61 = vsel %vm2672_vm4, %v2669_v24, %v2421_v53  ;;  %v2686_v25 = vsel %vm2672_vm4, %v2421_v53, %v2669_v24  ;;  %vm2784_vm6 = vcmp.gt.f32.partialorder %v2677_v27, %v2639_v18 }
  0xaa   :  { %2692 = vst [vmem:[#allocation3 + $0x17] ss:$-1 sm:$0xff] %v2686_v25  ;;  %v6284_v31 = vsel %vm2784_vm6, %v2677_v27, %v2639_v18  ;;  %v6286_v33 = vsel %vm2784_vm6, %v2639_v18, %v2677_v27  ;;  %v6288_v39 = vsel %vm2784_vm6, %v2685_v61, %v2647_v30  ;;  %v6290_v26 = vsel %vm2784_vm6, %v2647_v30, %v2685_v61 }
  0xab   :  { %v2543_v37 = vsel %vm5192_vm0, %v2541_v2, %v2542_v62  ;;  %v2547_v38 = vsel %vm2531_vm11, %v2528_v17, %v6146_v60  ;;  %v2548_v11 = vsel %vm2536_vm12, %v2528_v17, %v6146_v60  ;;  %2793 = vst [vmem:[#allocation1] sm:$0xff] %v6284_v31  ;;  %2796 = vst [vmem:[#allocation1 + $0x8] sm:$0xff] %v6286_v33 }
  0xac   :  { %2801 = vst [vmem:[#allocation3] sm:$0xff] %v6288_v39  ;;  %2804 = vst [vmem:[#allocation3 + $0x8] sm:$0xff] %v6290_v26  ;;  %v2511_v60 = vsel %vm5192_vm0, %v2509_v57, %v2510_v63  ;;  %v2517_v41 = vsel %vm5192_vm0, %v2515_v58, %v2516_v44  ;;  %v2738_v43 = vld [vmem:[#allocation1 + $0x37] ss:$-1 sm:$0xff]  ;;  %v2549_v40 = vsel %vm5192_vm0, %v2547_v38, %v2548_v11 }
  0xad   :  { %v2745_v35 = vld [vmem:[#allocation3 + $0x37] ss:$-1 sm:$0xff]  ;;  %vm2748_vm7 = vcmp.gt.f32.partialorder %v2738_v43, %v2543_v37 }
  0xae   :  { %v2700_v36 = vld [vmem:[#allocation1 + $0x3f] ss:$-1 sm:$0xff]  ;;  %v2753_v47 = vsel %vm2748_vm7, %v2738_v43, %v2543_v37  ;;  %v2754_v49 = vsel %vm2748_vm7, %v2543_v37, %v2738_v43  ;;  %v2761_v50 = vsel %vm2748_vm7, %v2745_v35, %v2549_v40  ;;  %v2762_v34 = vsel %vm2748_vm7, %v2549_v40, %v2745_v35 }
  0xaf   :  { %v2707_v45 = vld [vmem:[#allocation3 + $0x3f] ss:$-1 sm:$0xff]  ;;  %vm2710_vm8 = vcmp.gt.f32.partialorder %v2700_v36, %v2511_v60  ;;  %v2810_v42 = vld [vmem:[#allocation1 + $0x10] sm:$0xff]  ;;  %2760 = vst [vmem:[#allocation1 + $0x37] ss:$-1 sm:$0xff] %v2754_v49 }
  0xb0   :  { %v2715_v55 = vsel %vm2710_vm8, %v2700_v36, %v2511_v60  ;;  %v2716_v52 = vsel %vm2710_vm8, %v2511_v60, %v2700_v36  ;;  %v2723_v51 = vsel %vm2710_vm8, %v2707_v45, %v2517_v41  ;;  %v2724_v48 = vsel %vm2710_vm8, %v2517_v41, %v2707_v45  ;;  %v2811_v54 = vld [vmem:[#allocation1 + $0x18] sm:$0xff]  ;;  %2768 = vst [vmem:[#allocation3 + $0x37] ss:$-1 sm:$0xff] %v2762_v34 }
  0xb1   :  { %v2817_v28 = vld [vmem:[#allocation3 + $0x18] sm:$0xff]  ;;  %2722 = vst [vmem:[#allocation1 + $0x3f] ss:$-1 sm:$0xff] %v2716_v52  ;;  %2730 = vst [vmem:[#allocation3 + $0x3f] ss:$-1 sm:$0xff] %v2724_v48  ;;  %v2816_v59 = vld [vmem:[#allocation3 + $0x10] sm:$0xff]  ;;  %vm2820_vm9 = vcmp.gt.f32.partialorder %v2811_v54, %v2810_v42  ;;  %vm2856_vm10 = vcmp.gt.f32.partialorder %v2753_v47, %v2715_v55 }
  0xb2   :  { %v6316_v56 = vsel %vm2820_vm9, %v2811_v54, %v2810_v42  ;;  %v6318_v53 = vsel %vm2820_vm9, %v2810_v42, %v2811_v54  ;;  %v2833_v57 = vsel %vm2820_vm9, %v2817_v28, %v2816_v59  ;;  %v6320_v46 = vsel %vm2820_vm9, %v2816_v59, %v2817_v28  ;;  %v2920_v63 = vld.sshfl [vmem:[#allocation1] sm:$0xff pattern:$0x32107654]  ;;  %v2952_v3 = vld.sshfl [vmem:[#allocation1 + $0x8] sm:$0xff pattern:$0x32107654] }
  0xb3   :  { %v2924_v58 = vld.sshfl [vmem:[#allocation3] sm:$0xff pattern:$0x32107654]  ;;  %2829 = vst [vmem:[#allocation1 + $0x10] sm:$0xff] %v6316_v56  ;;  %2832 = vst [vmem:[#allocation1 + $0x18] sm:$0xff] %v6318_v53  ;;  %v6325_v2 = vsel %vm2856_vm10, %v2753_v47, %v2715_v55  ;;  %v6327_v62 = vsel %vm2856_vm10, %v2715_v55, %v2753_v47  ;;  %v6329_v1 = vsel %vm2856_vm10, %v2761_v50, %v2723_v51 }
  0xb4   :  { %2837 = vst [vmem:[#allocation3 + $0x10] sm:$0xff] %v2833_v57  ;;  %2840 = vst [vmem:[#allocation3 + $0x18] sm:$0xff] %v6320_v46  ;;  %v6331_v4 = vsel %vm2856_vm10, %v2723_v51, %v2761_v50  ;;  %vm2927_vm11 = vcmp.gt.f32.partialorder %v2920_v63, %v6284_v31  ;;  %vm2932_vm12 = vcmp.gt.f32.partialorder %v6284_v31, %v2920_v63  ;;  %v2956_v5 = vld.sshfl [vmem:[#allocation3 + $0x8] sm:$0xff pattern:$0x32107654] }
  0xb5   :  { %2865 = vst [vmem:[#allocation1 + $0x20] sm:$0xff] %v6325_v2  ;;  %2868 = vst [vmem:[#allocation1 + $0x28] sm:$0xff] %v6327_v62  ;;  %vm2959_vm14 = vcmp.gt.f32.partialorder %v2952_v3, %v6286_v33  ;;  %vm2964_vm15 = vcmp.gt.f32.partialorder %v6286_v33, %v2952_v3  ;;  %v2937_v9 = vsel %vm2927_vm11, %v2920_v63, %v6284_v31 }
  0xb6   :  { %2873 = vst [vmem:[#allocation3 + $0x20] sm:$0xff] %v6329_v1  ;;  %2876 = vst [vmem:[#allocation3 + $0x28] sm:$0xff] %v6331_v4  ;;  %v2938_v6 = vsel %vm2932_vm12, %v2920_v63, %v6284_v31  ;;  %v2943_v21 = vsel %vm2927_vm11, %v2924_v58, %v6288_v39  ;;  %v2944_v13 = vsel %vm2932_vm12, %v2924_v58, %v6288_v39  ;;  %v2882_v22 = vld [vmem:[#allocation1 + $0x30] sm:$0xff] }
  0xb7   :  { %v6347_v15 = vsel %vm5524_vm3, %v2937_v9, %v2938_v6  ;;  %v6351_v14 = vsel %vm5524_vm3, %v2943_v21, %v2944_v13  ;;  %v2969_v12 = vsel %vm2959_vm14, %v2952_v3, %v6286_v33  ;;  %v2970_v16 = vsel %vm2964_vm15, %v2952_v3, %v6286_v33  ;;  %v2888_v17 = vld [vmem:[#allocation3 + $0x30] sm:$0xff] }
  0xb8   :  { %2942 = vst [vmem:[#allocation1] sm:$0xff] %v6347_v15  ;;  %2948 = vst [vmem:[#allocation3] sm:$0xff] %v6351_v14  ;;  %v6359_v20 = vsel %vm5524_vm3, %v2969_v12, %v2970_v16  ;;  %v2975_v24 = vsel %vm2959_vm14, %v2956_v5, %v6290_v26  ;;  %v2976_v8 = vsel %vm2964_vm15, %v2956_v5, %v6290_v26  ;;  %v2883_v23 = vld [vmem:[#allocation1 + $0x38] sm:$0xff] }
  0xb9   :  { %v2889_v27 = vld [vmem:[#allocation3 + $0x38] sm:$0xff]  ;;  %2974 = vst [vmem:[#allocation1 + $0x8] sm:$0xff] %v6359_v20  ;;  %v6366_v7 = vsel %vm5524_vm3, %v2975_v24, %v2976_v8  ;;  %vm2892_vm1 = vcmp.gt.f32.partialorder %v2883_v23, %v2882_v22 }
  0xba   :  { %2980 = vst [vmem:[#allocation3 + $0x8] sm:$0xff] %v6366_v7  ;;  %v6369_v18 = vsel %vm2892_vm1, %v2883_v23, %v2882_v22  ;;  %v6371_v29 = vsel %vm2892_vm1, %v2882_v22, %v2883_v23  ;;  %v6373_v30 = vsel %vm2892_vm1, %v2889_v27, %v2888_v17  ;;  %v6375_v32 = vsel %vm2892_vm1, %v2888_v17, %v2889_v27  ;;  %v2984_v44 = vld.sshfl [vmem:[#allocation1 + $0x10] sm:$0xff pattern:$0x32107654] }
  0xbb   :  { %v2988_v61 = vld.sshfl [vmem:[#allocation3 + $0x10] sm:$0xff pattern:$0x32107654]  ;;  %2901 = vst [vmem:[#allocation1 + $0x30] sm:$0xff] %v6369_v18  ;;  %2904 = vst [vmem:[#allocation1 + $0x38] sm:$0xff] %v6371_v29  ;;  %vm2991_vm2 = vcmp.gt.f32.partialorder %v2984_v44, %v6316_v56  ;;  %vm2996_vm4 = vcmp.gt.f32.partialorder %v6316_v56, %v2984_v44 }
  0xbc   :  { %2909 = vst [vmem:[#allocation3 + $0x30] sm:$0xff] %v6373_v30  ;;  %2912 = vst [vmem:[#allocation3 + $0x38] sm:$0xff] %v6375_v32  ;;  %v3016_v25 = vld.sshfl [vmem:[#allocation1 + $0x18] sm:$0xff pattern:$0x32107654]  ;;  %v3001_v33 = vsel %vm2991_vm2, %v2984_v44, %v6316_v56  ;;  %v3002_v39 = vsel %vm2996_vm4, %v2984_v44, %v6316_v56  ;;  %v3007_v26 = vsel %vm2991_vm2, %v2988_v61, %v2833_v57 }
  0xbd   :  { %v3020_v31 = vld.sshfl [vmem:[#allocation3 + $0x18] sm:$0xff pattern:$0x32107654]  ;;  %v3008_v37 = vsel %vm2996_vm4, %v2988_v61, %v2833_v57  ;;  %v3048_v38 = vld.sshfl [vmem:[#allocation1 + $0x20] sm:$0xff pattern:$0x32107654]  ;;  %v6387_v11 = vsel %vm5524_vm3, %v3001_v33, %v3002_v39  ;;  %vm3023_vm5 = vcmp.gt.f32.partialorder %v3016_v25, %v6318_v53  ;;  %vm3028_vm6 = vcmp.gt.f32.partialorder %v6318_v53, %v3016_v25 }
  0xbe   :  { %v6391_v60 = vsel %vm5524_vm3, %v3007_v26, %v3008_v37  ;;  %v3052_v41 = vld.sshfl [vmem:[#allocation3 + $0x20] sm:$0xff pattern:$0x32107654]  ;;  %3006 = vst [vmem:[#allocation1 + $0x10] sm:$0xff] %v6387_v11  ;;  %v3033_v43 = vsel %vm3023_vm5, %v3016_v25, %v6318_v53  ;;  %v3034_v40 = vsel %vm3028_vm6, %v3016_v25, %v6318_v53  ;;  %v3039_v36 = vsel %vm3023_vm5, %v3020_v31, %v6320_v46 }
  0xbf   :  { %3012 = vst [vmem:[#allocation3 + $0x10] sm:$0xff] %v6391_v60  ;;  %v3040_v35 = vsel %vm3028_vm6, %v3020_v31, %v6320_v46  ;;  %v3080_v45 = vld.sshfl [vmem:[#allocation1 + $0x28] sm:$0xff pattern:$0x32107654]  ;;  %v6403_v47 = vsel %vm5524_vm3, %v3033_v43, %v3034_v40  ;;  %vm3055_vm7 = vcmp.gt.f32.partialorder %v3048_v38, %v6325_v2  ;;  %vm3060_vm8 = vcmp.gt.f32.partialorder %v6325_v2, %v3048_v38 }
  0xc0   :  { %v6407_v49 = vsel %vm5524_vm3, %v3039_v36, %v3040_v35  ;;  %v3084_v50 = vld.sshfl [vmem:[#allocation3 + $0x28] sm:$0xff pattern:$0x32107654]  ;;  %3038 = vst [vmem:[#allocation1 + $0x18] sm:$0xff] %v6403_v47  ;;  %v3065_v42 = vsel %vm3055_vm7, %v3048_v38, %v6325_v2  ;;  %v3066_v55 = vsel %vm3060_vm8, %v3048_v38, %v6325_v2  ;;  %v3071_v52 = vsel %vm3055_vm7, %v3052_v41, %v6329_v1 }
  0xc1   :  { %3044 = vst [vmem:[#allocation3 + $0x18] sm:$0xff] %v6407_v49  ;;  %v3072_v51 = vsel %vm3060_vm8, %v3052_v41, %v6329_v1  ;;  %v6419_v48 = vsel %vm5524_vm3, %v3065_v42, %v3066_v55  ;;  %vm3087_vm9 = vcmp.gt.f32.partialorder %v3080_v45, %v6327_v62  ;;  %vm3092_vm10 = vcmp.gt.f32.partialorder %v6327_v62, %v3080_v45  ;;  %v3180_v5 = vld.sshfl [vmem:[#allocation1] sm:$0xff pattern:$0x54761032] }
  0xc2   :  { %v6423_v54 = vsel %vm5524_vm3, %v3071_v52, %v3072_v51  ;;  %3070 = vst [vmem:[#allocation1 + $0x20] sm:$0xff] %v6419_v48  ;;  %v3097_v28 = vsel %vm3087_vm9, %v3080_v45, %v6327_v62  ;;  %v3098_v34 = vsel %vm3092_vm10, %v3080_v45, %v6327_v62  ;;  %v3103_v59 = vsel %vm3087_vm9, %v3084_v50, %v6331_v4  ;;  %v3112_v53 = vld.sshfl [vmem:[#allocation1 + $0x30] sm:$0xff pattern:$0x32107654] }
  0xc3   :  { %3076 = vst [vmem:[#allocation3 + $0x20] sm:$0xff] %v6423_v54  ;;  %v3104_v56 = vsel %vm3092_vm10, %v3084_v50, %v6331_v4  ;;  %v3116_v57 = vld.sshfl [vmem:[#allocation3 + $0x30] sm:$0xff pattern:$0x32107654]  ;;  %v6435_v46 = vsel %vm5524_vm3, %v3097_v28, %v3098_v34  ;;  %vm3119_vm11 = vcmp.gt.f32.partialorder %v3112_v53, %v6369_v18  ;;  %vm3124_vm12 = vcmp.gt.f32.partialorder %v6369_v18, %v3112_v53 }
  0xc4   :  { %v6439_v63 = vsel %vm5524_vm3, %v3103_v59, %v3104_v56  ;;  %v3144_v58 = vld.sshfl [vmem:[#allocation1 + $0x38] sm:$0xff pattern:$0x32107654]  ;;  %3102 = vst [vmem:[#allocation1 + $0x28] sm:$0xff] %v6435_v46  ;;  %v3129_v62 = vsel %vm3119_vm11, %v3112_v53, %v6369_v18  ;;  %v3130_v1 = vsel %vm3124_vm12, %v3112_v53, %v6369_v18  ;;  %v3135_v4 = vsel %vm3119_vm11, %v3116_v57, %v6373_v30 }
  0xc5   :  { %v3148_v2 = vld.sshfl [vmem:[#allocation3 + $0x38] sm:$0xff pattern:$0x32107654]  ;;  %3108 = vst [vmem:[#allocation3 + $0x28] sm:$0xff] %v6439_v63  ;;  %v3136_v3 = vsel %vm3124_vm12, %v3116_v57, %v6373_v30  ;;  %v6451_v9 = vsel %vm5524_vm3, %v3129_v62, %v3130_v1  ;;  %vm3151_vm14 = vcmp.gt.f32.partialorder %v3144_v58, %v6371_v29  ;;  %vm3156_vm15 = vcmp.gt.f32.partialorder %v6371_v29, %v3144_v58 }
  0xc6   :  { %v6455_v6 = vsel %vm5524_vm3, %v3135_v4, %v3136_v3  ;;  %v3184_v21 = vld.sshfl [vmem:[#allocation3] sm:$0xff pattern:$0x54761032]  ;;  %3134 = vst [vmem:[#allocation1 + $0x30] sm:$0xff] %v6451_v9  ;;  %v3161_v13 = vsel %vm3151_vm14, %v3144_v58, %v6371_v29  ;;  %v3162_v12 = vsel %vm3156_vm15, %v3144_v58, %v6371_v29  ;;  %v3167_v16 = vsel %vm3151_vm14, %v3148_v2, %v6375_v32 }
  0xc7   :  { %3140 = vst [vmem:[#allocation3 + $0x30] sm:$0xff] %v6455_v6  ;;  %v3168_v22 = vsel %vm3156_vm15, %v3148_v2, %v6375_v32  ;;  %v3212_v24 = vld.sshfl [vmem:[#allocation1 + $0x8] sm:$0xff pattern:$0x54761032]  ;;  %v6467_v8 = vsel %vm5524_vm3, %v3161_v13, %v3162_v12  ;;  %vm3187_vm1 = vcmp.gt.f32.partialorder %v3180_v5, %v6347_v15  ;;  %vm3192_vm2 = vcmp.gt.f32.partialorder %v6347_v15, %v3180_v5 }
  0xc8   :  { %v6471_v23 = vsel %vm5524_vm3, %v3167_v16, %v3168_v22  ;;  %v3216_v27 = vld.sshfl [vmem:[#allocation3 + $0x8] sm:$0xff pattern:$0x54761032]  ;;  %3166 = vst [vmem:[#allocation1 + $0x38] sm:$0xff] %v6467_v8  ;;  %v3197_v17 = vsel %vm3187_vm1, %v3180_v5, %v6347_v15  ;;  %v3198_v15 = vsel %vm3192_vm2, %v3180_v5, %v6347_v15  ;;  %v3203_v18 = vsel %vm3187_vm1, %v3184_v21, %v6351_v14 }
  0xc9   :  { %3172 = vst [vmem:[#allocation3 + $0x38] sm:$0xff] %v6471_v23  ;;  %v3204_v14 = vsel %vm3192_vm2, %v3184_v21, %v6351_v14  ;;  %v3244_v29 = vld.sshfl [vmem:[#allocation1 + $0x10] sm:$0xff pattern:$0x54761032]  ;;  %v6483_v30 = vsel %vm5262_vm13, %v3197_v17, %v3198_v15  ;;  %vm3219_vm4 = vcmp.gt.f32.partialorder %v3212_v24, %v6359_v20  ;;  %vm3224_vm5 = vcmp.gt.f32.partialorder %v6359_v20, %v3212_v24 }
  0xca   :  { %v6487_v32 = vsel %vm5262_vm13, %v3203_v18, %v3204_v14  ;;  %v3248_v44 = vld.sshfl [vmem:[#allocation3 + $0x10] sm:$0xff pattern:$0x54761032]  ;;  %3202 = vst [vmem:[#allocation1] sm:$0xff] %v6483_v30  ;;  %v3229_v61 = vsel %vm3219_vm4, %v3212_v24, %v6359_v20  ;;  %v3230_v20 = vsel %vm3224_vm5, %v3212_v24, %v6359_v20  ;;  %v3235_v25 = vsel %vm3219_vm4, %v3216_v27, %v6366_v7 }
  0xcb   :  { %3208 = vst [vmem:[#allocation3] sm:$0xff] %v6487_v32  ;;  %v3236_v7 = vsel %vm3224_vm5, %v3216_v27, %v6366_v7  ;;  %v3276_v31 = vld.sshfl [vmem:[#allocation1 + $0x18] sm:$0xff pattern:$0x54761032]  ;;  %v6499_v33 = vsel %vm5262_vm13, %v3229_v61, %v3230_v20  ;;  %vm3251_vm6 = vcmp.gt.f32.partialorder %v3244_v29, %v6387_v11  ;;  %vm3256_vm7 = vcmp.gt.f32.partialorder %v6387_v11, %v3244_v29 }
  0xcc   :  { %v6503_v39 = vsel %vm5262_vm13, %v3235_v25, %v3236_v7  ;;  %v3280_v26 = vld.sshfl [vmem:[#allocation3 + $0x18] sm:$0xff pattern:$0x54761032]  ;;  %3234 = vst [vmem:[#allocation1 + $0x8] sm:$0xff] %v6499_v33  ;;  %v3261_v37 = vsel %vm3251_vm6, %v3244_v29, %v6387_v11  ;;  %v3262_v38 = vsel %vm3256_vm7, %v3244_v29, %v6387_v11  ;;  %v3267_v11 = vsel %vm3251_vm6, %v3248_v44, %v6391_v60 }
  0xcd   :  { %3240 = vst [vmem:[#allocation3 + $0x8] sm:$0xff] %v6503_v39  ;;  %v3268_v60 = vsel %vm3256_vm7, %v3248_v44, %v6391_v60  ;;  %v3308_v41 = vld.sshfl [vmem:[#allocation1 + $0x20] sm:$0xff pattern:$0x54761032]  ;;  %v6515_v43 = vsel %vm5262_vm13, %v3261_v37, %v3262_v38  ;;  %vm3283_vm8 = vcmp.gt.f32.partialorder %v3276_v31, %v6403_v47  ;;  %vm3288_vm9 = vcmp.gt.f32.partialorder %v6403_v47, %v3276_v31 }
  0xce   :  { %v6519_v40 = vsel %vm5262_vm13, %v3267_v11, %v3268_v60  ;;  %v3312_v36 = vld.sshfl [vmem:[#allocation3 + $0x20] sm:$0xff pattern:$0x54761032]  ;;  %3266 = vst [vmem:[#allocation1 + $0x10] sm:$0xff] %v6515_v43  ;;  %v3293_v35 = vsel %vm3283_vm8, %v3276_v31, %v6403_v47  ;;  %v3294_v45 = vsel %vm3288_vm9, %v3276_v31, %v6403_v47  ;;  %v3299_v47 = vsel %vm3283_vm8, %v3280_v26, %v6407_v49 }
  0xcf   :  { %3272 = vst [vmem:[#allocation3 + $0x10] sm:$0xff] %v6519_v40  ;;  %v3300_v49 = vsel %vm3288_vm9, %v3280_v26, %v6407_v49  ;;  %v3340_v50 = vld.sshfl [vmem:[#allocation1 + $0x28] sm:$0xff pattern:$0x54761032]  ;;  %v6531_v42 = vsel %vm5262_vm13, %v3293_v35, %v3294_v45  ;;  %vm3315_vm10 = vcmp.gt.f32.partialorder %v3308_v41, %v6419_v48  ;;  %vm3320_vm11 = vcmp.gt.f32.partialorder %v6419_v48, %v3308_v41 }
  0xd0   :  { %v6535_v55 = vsel %vm5262_vm13, %v3299_v47, %v3300_v49  ;;  %v3344_v52 = vld.sshfl [vmem:[#allocation3 + $0x28] sm:$0xff pattern:$0x54761032]  ;;  %3298 = vst [vmem:[#allocation1 + $0x18] sm:$0xff] %v6531_v42  ;;  %v3325_v51 = vsel %vm3315_vm10, %v3308_v41, %v6419_v48  ;;  %v3326_v48 = vsel %vm3320_vm11, %v3308_v41, %v6419_v48  ;;  %v3331_v28 = vsel %vm3315_vm10, %v3312_v36, %v6423_v54 }
  0xd1   :  { %3304 = vst [vmem:[#allocation3 + $0x18] sm:$0xff] %v6535_v55  ;;  %v3332_v54 = vsel %vm3320_vm11, %v3312_v36, %v6423_v54  ;;  %v3372_v34 = vld.sshfl [vmem:[#allocation1 + $0x30] sm:$0xff pattern:$0x54761032]  ;;  %v6547_v59 = vsel %vm5262_vm13, %v3325_v51, %v3326_v48  ;;  %vm3347_vm12 = vcmp.gt.f32.partialorder %v3340_v50, %v6435_v46  ;;  %vm3352_vm14 = vcmp.gt.f32.partialorder %v6435_v46, %v3340_v50 }
  0xd2   :  { %v6551_v56 = vsel %vm5262_vm13, %v3331_v28, %v3332_v54  ;;  %v3376_v53 = vld.sshfl [vmem:[#allocation3 + $0x30] sm:$0xff pattern:$0x54761032]  ;;  %3330 = vst [vmem:[#allocation1 + $0x20] sm:$0xff] %v6547_v59  ;;  %v3357_v57 = vsel %vm3347_vm12, %v3340_v50, %v6435_v46  ;;  %v3358_v46 = vsel %vm3352_vm14, %v3340_v50, %v6435_v46  ;;  %v3363_v58 = vsel %vm3347_vm12, %v3344_v52, %v6439_v63 }
  0xd3   :  { %3336 = vst [vmem:[#allocation3 + $0x20] sm:$0xff] %v6551_v56  ;;  %v3364_v63 = vsel %vm3352_vm14, %v3344_v52, %v6439_v63  ;;  %v3404_v2 = vld.sshfl [vmem:[#allocation1 + $0x38] sm:$0xff pattern:$0x54761032]  ;;  %v6563_v62 = vsel %vm5262_vm13, %v3357_v57, %v3358_v46  ;;  %vm3379_vm15 = vcmp.gt.f32.partialorder %v3372_v34, %v6451_v9  ;;  %vm3384_vm1 = vcmp.gt.f32.partialorder %v6451_v9, %v3372_v34 }
  0xd4   :  { %v6567_v1 = vsel %vm5262_vm13, %v3363_v58, %v3364_v63  ;;  %v3408_v4 = vld.sshfl [vmem:[#allocation3 + $0x38] sm:$0xff pattern:$0x54761032]  ;;  %3362 = vst [vmem:[#allocation1 + $0x28] sm:$0xff] %v6563_v62  ;;  %v3389_v3 = vsel %vm3379_vm15, %v3372_v34, %v6451_v9  ;;  %v3390_v5 = vsel %vm3384_vm1, %v3372_v34, %v6451_v9  ;;  %v3395_v9 = vsel %vm3379_vm15, %v3376_v53, %v6455_v6 }
  0xd5   :  { %3368 = vst [vmem:[#allocation3 + $0x28] sm:$0xff] %v6567_v1  ;;  %v3396_v6 = vsel %vm3384_vm1, %v3376_v53, %v6455_v6  ;;  %v6579_v21 = vsel %vm5262_vm13, %v3389_v3, %v3390_v5  ;;  %vm3411_vm2 = vcmp.gt.f32.partialorder %v3404_v2, %v6467_v8  ;;  %vm3416_vm4 = vcmp.gt.f32.partialorder %v6467_v8, %v3404_v2  ;;  %v6603_v27 = vld.sshfl [vmem:[#allocation1 + $0x10] sm:$0xff pattern:$0x67452301] }
  0xd6   :  { %v6583_v13 = vsel %vm5262_vm13, %v3395_v9, %v3396_v6  ;;  %3394 = vst [vmem:[#allocation1 + $0x30] sm:$0xff] %v6579_v21  ;;  %v3421_v12 = vsel %vm3411_vm2, %v3404_v2, %v6467_v8  ;;  %v3422_v16 = vsel %vm3416_vm4, %v3404_v2, %v6467_v8  ;;  %v3427_v22 = vsel %vm3411_vm2, %v3408_v4, %v6471_v23  ;;  %v6605_v17 = vld.sshfl [vmem:[#allocation1 + $0x8] sm:$0xff pattern:$0x67452301] }
  0xd7   :  { %3400 = vst [vmem:[#allocation3 + $0x30] sm:$0xff] %v6583_v13  ;;  %v3428_v24 = vsel %vm3416_vm4, %v3408_v4, %v6471_v23  ;;  %v6595_v8 = vsel %vm5262_vm13, %v3421_v12, %v3422_v16  ;;  %v3536_v15 = vld.sshfl [vmem:[#allocation1 + $0x18] sm:$0xff pattern:$0x67452301]  ;;  %vm3511_vm5 = vcmp.gt.f32.partialorder %v6603_v27, %v6515_v43  ;;  %vm3516_vm6 = vcmp.gt.f32.partialorder %v6515_v43, %v6603_v27 }
  0xd8   :  { %v6599_v23 = vsel %vm5262_vm13, %v3427_v22, %v3428_v24  ;;  %3426 = vst [vmem:[#allocation1 + $0x38] sm:$0xff] %v6595_v8  ;;  %v6607_v18 = vld.sshfl [vmem:[#allocation1] sm:$0xff pattern:$0x67452301]  ;;  %vm3479_vm7 = vcmp.gt.f32.partialorder %v6605_v17, %v6499_v33  ;;  %vm3484_vm8 = vcmp.gt.f32.partialorder %v6499_v33, %v6605_v17  ;;  %v6621_v61 = vsel %vm3511_vm5, %v6603_v27, %v6515_v43 }
  0xd9   :  { %3432 = vst [vmem:[#allocation3 + $0x38] sm:$0xff] %v6599_v23  ;;  %v6609_v14 = vld.sshfl [vmem:[#allocation3 + $0x10] sm:$0xff pattern:$0x67452301]  ;;  %vm3543_vm9 = vcmp.gt.f32.partialorder %v3536_v15, %v6531_v42  ;;  %vm3548_vm10 = vcmp.gt.f32.partialorder %v6531_v42, %v3536_v15  ;;  %vm3447_vm11 = vcmp.gt.f32.partialorder %v6607_v18, %v6483_v30  ;;  %v6632_v25 = vsel %vm3516_vm6, %v6603_v27, %v6515_v43 }
  0xda   :  { %v3540_v29 = vld.sshfl [vmem:[#allocation3 + $0x18] sm:$0xff pattern:$0x67452301]  ;;  %v3568_v44 = vld.sshfl [vmem:[#allocation1 + $0x20] sm:$0xff pattern:$0x67452301]  ;;  %v6636_v7 = vsel %vm3511_vm5, %v6609_v14, %v6519_v40  ;;  %v3553_v31 = vsel %vm3543_vm9, %v3536_v15, %v6531_v42  ;;  %v3554_v26 = vsel %vm3548_vm10, %v3536_v15, %v6531_v42  ;;  %vm3452_vm12 = vcmp.gt.f32.partialorder %v6483_v30, %v6607_v18 }
  0xdb   :  { %v3572_v20 = vld.sshfl [vmem:[#allocation3 + $0x20] sm:$0xff pattern:$0x67452301]  ;;  %v3600_v37 = vld.sshfl [vmem:[#allocation1 + $0x28] sm:$0xff pattern:$0x67452301]  ;;  %v3559_v38 = vsel %vm3543_vm9, %v3540_v29, %v6535_v55  ;;  %v3560_v11 = vsel %vm3548_vm10, %v3540_v29, %v6535_v55  ;;  %vm3575_vm14 = vcmp.gt.f32.partialorder %v3568_v44, %v6547_v59  ;;  %vm3580_vm15 = vcmp.gt.f32.partialorder %v6547_v59, %v3568_v44 }
  0xdc   :  { %v3604_v60 = vld.sshfl [vmem:[#allocation3 + $0x28] sm:$0xff pattern:$0x67452301]  ;;  %v3585_v41 = vsel %vm3575_vm14, %v3568_v44, %v6547_v59  ;;  %v3586_v36 = vsel %vm3580_vm15, %v3568_v44, %v6547_v59  ;;  %v3591_v35 = vsel %vm3575_vm14, %v3572_v20, %v6551_v56  ;;  %v3592_v45 = vsel %vm3580_vm15, %v3572_v20, %v6551_v56  ;;  %v3444_v5 = vld.sshfl [vmem:[#allocation3] sm:$0xff pattern:$0x67452301] }
  0xdd   :  { %v3632_v47 = vld.sshfl [vmem:[#allocation1 + $0x30] sm:$0xff pattern:$0x67452301]  ;;  %v3587_v49 = vsel %vm5192_vm0, %v3585_v41, %v3586_v36  ;;  %v3593_v50 = vsel %vm5192_vm0, %v3591_v35, %v3592_v45  ;;  %vm3607_vm1 = vcmp.gt.f32.partialorder %v3600_v37, %v6563_v62  ;;  %vm3612_vm2 = vcmp.gt.f32.partialorder %v6563_v62, %v3600_v37  ;;  %v3476_v2 = vld.sshfl [vmem:[#allocation3 + $0x8] sm:$0xff pattern:$0x67452301] }
  0xde   :  { %v3636_v42 = vld.sshfl [vmem:[#allocation3 + $0x30] sm:$0xff pattern:$0x67452301]  ;;  %3590 = vst [vmem:[#allocation1 + $0x20] sm:$0xff] %v3587_v49  ;;  %3596 = vst [vmem:[#allocation3 + $0x20] sm:$0xff] %v3593_v50  ;;  %v3617_v55 = vsel %vm3607_vm1, %v3600_v37, %v6563_v62  ;;  %v3618_v52 = vsel %vm3612_vm2, %v3600_v37, %v6563_v62  ;;  %v3623_v51 = vsel %vm3607_vm1, %v3604_v60, %v6567_v1 }
  0xdf   :  { %v3624_v48 = vsel %vm3612_vm2, %v3604_v60, %v6567_v1  ;;  %v3664_v28 = vld.sshfl [vmem:[#allocation1 + $0x38] sm:$0xff pattern:$0x67452301]  ;;  %v3619_v54 = vsel %vm5192_vm0, %v3617_v55, %v3618_v52  ;;  %vm3639_vm4 = vcmp.gt.f32.partialorder %v3632_v47, %v6579_v21  ;;  %vm3644_vm5 = vcmp.gt.f32.partialorder %v6579_v21, %v3632_v47 }
  0xe0   :  { %v3625_v34 = vsel %vm5192_vm0, %v3623_v51, %v3624_v48  ;;  %v3668_v59 = vld.sshfl [vmem:[#allocation3 + $0x38] sm:$0xff pattern:$0x67452301]  ;;  %3622 = vst [vmem:[#allocation1 + $0x28] sm:$0xff] %v3619_v54  ;;  %v3649_v56 = vsel %vm3639_vm4, %v3632_v47, %v6579_v21  ;;  %v3650_v53 = vsel %vm3644_vm5, %v3632_v47, %v6579_v21  ;;  %v3655_v57 = vsel %vm3639_vm4, %v3636_v42, %v6583_v13 }
  0xe1   :  { %3628 = vst [vmem:[#allocation3 + $0x28] sm:$0xff] %v3625_v34  ;;  %v3656_v46 = vsel %vm3644_vm5, %v3636_v42, %v6583_v13  ;;  %v3651_v58 = vsel %vm5192_vm0, %v3649_v56, %v3650_v53  ;;  %vm3671_vm9 = vcmp.gt.f32.partialorder %v3664_v28, %v6595_v8  ;;  %vm3676_vm10 = vcmp.gt.f32.partialorder %v6595_v8, %v3664_v28 }
  0xe2   :  { %v3657_v63 = vsel %vm5192_vm0, %v3655_v57, %v3656_v46  ;;  %3654 = vst [vmem:[#allocation1 + $0x30] sm:$0xff] %v3651_v58  ;;  %v3681_v62 = vsel %vm3671_vm9, %v3664_v28, %v6595_v8  ;;  %v3682_v1 = vsel %vm3676_vm10, %v3664_v28, %v6595_v8  ;;  %v3687_v4 = vsel %vm3671_vm9, %v3668_v59, %v6599_v23 }
  0xe3   :  { %3660 = vst [vmem:[#allocation3 + $0x30] sm:$0xff] %v3657_v63  ;;  %v3688_v3 = vsel %vm3676_vm10, %v3668_v59, %v6599_v23  ;;  %v3528_v43 = vsel %vm3516_vm6, %v6609_v14, %v6519_v40  ;;  %v3555_v40 = vsel %vm5192_vm0, %v3553_v31, %v3554_v26  ;;  %v3683_v9 = vsel %vm5192_vm0, %v3681_v62, %v3682_v1 }
  0xe4   :  { %v3689_v6 = vsel %vm5192_vm0, %v3687_v4, %v3688_v3  ;;  %v3489_v21 = vsel %vm3479_vm7, %v6605_v17, %v6499_v33  ;;  %v3490_v13 = vsel %vm3484_vm8, %v6605_v17, %v6499_v33  ;;  %v3561_v12 = vsel %vm5192_vm0, %v3559_v38, %v3560_v11  ;;  %3686 = vst [vmem:[#allocation1 + $0x38] sm:$0xff] %v3683_v9 }
  0xe5   :  { %3692 = vst [vmem:[#allocation3 + $0x38] sm:$0xff] %v3689_v6  ;;  %v3457_v16 = vsel %vm3447_vm11, %v6607_v18, %v6483_v30  ;;  %v3495_v22 = vsel %vm3479_vm7, %v3476_v2, %v6503_v39  ;;  %v3496_v33 = vsel %vm3484_vm8, %v3476_v2, %v6503_v39  ;;  %v3523_v39 = vsel %vm5192_vm0, %v6621_v61, %v6632_v25  ;;  %v3814_v24 = vld [vmem:[#allocation1 + $0x27] ss:$-1 sm:$0xff] }
  0xe6   :  { %v3821_v8 = vld [vmem:[#allocation3 + $0x27] ss:$-1 sm:$0xff]  ;;  %v3458_v23 = vsel %vm3452_vm12, %v6607_v18, %v6483_v30  ;;  %v3463_v27 = vsel %vm3447_vm11, %v3444_v5, %v6487_v32  ;;  %v3529_v17 = vsel %vm5192_vm0, %v6636_v7, %v3528_v43  ;;  %vm3824_vm6 = vcmp.gt.f32.partialorder %v3814_v24, %v3555_v40 }
  0xe7   :  { %v3464_v30 = vsel %vm3452_vm12, %v3444_v5, %v6487_v32  ;;  %v3491_v32 = vsel %vm5192_vm0, %v3489_v21, %v3490_v13  ;;  %v3776_v15 = vld [vmem:[#allocation1 + $0x2f] ss:$-1 sm:$0xff]  ;;  %v3830_v14 = vsel %vm3824_vm6, %v3555_v40, %v3814_v24  ;;  %v3838_v29 = vsel %vm3824_vm6, %v3561_v12, %v3821_v8 }
  0xe8   :  { %v3783_v18 = vld [vmem:[#allocation3 + $0x2f] ss:$-1 sm:$0xff]  ;;  %v3497_v44 = vsel %vm5192_vm0, %v3495_v22, %v3496_v33  ;;  %vm3786_vm7 = vcmp.gt.f32.partialorder %v3776_v15, %v3523_v39  ;;  %3836 = vst [vmem:[#allocation1 + $0x27] ss:$-1 sm:$0xff] %v3830_v14  ;;  %3844 = vst [vmem:[#allocation3 + $0x27] ss:$-1 sm:$0xff] %v3838_v29  ;;  %v3459_v61 = vsel %vm5192_vm0, %v3457_v16, %v3458_v23 }
  0xe9   :  { %v3738_v20 = vld [vmem:[#allocation1 + $0x37] ss:$-1 sm:$0xff]  ;;  %v3792_v7 = vsel %vm3786_vm7, %v3523_v39, %v3776_v15  ;;  %v3800_v31 = vsel %vm3786_vm7, %v3529_v17, %v3783_v18  ;;  %v3829_v26 = vsel %vm3824_vm6, %v3814_v24, %v3555_v40  ;;  %v3465_v37 = vsel %vm5192_vm0, %v3463_v27, %v3464_v30 }
  0xea   :  { %v3745_v25 = vld [vmem:[#allocation3 + $0x37] ss:$-1 sm:$0xff]  ;;  %vm3748_vm8 = vcmp.gt.f32.partialorder %v3738_v20, %v3491_v32  ;;  %v3791_v38 = vsel %vm3786_vm7, %v3776_v15, %v3523_v39  ;;  %3798 = vst [vmem:[#allocation1 + $0x2f] ss:$-1 sm:$0xff] %v3792_v7  ;;  %3806 = vst [vmem:[#allocation3 + $0x2f] ss:$-1 sm:$0xff] %v3800_v31  ;;  %v3837_v11 = vsel %vm3824_vm6, %v3821_v8, %v3561_v12 }
  0xeb   :  { %v3700_v60 = vld [vmem:[#allocation1 + $0x3f] ss:$-1 sm:$0xff]  ;;  %v3753_v36 = vsel %vm3748_vm8, %v3738_v20, %v3491_v32  ;;  %v3754_v35 = vsel %vm3748_vm8, %v3491_v32, %v3738_v20  ;;  %v3761_v45 = vsel %vm3748_vm8, %v3745_v25, %v3497_v44  ;;  %v3762_v47 = vsel %vm3748_vm8, %v3497_v44, %v3745_v25 }
  0xec   :  { %v3707_v41 = vld [vmem:[#allocation3 + $0x3f] ss:$-1 sm:$0xff]  ;;  %vm3710_vm11 = vcmp.gt.f32.partialorder %v3700_v60, %v3459_v61  ;;  %3760 = vst [vmem:[#allocation1 + $0x37] ss:$-1 sm:$0xff] %v3754_v35  ;;  %3768 = vst [vmem:[#allocation3 + $0x37] ss:$-1 sm:$0xff] %v3762_v47  ;;  %v3799_v49 = vsel %vm3786_vm7, %v3783_v18, %v3529_v17  ;;  %vm3896_vm12 = vcmp.gt.f32.partialorder %v3829_v26, %v3753_v36 }
  0xed   :  { %v3715_v50 = vsel %vm3710_vm11, %v3700_v60, %v3459_v61  ;;  %v3716_v42 = vsel %vm3710_vm11, %v3459_v61, %v3700_v60  ;;  %v3723_v55 = vsel %vm3710_vm11, %v3707_v41, %v3465_v37  ;;  %v3724_v52 = vsel %vm3710_vm11, %v3465_v37, %v3707_v41 }
  0xee   :  { %3722 = vst [vmem:[#allocation1 + $0x3f] ss:$-1 sm:$0xff] %v3716_v42  ;;  %3730 = vst [vmem:[#allocation3 + $0x3f] ss:$-1 sm:$0xff] %v3724_v52  ;;  %vm3860_vm14 = vcmp.gt.f32.partialorder %v3791_v38, %v3715_v50  ;;  %v3901_v51 = vsel %vm3896_vm12, %v3829_v26, %v3753_v36  ;;  %v3902_v48 = vsel %vm3896_vm12, %v3753_v36, %v3829_v26 }
  0xef   :  { %v3909_v28 = vsel %vm3896_vm12, %v3837_v11, %v3761_v45  ;;  %v3865_v54 = vsel %vm3860_vm14, %v3791_v38, %v3715_v50  ;;  %v3866_v34 = vsel %vm3860_vm14, %v3715_v50, %v3791_v38  ;;  %v3873_v59 = vsel %vm3860_vm14, %v3799_v49, %v3723_v55  ;;  %v3922_v57 = vld [vmem:[#allocation1 + $0x20] sm:$0xff] }
  0xf0   :  { %v3874_v56 = vsel %vm3860_vm14, %v3723_v55, %v3799_v49  ;;  %v3910_v53 = vsel %vm3896_vm12, %v3761_v45, %v3837_v11  ;;  %vm4004_vm15 = vcmp.gt.f32.partialorder %v3901_v51, %v3865_v54  ;;  %vm4040_vm1 = vcmp.gt.f32.partialorder %v3902_v48, %v3866_v34  ;;  %v3928_v62 = vld [vmem:[#allocation3 + $0x20] sm:$0xff] }
  0xf1   :  { %v6752_v46 = vsel %vm4004_vm15, %v3901_v51, %v3865_v54  ;;  %v6754_v58 = vsel %vm4004_vm15, %v3865_v54, %v3901_v51  ;;  %v4017_v63 = vsel %vm4004_vm15, %v3909_v28, %v3873_v59  ;;  %v6756_v2 = vsel %vm4004_vm15, %v3873_v59, %v3909_v28  ;;  %v3958_v9 = vld [vmem:[#allocation1 + $0x28] sm:$0xff] }
  0xf2   :  { %4013 = vst [vmem:[#allocation1] sm:$0xff] %v6752_v46  ;;  %4016 = vst [vmem:[#allocation1 + $0x8] sm:$0xff] %v6754_v58  ;;  %v6761_v1 = vsel %vm4040_vm1, %v3902_v48, %v3866_v34  ;;  %v6763_v4 = vsel %vm4040_vm1, %v3866_v34, %v3902_v48  ;;  %v6765_v3 = vsel %vm4040_vm1, %v3910_v53, %v3874_v56  ;;  %v3964_v6 = vld [vmem:[#allocation3 + $0x28] sm:$0xff] }
  0xf3   :  { %4021 = vst [vmem:[#allocation3] sm:$0xff] %v4017_v63  ;;  %4024 = vst [vmem:[#allocation3 + $0x8] sm:$0xff] %v6756_v2  ;;  %v6767_v5 = vsel %vm4040_vm1, %v3874_v56, %v3910_v53  ;;  %v3923_v43 = vld [vmem:[#allocation1 + $0x30] sm:$0xff] }
  0xf4   :  { %v3929_v40 = vld [vmem:[#allocation3 + $0x30] sm:$0xff]  ;;  %4049 = vst [vmem:[#allocation1 + $0x10] sm:$0xff] %v6761_v1  ;;  %4052 = vst [vmem:[#allocation1 + $0x18] sm:$0xff] %v6763_v4  ;;  %vm3932_vm2 = vcmp.gt.f32.partialorder %v3923_v43, %v3922_v57 }
  0xf5   :  { %4057 = vst [vmem:[#allocation3 + $0x10] sm:$0xff] %v6765_v3  ;;  %4060 = vst [vmem:[#allocation3 + $0x18] sm:$0xff] %v6767_v5  ;;  %v3937_v21 = vsel %vm3932_vm2, %v3923_v43, %v3922_v57  ;;  %v3938_v13 = vsel %vm3932_vm2, %v3922_v57, %v3923_v43  ;;  %v3959_v12 = vld [vmem:[#allocation1 + $0x38] sm:$0xff]  ;;  %v3945_v22 = vsel %vm3932_vm2, %v3929_v40, %v3928_v62 }
  0xf6   :  { %v3965_v16 = vld [vmem:[#allocation3 + $0x38] sm:$0xff]  ;;  %v3946_v33 = vsel %vm3932_vm2, %v3928_v62, %v3929_v40  ;;  %vm3968_vm4 = vcmp.gt.f32.partialorder %v3959_v12, %v3958_v9 }
  0xf7   :  { %v3973_v39 = vsel %vm3968_vm4, %v3959_v12, %v3958_v9  ;;  %v3974_v24 = vsel %vm3968_vm4, %v3958_v9, %v3959_v12  ;;  %v3981_v8 = vsel %vm3968_vm4, %v3965_v16, %v3964_v6  ;;  %v3982_v23 = vsel %vm3968_vm4, %v3964_v6, %v3965_v16 }
  0xf8   :  { %vm4076_vm5 = vcmp.gt.f32.partialorder %v3973_v39, %v3937_v21  ;;  %vm4112_vm9 = vcmp.gt.f32.partialorder %v3974_v24, %v3938_v13 }
  0xf9   :  { %v6773_v27 = vsel %vm4076_vm5, %v3973_v39, %v3937_v21  ;;  %v6775_v17 = vsel %vm4076_vm5, %v3937_v21, %v3973_v39  ;;  %v6777_v30 = vsel %vm4076_vm5, %v3981_v8, %v3945_v22  ;;  %v6779_v32 = vsel %vm4076_vm5, %v3945_v22, %v3981_v8  ;;  %v4140_v15 = vld.sshfl [vmem:[#allocation1] sm:$0xff pattern:$0x32107654]  ;;  %v4172_v20 = vld.sshfl [vmem:[#allocation1 + $0x8] sm:$0xff pattern:$0x32107654] }
  0xfa   :  { %v4144_v18 = vld.sshfl [vmem:[#allocation3] sm:$0xff pattern:$0x32107654]  ;;  %4085 = vst [vmem:[#allocation1 + $0x20] sm:$0xff] %v6773_v27  ;;  %4088 = vst [vmem:[#allocation1 + $0x28] sm:$0xff] %v6775_v17  ;;  %v6785_v14 = vsel %vm4112_vm9, %v3974_v24, %v3938_v13  ;;  %v6787_v29 = vsel %vm4112_vm9, %v3938_v13, %v3974_v24  ;;  %v6789_v44 = vsel %vm4112_vm9, %v3982_v23, %v3946_v33 }
  0xfb   :  { %4093 = vst [vmem:[#allocation3 + $0x20] sm:$0xff] %v6777_v30  ;;  %4096 = vst [vmem:[#allocation3 + $0x28] sm:$0xff] %v6779_v32  ;;  %v6791_v61 = vsel %vm4112_vm9, %v3946_v33, %v3982_v23  ;;  %vm4147_vm10 = vcmp.gt.f32.partialorder %v4140_v15, %v6752_v46  ;;  %vm4152_vm6 = vcmp.gt.f32.partialorder %v6752_v46, %v4140_v15  ;;  %v4176_v25 = vld.sshfl [vmem:[#allocation3 + $0x8] sm:$0xff pattern:$0x32107654] }
  0xfc   :  { %4121 = vst [vmem:[#allocation1 + $0x30] sm:$0xff] %v6785_v14  ;;  %4124 = vst [vmem:[#allocation1 + $0x38] sm:$0xff] %v6787_v29  ;;  %vm4179_vm7 = vcmp.gt.f32.partialorder %v4172_v20, %v6754_v58  ;;  %vm4184_vm8 = vcmp.gt.f32.partialorder %v6754_v58, %v4172_v20  ;;  %v4204_v7 = vld.sshfl [vmem:[#allocation1 + $0x10] sm:$0xff pattern:$0x32107654]  ;;  %v4157_v31 = vsel %vm4147_vm10, %v4140_v15, %v6752_v46 }
  0xfd   :  { %4129 = vst [vmem:[#allocation3 + $0x30] sm:$0xff] %v6789_v44  ;;  %4132 = vst [vmem:[#allocation3 + $0x38] sm:$0xff] %v6791_v61  ;;  %v4158_v26 = vsel %vm4152_vm6, %v4140_v15, %v6752_v46  ;;  %v4163_v37 = vsel %vm4147_vm10, %v4144_v18, %v4017_v63  ;;  %v4164_v38 = vsel %vm4152_vm6, %v4144_v18, %v4017_v63  ;;  %v4208_v11 = vld.sshfl [vmem:[#allocation3 + $0x10] sm:$0xff pattern:$0x32107654] }
  0xfe   :  { %v6805_v60 = vsel %vm5524_vm3, %v4157_v31, %v4158_v26  ;;  %v6809_v41 = vsel %vm5524_vm3, %v4163_v37, %v4164_v38  ;;  %v4189_v36 = vsel %vm4179_vm7, %v4172_v20, %v6754_v58  ;;  %v4190_v35 = vsel %vm4184_vm8, %v4172_v20, %v6754_v58  ;;  %v4236_v45 = vld.sshfl [vmem:[#allocation1 + $0x18] sm:$0xff pattern:$0x32107654] }
  0xff   :  { %4162 = vst [vmem:[#allocation1] sm:$0xff] %v6805_v60  ;;  %4168 = vst [vmem:[#allocation3] sm:$0xff] %v6809_v41  ;;  %v6821_v47 = vsel %vm5524_vm3, %v4189_v36, %v4190_v35  ;;  %v4195_v49 = vsel %vm4179_vm7, %v4176_v25, %v6756_v2  ;;  %v4196_v50 = vsel %vm4184_vm8, %v4176_v25, %v6756_v2  ;;  %v4240_v51 = vld.sshfl [vmem:[#allocation3 + $0x18] sm:$0xff pattern:$0x32107654] }
 0x100   :  { %vm4211_vm11 = vcmp.gt.f32.partialorder %v4204_v7, %v6761_v1  ;;  %4194 = vst [vmem:[#allocation1 + $0x8] sm:$0xff] %v6821_v47  ;;  %v6833_v42 = vsel %vm5524_vm3, %v4195_v49, %v4196_v50  ;;  %vm4216_vm12 = vcmp.gt.f32.partialorder %v6761_v1, %v4204_v7  ;;  %vm4243_vm14 = vcmp.gt.f32.partialorder %v4236_v45, %v6763_v4 }
 0x101   :  { %v4221_v55 = vsel %vm4211_vm11, %v4204_v7, %v6761_v1  ;;  %v4227_v52 = vsel %vm4211_vm11, %v4208_v11, %v6765_v3  ;;  %4200 = vst [vmem:[#allocation3 + $0x8] sm:$0xff] %v6833_v42  ;;  %v4222_v48 = vsel %vm4216_vm12, %v4204_v7, %v6761_v1  ;;  %v4228_v28 = vsel %vm4216_vm12, %v4208_v11, %v6765_v3  ;;  %v4268_v53 = vld.sshfl [vmem:[#allocation1 + $0x20] sm:$0xff pattern:$0x32107654] }
 0x102   :  { %vm4248_vm15 = vcmp.gt.f32.partialorder %v6763_v4, %v4236_v45  ;;  %v6845_v54 = vsel %vm5524_vm3, %v4221_v55, %v4222_v48  ;;  %v6849_v34 = vsel %vm5524_vm3, %v4227_v52, %v4228_v28  ;;  %v4253_v59 = vsel %vm4243_vm14, %v4236_v45, %v6763_v4  ;;  %v4272_v57 = vld.sshfl [vmem:[#allocation3 + $0x20] sm:$0xff pattern:$0x32107654]  ;;  %v4300_v2 = vld.sshfl [vmem:[#allocation1 + $0x28] sm:$0xff pattern:$0x32107654] }
 0x103   :  { %v4254_v56 = vsel %vm4248_vm15, %v4236_v45, %v6763_v4  ;;  %4226 = vst [vmem:[#allocation1 + $0x10] sm:$0xff] %v6845_v54  ;;  %4232 = vst [vmem:[#allocation3 + $0x10] sm:$0xff] %v6849_v34  ;;  %v4259_v58 = vsel %vm4243_vm14, %v4240_v51, %v6767_v5  ;;  %v4260_v63 = vsel %vm4248_vm15, %v4240_v51, %v6767_v5  ;;  %v4304_v3 = vld.sshfl [vmem:[#allocation3 + $0x28] sm:$0xff pattern:$0x32107654] }
 0x104   :  { %v6857_v46 = vsel %vm5524_vm3, %v4253_v59, %v4254_v56  ;;  %vm4275_vm1 = vcmp.gt.f32.partialorder %v4268_v53, %v6773_v27  ;;  %v6865_v62 = vsel %vm5524_vm3, %v4259_v58, %v4260_v63  ;;  %vm4280_vm2 = vcmp.gt.f32.partialorder %v6773_v27, %v4268_v53  ;;  %v4332_v5 = vld.sshfl [vmem:[#allocation1 + $0x30] sm:$0xff pattern:$0x32107654]  ;;  %v4364_v16 = vld.sshfl [vmem:[#allocation1 + $0x38] sm:$0xff pattern:$0x32107654] }
 0x105   :  { %4258 = vst [vmem:[#allocation1 + $0x18] sm:$0xff] %v6857_v46  ;;  %v4285_v1 = vsel %vm4275_vm1, %v4268_v53, %v6773_v27  ;;  %v4291_v4 = vsel %vm4275_vm1, %v4272_v57, %v6777_v30  ;;  %4264 = vst [vmem:[#allocation3 + $0x18] sm:$0xff] %v6865_v62  ;;  %v4286_v43 = vsel %vm4280_vm2, %v4268_v53, %v6773_v27  ;;  %v4336_v9 = vld.sshfl [vmem:[#allocation3 + $0x30] sm:$0xff pattern:$0x32107654] }
 0x106   :  { %v4292_v40 = vsel %vm4280_vm2, %v4272_v57, %v6777_v30  ;;  %vm4307_vm4 = vcmp.gt.f32.partialorder %v4300_v2, %v6775_v17  ;;  %vm4312_vm5 = vcmp.gt.f32.partialorder %v6775_v17, %v4300_v2  ;;  %v6877_v6 = vsel %vm5524_vm3, %v4285_v1, %v4286_v43  ;;  %v4368_v27 = vld.sshfl [vmem:[#allocation3 + $0x38] sm:$0xff pattern:$0x32107654]  ;;  %v4404_v15 = vld.sshfl [vmem:[#allocation3] sm:$0xff pattern:$0x54761032] }
 0x107   :  { %v6881_v21 = vsel %vm5524_vm3, %v4291_v4, %v4292_v40  ;;  %v4317_v13 = vsel %vm4307_vm4, %v4300_v2, %v6775_v17  ;;  %v4318_v12 = vsel %vm4312_vm5, %v4300_v2, %v6775_v17  ;;  %4290 = vst [vmem:[#allocation1 + $0x20] sm:$0xff] %v6877_v6  ;;  %v4323_v33 = vsel %vm4307_vm4, %v4304_v3, %v6779_v32  ;;  %v4400_v17 = vld.sshfl [vmem:[#allocation1] sm:$0xff pattern:$0x54761032] }
 0x108   :  { %4296 = vst [vmem:[#allocation3 + $0x20] sm:$0xff] %v6881_v21  ;;  %v6889_v22 = vsel %vm5524_vm3, %v4317_v13, %v4318_v12  ;;  %v4324_v39 = vsel %vm4312_vm5, %v4304_v3, %v6779_v32  ;;  %vm4339_vm9 = vcmp.gt.f32.partialorder %v4332_v5, %v6785_v14  ;;  %vm4344_vm10 = vcmp.gt.f32.partialorder %v6785_v14, %v4332_v5  ;;  %v4432_v20 = vld.sshfl [vmem:[#allocation1 + $0x8] sm:$0xff pattern:$0x54761032] }
 0x109   :  { %4322 = vst [vmem:[#allocation1 + $0x28] sm:$0xff] %v6889_v22  ;;  %v6897_v24 = vsel %vm5524_vm3, %v4323_v33, %v4324_v39  ;;  %v4349_v8 = vsel %vm4339_vm9, %v4332_v5, %v6785_v14  ;;  %v4355_v23 = vsel %vm4339_vm9, %v4336_v9, %v6789_v44  ;;  %v4350_v30 = vsel %vm4344_vm10, %v4332_v5, %v6785_v14  ;;  %v4436_v37 = vld.sshfl [vmem:[#allocation3 + $0x8] sm:$0xff pattern:$0x54761032] }
 0x10a   :  { %4328 = vst [vmem:[#allocation3 + $0x28] sm:$0xff] %v6897_v24  ;;  %v4356_v32 = vsel %vm4344_vm10, %v4336_v9, %v6789_v44  ;;  %vm4371_vm6 = vcmp.gt.f32.partialorder %v4364_v16, %v6787_v29  ;;  %vm4376_vm7 = vcmp.gt.f32.partialorder %v6787_v29, %v4364_v16  ;;  %v6909_v18 = vsel %vm5524_vm3, %v4349_v8, %v4350_v30  ;;  %v4464_v38 = vld.sshfl [vmem:[#allocation1 + $0x10] sm:$0xff pattern:$0x54761032] }
 0x10b   :  { %v6913_v14 = vsel %vm5524_vm3, %v4355_v23, %v4356_v32  ;;  %v4381_v44 = vsel %vm4371_vm6, %v4364_v16, %v6787_v29  ;;  %v4382_v29 = vsel %vm4376_vm7, %v4364_v16, %v6787_v29  ;;  %4354 = vst [vmem:[#allocation1 + $0x30] sm:$0xff] %v6909_v18  ;;  %v4387_v7 = vsel %vm4371_vm6, %v4368_v27, %v6791_v61 }
 0x10c   :  { %4360 = vst [vmem:[#allocation3 + $0x30] sm:$0xff] %v6913_v14  ;;  %v6921_v25 = vsel %vm5524_vm3, %v4381_v44, %v4382_v29  ;;  %v4388_v61 = vsel %vm4376_vm7, %v4368_v27, %v6791_v61  ;;  %vm4407_vm8 = vcmp.gt.f32.partialorder %v4400_v17, %v6805_v60  ;;  %vm4439_vm11 = vcmp.gt.f32.partialorder %v4432_v20, %v6821_v47  ;;  %v4496_v49 = vld.sshfl [vmem:[#allocation1 + $0x18] sm:$0xff pattern:$0x54761032] }
 0x10d   :  { %4386 = vst [vmem:[#allocation1 + $0x38] sm:$0xff] %v6921_v25  ;;  %v6929_v10 = vsel %vm5524_vm3, %v4387_v7, %v4388_v61  ;;  %vm4412_vm3 = vcmp.gt.f32.partialorder %v6805_v60, %v4400_v17  ;;  %v4417_v31 = vsel %vm4407_vm8, %v4400_v17, %v6805_v60  ;;  %v4423_v26 = vsel %vm4407_vm8, %v4404_v15, %v6809_v41  ;;  %v4500_v28 = vld.sshfl [vmem:[#allocation3 + $0x18] sm:$0xff pattern:$0x54761032] }
 0x10e   :  { %4392 = vst [vmem:[#allocation3 + $0x38] sm:$0xff] %v6929_v10  ;;  %v4418_v11 = vsel %vm4412_vm3, %v4400_v17, %v6805_v60  ;;  %v4424_v60 = vsel %vm4412_vm3, %v4404_v15, %v6809_v41  ;;  %vm4444_vm12 = vcmp.gt.f32.partialorder %v6821_v47, %v4432_v20  ;;  %v4468_v41 = vld.sshfl [vmem:[#allocation3 + $0x10] sm:$0xff pattern:$0x54761032]  ;;  %v4449_v45 = vsel %vm4439_vm11, %v4432_v20, %v6821_v47 }
 0x10f   :  { %v6941_v36 = vsel %vm5262_vm13, %v4417_v31, %v4418_v11  ;;  %v6945_v35 = vsel %vm5262_vm13, %v4423_v26, %v4424_v60  ;;  %v4450_v47 = vsel %vm4444_vm12, %v4432_v20, %v6821_v47  ;;  %v4455_v55 = vsel %vm4439_vm11, %v4436_v37, %v6833_v42  ;;  %v4528_v59 = vld.sshfl [vmem:[#allocation1 + $0x20] sm:$0xff pattern:$0x54761032] }
 0x110   :  { %4422 = vst [vmem:[#allocation1] sm:$0xff] %v6941_v36  ;;  %4428 = vst [vmem:[#allocation3] sm:$0xff] %v6945_v35  ;;  %v6953_v50 = vsel %vm5262_vm13, %v4449_v45, %v4450_v47  ;;  %v4456_v42 = vsel %vm4444_vm12, %v4436_v37, %v6833_v42  ;;  %vm4471_vm14 = vcmp.gt.f32.partialorder %v4464_v38, %v6845_v54  ;;  %v4532_v56 = vld.sshfl [vmem:[#allocation3 + $0x20] sm:$0xff pattern:$0x54761032] }
 0x111   :  { %4454 = vst [vmem:[#allocation1 + $0x8] sm:$0xff] %v6953_v50  ;;  %v6961_v52 = vsel %vm5262_vm13, %v4455_v55, %v4456_v42  ;;  %vm4476_vm15 = vcmp.gt.f32.partialorder %v6845_v54, %v4464_v38  ;;  %v4481_v51 = vsel %vm4471_vm14, %v4464_v38, %v6845_v54  ;;  %v4487_v48 = vsel %vm4471_vm14, %v4468_v41, %v6849_v34  ;;  %v4560_v63 = vld.sshfl [vmem:[#allocation1 + $0x28] sm:$0xff pattern:$0x54761032] }
 0x112   :  { %4460 = vst [vmem:[#allocation3 + $0x8] sm:$0xff] %v6961_v52  ;;  %v4482_v54 = vsel %vm4476_vm15, %v4464_v38, %v6845_v54  ;;  %v4488_v34 = vsel %vm4476_vm15, %v4468_v41, %v6849_v34  ;;  %vm4503_vm1 = vcmp.gt.f32.partialorder %v4496_v49, %v6857_v46  ;;  %vm4508_vm2 = vcmp.gt.f32.partialorder %v6857_v46, %v4496_v49  ;;  %v4564_v43 = vld.sshfl [vmem:[#allocation3 + $0x28] sm:$0xff pattern:$0x54761032] }
 0x113   :  { %v6973_v53 = vsel %vm5262_vm13, %v4481_v51, %v4482_v54  ;;  %v6977_v57 = vsel %vm5262_vm13, %v4487_v48, %v4488_v34  ;;  %v4513_v58 = vsel %vm4503_vm1, %v4496_v49, %v6857_v46  ;;  %v4514_v46 = vsel %vm4508_vm2, %v4496_v49, %v6857_v46  ;;  %v4592_v40 = vld.sshfl [vmem:[#allocation1 + $0x30] sm:$0xff pattern:$0x54761032] }
 0x114   :  { %4486 = vst [vmem:[#allocation1 + $0x10] sm:$0xff] %v6973_v53  ;;  %4492 = vst [vmem:[#allocation3 + $0x10] sm:$0xff] %v6977_v57  ;;  %v6985_v2 = vsel %vm5262_vm13, %v4513_v58, %v4514_v46  ;;  %v4519_v1 = vsel %vm4503_vm1, %v4500_v28, %v6865_v62  ;;  %v4520_v62 = vsel %vm4508_vm2, %v4500_v28, %v6865_v62  ;;  %v4624_v33 = vld.sshfl [vmem:[#allocation1 + $0x38] sm:$0xff pattern:$0x54761032] }
 0x115   :  { %vm4535_vm4 = vcmp.gt.f32.partialorder %v4528_v59, %v6877_v6  ;;  %4518 = vst [vmem:[#allocation1 + $0x18] sm:$0xff] %v6985_v2  ;;  %v6993_v4 = vsel %vm5262_vm13, %v4519_v1, %v4520_v62  ;;  %vm4540_vm5 = vcmp.gt.f32.partialorder %v6877_v6, %v4528_v59  ;;  %vm4567_vm9 = vcmp.gt.f32.partialorder %v4560_v63, %v6889_v22  ;;  %v4628_v30 = vld.sshfl [vmem:[#allocation3 + $0x38] sm:$0xff pattern:$0x54761032] }
 0x116   :  { %v4545_v3 = vsel %vm4535_vm4, %v4528_v59, %v6877_v6  ;;  %v4551_v5 = vsel %vm4535_vm4, %v4532_v56, %v6881_v21  ;;  %4524 = vst [vmem:[#allocation3 + $0x18] sm:$0xff] %v6993_v4  ;;  %v4546_v9 = vsel %vm4540_vm5, %v4528_v59, %v6877_v6  ;;  %v4552_v6 = vsel %vm4540_vm5, %v4532_v56, %v6881_v21  ;;  %v4596_v21 = vld.sshfl [vmem:[#allocation3 + $0x30] sm:$0xff pattern:$0x54761032] }
 0x117   :  { %vm4572_vm10 = vcmp.gt.f32.partialorder %v6889_v22, %v4560_v63  ;;  %v7005_v13 = vsel %vm5262_vm13, %v4545_v3, %v4546_v9  ;;  %v7009_v12 = vsel %vm5262_vm13, %v4551_v5, %v4552_v6  ;;  %v4577_v16 = vsel %vm4567_vm9, %v4560_v63, %v6889_v22  ;;  %v4660_v32 = vld.sshfl [vmem:[#allocation1] sm:$0xff pattern:$0x67452301] }
 0x118   :  { %v4578_v22 = vsel %vm4572_vm10, %v4560_v63, %v6889_v22  ;;  %4550 = vst [vmem:[#allocation1 + $0x20] sm:$0xff] %v7005_v13  ;;  %4556 = vst [vmem:[#allocation3 + $0x20] sm:$0xff] %v7009_v12  ;;  %v4583_v8 = vsel %vm4567_vm9, %v4564_v43, %v6897_v24  ;;  %v4584_v24 = vsel %vm4572_vm10, %v4564_v43, %v6897_v24  ;;  %v4692_v7 = vld.sshfl [vmem:[#allocation1 + $0x8] sm:$0xff pattern:$0x67452301] }
 0x119   :  { %v7017_v39 = vsel %vm5262_vm13, %v4577_v16, %v4578_v22  ;;  %vm4599_vm6 = vcmp.gt.f32.partialorder %v4592_v40, %v6909_v18  ;;  %v7025_v23 = vsel %vm5262_vm13, %v4583_v8, %v4584_v24  ;;  %vm4604_vm7 = vcmp.gt.f32.partialorder %v6909_v18, %v4592_v40  ;;  %v4696_v38 = vld.sshfl [vmem:[#allocation3 + $0x8] sm:$0xff pattern:$0x67452301] }
 0x11a   :  { %4582 = vst [vmem:[#allocation1 + $0x28] sm:$0xff] %v7017_v39  ;;  %v4609_v27 = vsel %vm4599_vm6, %v4592_v40, %v6909_v18  ;;  %v4615_v17 = vsel %vm4599_vm6, %v4596_v21, %v6913_v14  ;;  %4588 = vst [vmem:[#allocation3 + $0x28] sm:$0xff] %v7025_v23  ;;  %v4610_v15 = vsel %vm4604_vm7, %v4592_v40, %v6909_v18 }
 0x11b   :  { %v4616_v18 = vsel %vm4604_vm7, %v4596_v21, %v6913_v14  ;;  %vm4631_vm8 = vcmp.gt.f32.partialorder %v4624_v33, %v6921_v25  ;;  %vm4636_vm3 = vcmp.gt.f32.partialorder %v6921_v25, %v4624_v33  ;;  %v4664_v14 = vld.sshfl [vmem:[#allocation3] sm:$0xff pattern:$0x67452301]  ;;  %v7037_v44 = vsel %vm5262_vm13, %v4609_v27, %v4610_v15  ;;  %v4724_v11 = vld.sshfl [vmem:[#allocation1 + $0x10] sm:$0xff pattern:$0x67452301] }
 0x11c   :  { %v7041_v29 = vsel %vm5262_vm13, %v4615_v17, %v4616_v18  ;;  %v4641_v20 = vsel %vm4631_vm8, %v4624_v33, %v6921_v25  ;;  %v4642_v25 = vsel %vm4636_vm3, %v4624_v33, %v6921_v25  ;;  %4614 = vst [vmem:[#allocation1 + $0x30] sm:$0xff] %v7037_v44  ;;  %v4647_v31 = vsel %vm4631_vm8, %v4628_v30, %v6929_v10 }
 0x11d   :  { %4620 = vst [vmem:[#allocation3 + $0x30] sm:$0xff] %v7041_v29  ;;  %v7049_v61 = vsel %vm5262_vm13, %v4641_v20, %v4642_v25  ;;  %v4648_v10 = vsel %vm4636_vm3, %v4628_v30, %v6929_v10  ;;  %vm4667_vm11 = vcmp.gt.f32.partialorder %v4660_v32, %v6941_v36  ;;  %vm4699_vm12 = vcmp.gt.f32.partialorder %v4692_v7, %v6953_v50  ;;  %v4760_v59 = vld.sshfl [vmem:[#allocation3 + $0x18] sm:$0xff pattern:$0x67452301] }
 0x11e   :  { %4646 = vst [vmem:[#allocation1 + $0x38] sm:$0xff] %v7049_v61  ;;  %v7057_v0 = vsel %vm5262_vm13, %v4647_v31, %v4648_v10  ;;  %vm4672_vm13 = vcmp.gt.f32.partialorder %v6941_v36, %v4660_v32  ;;  %v4677_v26 = vsel %vm4667_vm11, %v4660_v32, %v6941_v36  ;;  %v4683_v37 = vsel %vm4667_vm11, %v4664_v14, %v6945_v35 }
 0x11f   :  { %4652 = vst [vmem:[#allocation3 + $0x38] sm:$0xff] %v7057_v0  ;;  %v4678_v60 = vsel %vm4672_vm13, %v4660_v32, %v6941_v36  ;;  %v4684_v41 = vsel %vm4672_vm13, %v4664_v14, %v6945_v35  ;;  %vm4704_vm14 = vcmp.gt.f32.partialorder %v6953_v50, %v4692_v7  ;;  %v4728_v36 = vld.sshfl [vmem:[#allocation3 + $0x10] sm:$0xff pattern:$0x67452301]  ;;  %v4709_v47 = vsel %vm4699_vm12, %v4692_v7, %v6953_v50 }
 0x120   :  { %v4679_v35 = vsel %vm5192_vm0, %v4677_v26, %v4678_v60  ;;  %v4685_v45 = vsel %vm5192_vm0, %v4683_v37, %v4684_v41  ;;  %v4710_v49 = vsel %vm4704_vm14, %v4692_v7, %v6953_v50  ;;  %v4756_v50 = vld.sshfl [vmem:[#allocation1 + $0x18] sm:$0xff pattern:$0x67452301]  ;;  %v4715_v42 = vsel %vm4699_vm12, %v4696_v38, %v6961_v52  ;;  %v4788_v54 = vld.sshfl [vmem:[#allocation1 + $0x20] sm:$0xff pattern:$0x67452301] }
 0x121   :  { %4682 = vst [vmem:[#allocation1] sm:$0xff] %v4679_v35  ;;  %4688 = vst [vmem:[#allocation3] sm:$0xff] %v4685_v45  ;;  %v4711_v55 = vsel %vm5192_vm0, %v4709_v47, %v4710_v49  ;;  %v4716_v52 = vsel %vm4704_vm14, %v4696_v38, %v6961_v52  ;;  %vm4731_vm15 = vcmp.gt.f32.partialorder %v4724_v11, %v6973_v53  ;;  %v4824_v40 = vld.sshfl [vmem:[#allocation3 + $0x28] sm:$0xff pattern:$0x67452301] }
 0x122   :  { %4955 = vst [vmem:[%s7189_s2] sm:$0xff] %v4679_v35  ;;  %5015 = vst [vmem:[%s7190_s3] sm:$0xff] %v4685_v45  ;;  %v4717_v51 = vsel %vm5192_vm0, %v4715_v42, %v4716_v52  ;;  %vm4736_vm1 = vcmp.gt.f32.partialorder %v6973_v53, %v4724_v11  ;;  %v4741_v48 = vsel %vm4731_vm15, %v4724_v11, %v6973_v53 }
 0x123   :  { %4714 = vst [vmem:[#allocation1 + $0x8] sm:$0xff] %v4711_v55  ;;  %v4747_v28 = vsel %vm4731_vm15, %v4728_v36, %v6977_v57  ;;  %4957 = vst [vmem:[%s7189_s2 + $0x8] sm:$0xff] %v4711_v55  ;;  %v4742_v34 = vsel %vm4736_vm1, %v4724_v11, %v6973_v53  ;;  %v4748_v56 = vsel %vm4736_vm1, %v4728_v36, %v6977_v57  ;;  %v4792_v53 = vld.sshfl [vmem:[#allocation3 + $0x20] sm:$0xff pattern:$0x67452301] }
 0x124   :  { %4720 = vst [vmem:[#allocation3 + $0x8] sm:$0xff] %v4717_v51  ;;  %vm4763_vm2 = vcmp.gt.f32.partialorder %v4756_v50, %v6985_v2  ;;  %vm4768_vm4 = vcmp.gt.f32.partialorder %v6985_v2, %v4756_v50  ;;  %5017 = vst [vmem:[%s7190_s3 + $0x8] sm:$0xff] %v4717_v51  ;;  %v4743_v57 = vsel %vm5192_vm0, %v4741_v48, %v4742_v34  ;;  %v4852_v9 = vld.sshfl [vmem:[#allocation1 + $0x30] sm:$0xff pattern:$0x67452301] }
 0x125   :  { %v4749_v58 = vsel %vm5192_vm0, %v4747_v28, %v4748_v56  ;;  %v4773_v46 = vsel %vm4763_vm2, %v4756_v50, %v6985_v2  ;;  %v4774_v63 = vsel %vm4768_vm4, %v4756_v50, %v6985_v2  ;;  %v4820_v2 = vld.sshfl [vmem:[#allocation1 + $0x28] sm:$0xff pattern:$0x67452301]  ;;  %4746 = vst [vmem:[#allocation1 + $0x10] sm:$0xff] %v4743_v57  ;;  %v4779_v62 = vsel %vm4763_vm2, %v4760_v59, %v6993_v4 }
 0x126   :  { %4752 = vst [vmem:[#allocation3 + $0x10] sm:$0xff] %v4749_v58  ;;  %v4775_v1 = vsel %vm5192_vm0, %v4773_v46, %v4774_v63  ;;  %v4780_v4 = vsel %vm4768_vm4, %v4760_v59, %v6993_v4  ;;  %vm4795_vm5 = vcmp.gt.f32.partialorder %v4788_v54, %v7005_v13  ;;  %4959 = vst [vmem:[%s7189_s2 + $0x10] sm:$0xff] %v4743_v57  ;;  %v4888_v32 = vld.sshfl [vmem:[#allocation3 + $0x38] sm:$0xff pattern:$0x67452301] }
 0x127   :  { %5019 = vst [vmem:[%s7190_s3 + $0x10] sm:$0xff] %v4749_v58  ;;  %4778 = vst [vmem:[#allocation1 + $0x18] sm:$0xff] %v4775_v1  ;;  %v4781_v3 = vsel %vm5192_vm0, %v4779_v62, %v4780_v4  ;;  %vm4800_vm9 = vcmp.gt.f32.partialorder %v7005_v13, %v4788_v54  ;;  %v4805_v5 = vsel %vm4795_vm5, %v4788_v54, %v7005_v13 }
 0x128   :  { %v4811_v43 = vsel %vm4795_vm5, %v4792_v53, %v7009_v12  ;;  %4961 = vst [vmem:[%s7189_s2 + $0x18] sm:$0xff] %v4775_v1  ;;  %4784 = vst [vmem:[#allocation3 + $0x18] sm:$0xff] %v4781_v3  ;;  %v4806_v6 = vsel %vm4800_vm9, %v4788_v54, %v7005_v13  ;;  %v4812_v21 = vsel %vm4800_vm9, %v4792_v53, %v7009_v12  ;;  %v4856_v13 = vld.sshfl [vmem:[#allocation3 + $0x30] sm:$0xff pattern:$0x67452301] }
 0x129   :  { %vm4827_vm10 = vcmp.gt.f32.partialorder %v4820_v2, %v7017_v39  ;;  %vm4832_vm6 = vcmp.gt.f32.partialorder %v7017_v39, %v4820_v2  ;;  %5021 = vst [vmem:[%s7190_s3 + $0x18] sm:$0xff] %v4781_v3  ;;  %v4807_v12 = vsel %vm5192_vm0, %v4805_v5, %v4806_v6  ;;  %v4813_v16 = vsel %vm5192_vm0, %v4811_v43, %v4812_v21 }
 0x12a   :  { %v4837_v22 = vsel %vm4827_vm10, %v4820_v2, %v7017_v39  ;;  %v4838_v33 = vsel %vm4832_vm6, %v4820_v2, %v7017_v39  ;;  %v4884_v39 = vld.sshfl [vmem:[#allocation1 + $0x38] sm:$0xff pattern:$0x67452301]  ;;  %4810 = vst [vmem:[#allocation1 + $0x20] sm:$0xff] %v4807_v12  ;;  %4816 = vst [vmem:[#allocation3 + $0x20] sm:$0xff] %v4813_v16  ;;  %v4843_v24 = vsel %vm4827_vm10, %v4824_v40, %v7025_v23 }
 0x12b   :  { %v4839_v8 = vsel %vm5192_vm0, %v4837_v22, %v4838_v33  ;;  %v4844_v23 = vsel %vm4832_vm6, %v4824_v40, %v7025_v23  ;;  %vm4859_vm7 = vcmp.gt.f32.partialorder %v4852_v9, %v7037_v44  ;;  %4963 = vst [vmem:[%s7189_s2 + $0x20] sm:$0xff] %v4807_v12  ;;  %5023 = vst [vmem:[%s7190_s3 + $0x20] sm:$0xff] %v4813_v16 }
 0x12c   :  { %4842 = vst [vmem:[#allocation1 + $0x28] sm:$0xff] %v4839_v8  ;;  %v4845_v27 = vsel %vm5192_vm0, %v4843_v24, %v4844_v23  ;;  %vm4864_vm8 = vcmp.gt.f32.partialorder %v7037_v44, %v4852_v9  ;;  %v4869_v17 = vsel %vm4859_vm7, %v4852_v9, %v7037_v44  ;;  %v4875_v30 = vsel %vm4859_vm7, %v4856_v13, %v7041_v29 }
 0x12d   :  { %4965 = vst [vmem:[%s7189_s2 + $0x28] sm:$0xff] %v4839_v8  ;;  %4848 = vst [vmem:[#allocation3 + $0x28] sm:$0xff] %v4845_v27  ;;  %v4870_v15 = vsel %vm4864_vm8, %v4852_v9, %v7037_v44  ;;  %v4876_v18 = vsel %vm4864_vm8, %v4856_v13, %v7041_v29  ;;  %vm4891_vm3 = vcmp.gt.f32.partialorder %v4884_v39, %v7049_v61 }
 0x12e   :  { %vm4896_vm11 = vcmp.gt.f32.partialorder %v7049_v61, %v4884_v39  ;;  %5025 = vst [vmem:[%s7190_s3 + $0x28] sm:$0xff] %v4845_v27  ;;  %v4871_v14 = vsel %vm5192_vm0, %v4869_v17, %v4870_v15  ;;  %v4877_v44 = vsel %vm5192_vm0, %v4875_v30, %v4876_v18  ;;  %v4901_v29 = vsel %vm4891_vm3, %v4884_v39, %v7049_v61 }
 0x12f   :  { %v4902_v20 = vsel %vm4896_vm11, %v4884_v39, %v7049_v61  ;;  %4874 = vst [vmem:[#allocation1 + $0x30] sm:$0xff] %v4871_v14  ;;  %4880 = vst [vmem:[#allocation3 + $0x30] sm:$0xff] %v4877_v44  ;;  %v4907_v7 = vsel %vm4891_vm3, %v4888_v32, %v7057_v0  ;;  %v4908_v61 = vsel %vm4896_vm11, %v4888_v32, %v7057_v0 }
 0x130   :  { %v4903_v25 = vsel %vm5192_vm0, %v4901_v29, %v4902_v20  ;;  %4967 = vst [vmem:[%s7189_s2 + $0x30] sm:$0xff] %v4871_v14  ;;  %5027 = vst [vmem:[%s7190_s3 + $0x30] sm:$0xff] %v4877_v44  ;;  %v4909_v19 = vsel %vm5192_vm0, %v4907_v7, %v4908_v61 }
 0x131   :  { %4906 = vst [vmem:[#allocation1 + $0x38] sm:$0xff] %v4903_v25  ;;  %4969 = vst [vmem:[%s7189_s2 + $0x38] sm:$0xff] %v4903_v25 }
 0x132   :  { %4912 = vst [vmem:[#allocation3 + $0x38] sm:$0xff] %v4909_v19  ;;  %5029 = vst [vmem:[%s7190_s3 + $0x38] sm:$0xff] %v4909_v19 }

// kernel: gravnet_block_forward.5
= control target key start
LH: loop header
LB: loop body
LE: loop exit
PB: predicated region body
PF: predicated region fallthrough
CT: control target
= control target key end

     0   :  { %v23_v0 = vlaneseq  ;;  %vm56_vm0 = vcmask 261120   ;;  %s301_s11 = smov 32   ;;  %vm226_vm1 = vcmask 785408   ;;  %s420_s1 = inlined_call_operand.vmem [shape: f32[33,64], index: 1, kind: input, shape index: {}]   ;;  %s421_s2 = inlined_call_operand.vmem [shape: f32[2,32], index: 2, kind: input, shape index: {}]   ;;  %s422_s0 = inlined_call_operand.vmem [shape: f32[64,32], index: 0, kind: input, shape index: {}]   ;;  %s423_s3 = inlined_call_operand.vmem [shape: f32[64,128], index: 3, kind: output, shape index: {}]  }
   0x1   :  { %v47_v1 = vld [vmem:[%s420_s1] sm:$0xff]  ;;  %v48_v2 = vld [vmem:[%s420_s1 + $0x8] sm:$0xff]  ;;  %v49_v3 = vld [vmem:[%s420_s1 + $0x10] sm:$0xff] }
   0x2   :  { %v288_v4 = vpack.c.bf16 %v48_v2, %v47_v1  ;;  %v50_v5 = vld [vmem:[%s420_s1 + $0x18] sm:$0xff]  ;;  %v24_v6 = vshrl.u32 %v23_v0, 7  ;;  %v22_v8 = vld [vmem:[%s421_s2] sm:$0x3]  ;;  %v15_v13 = vld [vmem:[%s422_s0 + $0x8] sm:$0xff] }
   0x3   :  { %v292_v7 = vpack.c.bf16 %v50_v5, %v49_v3  ;;  %v14_v9 = vld [vmem:[%s422_s0] sm:$0xff]  ;;  %v19_v14 = vld [vmem:[%s422_s0 + $0x28] sm:$0xff]  ;;  %v16_v17 = vld [vmem:[%s422_s0 + $0x10] sm:$0xff] }
   0x4   :  { %289 = vmatprep.subr.bf16.mxu0 %v288_v4  ;;  %296 = vmatprep.subr.bf16.mxu1 %v288_v4  ;;  %v25_v10 = vsub.s32 0, %v24_v6  ;;  %v37_v11 = vsub.s32 1, %v24_v6  ;;  %v18_v12 = vld [vmem:[%s422_s0 + $0x20] sm:$0xff]  ;;  %v17_v18 = vld [vmem:[%s422_s0 + $0x18] sm:$0xff]  ;;  %v20_v19 = vld [vmem:[%s422_s0 + $0x30] sm:$0xff] }
   0x5   :  { %291 = vmatpush3.bf16.msra.mxu0 %v288_v4  ;;  %298 = vmatpush3.bf16.msra.mxu1 %v288_v4  ;;  %v21_v24 = vld [vmem:[%s422_s0 + $0x38] sm:$0xff]  ;;  %v247_v37 = vld [vmem:[%s420_s1 + $0x20] ss:$0 sm:$0xff] }
   0x6   :  { %293 = vmatprep.subr.bf16.mxu0 %v292_v7  ;;  %297 = vmatprep.subr.bf16.mxu1 %v292_v7  ;;  %v26_v15 = vrot.slane %v22_v8, %v25_v10  ;;  %v38_v16 = vrot.slane %v22_v8, %v37_v11 }
   0x8   :  { %v27_v20 = vsub.f32 %v14_v9, %v26_v15  ;;  %v31_v21 = vsub.f32 %v18_v12, %v26_v15  ;;  %v28_v22 = vsub.f32 %v15_v13, %v26_v15  ;;  %v32_v23 = vsub.f32 %v19_v14, %v26_v15 }
   0x9   :  { %295 = vmatpush3.bf16.msra.mxu0 %v292_v7  ;;  %299 = vmatpush3.bf16.msra.mxu1 %v292_v7  ;;  %v29_v25 = vsub.f32 %v16_v17, %v26_v15  ;;  %v30_v26 = vsub.f32 %v17_v18, %v26_v15  ;;  %v33_v27 = vsub.f32 %v20_v19, %v26_v15 }
   0xa   :  { %v39_v28 = vmul.f32 %v38_v16, %v27_v20  ;;  %v361_v29 = vmul.f32 %v38_v16, %v31_v21  ;;  %v40_v30 = vmul.f32 %v38_v16, %v28_v22  ;;  %v44_v31 = vmul.f32 %v38_v16, %v32_v23 }
   0xb   :  { %v41_v32 = vmul.f32 %v38_v16, %v29_v25  ;;  %v363_v33 = vmul.f32 %v38_v16, %v33_v27  ;;  %v34_v34 = vsub.f32 %v21_v24, %v26_v15  ;;  %v42_v35 = vmul.f32 %v38_v16, %v30_v26 }
   0xc   :  { %276 = vmatprep.mubr.msk.f32.mxu0 %vm56_vm0, %v39_v28  ;;  %282 = vmatprep.mubr.msk.f32.mxu1 %vm56_vm0, %v361_v29 }
   0xd   :  { %277 = vmatmul.mubr.msk.f32.vlgmr.msra.gmra.mrb[0].mxu0 %vm56_vm0, %v40_v30  ;;  %283 = vmatmul.mubr.msk.f32.vlgmr.msra.gmra.mrb[0].mxu1 %vm56_vm0, %v44_v31  ;;  %v46_v36 = vmul.f32 %v38_v16, %v34_v34 }
   0xe   :  { %279 = vmatprep.mubr.msk.f32.mxu0 %vm56_vm0, %v41_v32  ;;  %285 = vmatprep.mubr.msk.f32.mxu1 %vm56_vm0, %v363_v33 }
  0x11   :  { %280 = vmatmul.mubr.msk.f32.gmra.mrb[2].mxu0 %vm56_vm0, %v42_v35  ;;  %286 = vmatmul.mubr.msk.f32.gmra.mrb[2].mxu1 %vm56_vm0, %v46_v36 }
  0xe0   :  { %v278_v38 = vpop.f32.mrb[0].mxu0  ;;  %v284_v39 = vpop.f32.mrb[0].mxu1 }
  0xe1   :  { %v153_v40 = vadd.f32 %v278_v38, %v247_v37  ;;  %v173_v41 = vadd.f32 %v284_v39, %v247_v37  ;;  %v147_v42 = vpop.f32.mrb[1].mxu0  ;;  %v167_v43 = vpop.f32.mrb[1].mxu1 }
  0xe2   :  { %v148_v46 = vadd.f32 %v247_v37, %v147_v42  ;;  %v168_v50 = vadd.f32 %v247_v37, %v167_v43 }
  0xe3   :  { %204 = vrot.lane.b32.xlu1 %v173_v41, %s301_s11  ;;  %196 = vrot.lane.b32.xlu0 %v153_v40, %s301_s11 }
  0xe4   :  { %v281_v44 = vpop.f32.mrb[2].mxu0  ;;  %v287_v45 = vpop.f32.mrb[2].mxu1 }
  0xe5   :  { %v163_v47 = vadd.f32 %v281_v44, %v247_v37  ;;  %v157_v48 = vpop.f32.mrb[3].mxu0  ;;  %v177_v49 = vpop.f32.mrb[3].mxu1  ;;  %v183_v52 = vadd.f32 %v287_v45, %v247_v37 }
  0xe6   :  { %v158_v51 = vadd.f32 %v247_v37, %v157_v48  ;;  %v178_v53 = vadd.f32 %v247_v37, %v177_v49 }
  0xe7   :  { %200 = vrot.lane.b32.xlu1 %v163_v47, %s301_s11  ;;  %194 = vrot.lane.b32.xlu0 %v148_v46, %s301_s11 }
  0xeb   :  { %198 = vrot.lane.b32.xlu1 %v158_v51, %s301_s11  ;;  %202 = vrot.lane.b32.xlu0 %v168_v50, %s301_s11 }
  0xef   :  { %208 = vrot.lane.b32.xlu1 %v183_v52, %s301_s11  ;;  %206 = vrot.lane.b32.xlu0 %v178_v53, %s301_s11 }
 0x155   :  { %v205_v54 = vpop.permute.xlu1 %204  ;;  %v197_v55 = vpop.permute.xlu0 %196 }
 0x156   :  { %v223_v56 = vsel %vm56_vm0, %v44_v31, %v205_v54  ;;  %v219_v57 = vsel %vm56_vm0, %v40_v30, %v197_v55 }
 0x157   :  { %v232_v58 = vsel %vm226_vm1, %v223_v56, 0.0  ;;  %v228_v59 = vsel %vm226_vm1, %v219_v57, 0.0 }
 0x158   :  { %240 = vst [vmem:[%s423_s3 + $0x28] sm:$0xff] %v232_v58  ;;  %236 = vst [vmem:[%s423_s3 + $0x8] sm:$0xff] %v228_v59 }
 0x159   :  { %v201_v60 = vpop.permute.xlu1 %200  ;;  %v195_v61 = vpop.permute.xlu0 %194 }
 0x15a   :  { %v221_v62 = vsel %vm56_vm0, %v42_v35, %v201_v60  ;;  %v218_v63 = vsel %vm56_vm0, %v39_v28, %v195_v61 }
 0x15b   :  { %v230_v0 = vsel %vm226_vm1, %v221_v62, 0.0  ;;  %v227_v1 = vsel %vm226_vm1, %v218_v63, 0.0 }
 0x15c   :  { %238 = vst [vmem:[%s423_s3 + $0x18] sm:$0xff] %v230_v0  ;;  %235 = vst [vmem:[%s423_s3] sm:$0xff] %v227_v1 }
 0x15d   :  { %v199_v2 = vpop.permute.xlu1 %198  ;;  %v203_v3 = vpop.permute.xlu0 %202 }
 0x15e   :  { %v220_v4 = vsel %vm56_vm0, %v41_v32, %v199_v2  ;;  %v222_v5 = vsel %vm56_vm0, %v361_v29, %v203_v3 }
 0x15f   :  { %v229_v6 = vsel %vm226_vm1, %v220_v4, 0.0  ;;  %v231_v7 = vsel %vm226_vm1, %v222_v5, 0.0 }
 0x160   :  { %237 = vst [vmem:[%s423_s3 + $0x10] sm:$0xff] %v229_v6  ;;  %239 = vst [vmem:[%s423_s3 + $0x20] sm:$0xff] %v231_v7 }
 0x161   :  { %v209_v8 = vpop.permute.xlu1 %208  ;;  %v207_v9 = vpop.permute.xlu0 %206 }
 0x162   :  { %v225_v10 = vsel %vm56_vm0, %v46_v36, %v209_v8  ;;  %v224_v11 = vsel %vm56_vm0, %v363_v33, %v207_v9 }
 0x163   :  { %v234_v12 = vsel %vm226_vm1, %v225_v10, 0.0  ;;  %v233_v13 = vsel %vm226_vm1, %v224_v11, 0.0 }
 0x164   :  { %242 = vst [vmem:[%s423_s3 + $0x38] sm:$0xff] %v234_v12  ;;  %241 = vst [vmem:[%s423_s3 + $0x30] sm:$0xff] %v233_v13 }

// kernel: gravnet_block_forward.6
= control target key start
LH: loop header
LB: loop body
LE: loop exit
PB: predicated region body
PF: predicated region fallthrough
CT: control target
= control target key end

     0   :  { %v278_v0 = vmov 0   ;;  %v279_v9 = vmov 1   ;;  %v280_v10 = vmov 2   ;;  %v60_v19 = vlaneseq  ;;  %s437_s0 = inlined_call_operand.vmem [shape: f32[64,3], index: 0, kind: input, shape index: {}]   ;;  %s438_s1 = inlined_call_operand.vmem [shape: f32[3,64], index: 1, kind: input, shape index: {}]   ;;  %s439_s2 = inlined_call_operand.vmem [shape: f32[64,64], index: 2, kind: output, shape index: {}]  }
   0x1   :  { %273 = vset.pattern.permute.xlu1 %v278_v0  ;;  %272 = vset.pattern.permute.xlu0 %v278_v0  ;;  %v13_v1 = vld [vmem:[%s437_s0 + $0x10] sm:$0xff]  ;;  %v11_v2 = vld [vmem:[%s437_s0] sm:$0xff]  ;;  %v14_v3 = vld [vmem:[%s437_s0 + $0x18] sm:$0xff]  ;;  %vm256_vm0 = vcmask 523264  }
   0x2   :  { %32 = vperm.xlu1 %273, %v13_v1   ;;  %22 = vperm.xlu0 %272, %v11_v2   ;;  %v12_v4 = vld [vmem:[%s437_s0 + $0x8] sm:$0xff]  ;;  %v15_v6 = vld [vmem:[%s437_s0 + $0x20] sm:$0xff]  ;;  %v18_v7 = vld [vmem:[%s437_s0 + $0x38] sm:$0xff]  ;;  %v324_v22 = vshrl.u32 %v60_v19, 7  ;;  %v340_v37 = vand.u32 127, %v60_v19 }
   0x3   :  { %v16_v5 = vld [vmem:[%s437_s0 + $0x28] sm:$0xff]  ;;  %v17_v8 = vld [vmem:[%s437_s0 + $0x30] sm:$0xff]  ;;  %v19_v26 = vld [vmem:[%s438_s1] sm:$0x7] }
   0x4   :  { %v122_v23 = vsub.s32 1, %v324_v22  ;;  %v62_v27 = vsub.s32 0, %v324_v22  ;;  %v182_v31 = vsub.s32 2, %v324_v22  ;;  %v211_v38 = vadd.s32 8, %v324_v22 }
   0x5   :  { %v348_v42 = vadd.s32 16, %v324_v22  ;;  %v354_v46 = vadd.s32 32, %v324_v22  ;;  %vm232_vm1 = vcmp.eq.s32.totalorder %v324_v22, %v340_v37  ;;  %v361_v52 = vadd.s32 24, %v324_v22 }
   0x6   :  { %37 = vperm.xlu1 %273, %v14_v3   ;;  %27 = vperm.xlu0 %272, %v12_v4   ;;  %v331_v28 = vrot.slane %v19_v26, %v122_v23  ;;  %v334_v32 = vrot.slane %v19_v26, %v62_v27  ;;  %v345_v41 = vrot.slane %v19_v26, %v182_v31  ;;  %v216_v26 = vadd.s32 48, %v324_v22 }
   0x7   :  { %vm233_vm2 = vcmp.eq.s32.totalorder %v211_v38, %v340_v37  ;;  %vm234_vm3 = vcmp.eq.s32.totalorder %v348_v42, %v340_v37  ;;  %vm236_vm4 = vcmp.eq.s32.totalorder %v354_v46, %v340_v37  ;;  %vm235_vm5 = vcmp.eq.s32.totalorder %v361_v52, %v340_v37 }
   0x8   :  { %vm238_vm6 = vcmp.eq.s32.totalorder %v216_v26, %v340_v37  ;;  %v217_v52 = vadd.s32 56, %v324_v22 }
   0xa   :  { %47 = vperm.xlu1 %273, %v16_v5   ;;  %42 = vperm.xlu0 %272, %v15_v6   ;;  %vm239_vm8 = vcmp.eq.s32.totalorder %v217_v52, %v340_v37 }
   0xe   :  { %57 = vperm.xlu1 %273, %v18_v7   ;;  %52 = vperm.xlu0 %272, %v17_v8  }
  0x12   :  { %275 = vset.pattern.permute.xlu1 %v279_v9  ;;  %274 = vset.pattern.permute.xlu0 %v279_v9 }
  0x13   :  { %93 = vperm.xlu1 %275, %v12_v4   ;;  %89 = vperm.xlu0 %274, %v11_v2  }
  0x17   :  { %97 = vperm.xlu1 %275, %v13_v1   ;;  %101 = vperm.xlu0 %274, %v14_v3  }
  0x1b   :  { %105 = vperm.xlu1 %275, %v15_v6   ;;  %109 = vperm.xlu0 %274, %v16_v5  }
  0x1f   :  { %113 = vperm.xlu1 %275, %v17_v8   ;;  %117 = vperm.xlu0 %274, %v18_v7  }
  0x23   :  { %276 = vset.pattern.permute.xlu1 %v280_v10  ;;  %277 = vset.pattern.permute.xlu0 %v280_v10 }
  0x24   :  { %149 = vperm.xlu1 %276, %v11_v2   ;;  %153 = vperm.xlu0 %277, %v12_v4  }
  0x28   :  { %157 = vperm.xlu1 %276, %v13_v1   ;;  %165 = vperm.xlu0 %277, %v15_v6  }
  0x2c   :  { %161 = vperm.xlu1 %276, %v14_v3   ;;  %173 = vperm.xlu0 %277, %v17_v8  }
  0x30   :  { %169 = vperm.xlu1 %276, %v16_v5  }
  0x34   :  { %177 = vperm.xlu1 %276, %v18_v7  }
  0x81   :  { %v33_v11 = vpop.permute.xlu1 %32  ;;  %v23_v12 = vpop.permute.xlu0 %22 }
  0x82   :  { %v64_v39 = vsub.f32 %v23_v12, %v334_v32  ;;  %v66_v43 = vsub.f32 %v33_v11, %v334_v32 }
  0x84   :  { %v72_v53 = vmul.f32 %v64_v39, %v64_v39  ;;  %v74_v57 = vmul.f32 %v66_v43, %v66_v43 }
  0x85   :  { %v38_v13 = vpop.permute.xlu1 %37  ;;  %v28_v14 = vpop.permute.xlu0 %27 }
  0x86   :  { %v65_v40 = vsub.f32 %v28_v14, %v334_v32  ;;  %v67_v58 = vsub.f32 %v38_v13, %v334_v32 }
  0x88   :  { %v73_v54 = vmul.f32 %v65_v40, %v65_v40 }
  0x89   :  { %v48_v15 = vpop.permute.xlu1 %47  ;;  %v43_v16 = vpop.permute.xlu0 %42 }
  0x8a   :  { %v68_v49 = vsub.f32 %v43_v16, %v334_v32  ;;  %v69_v1 = vsub.f32 %v48_v15, %v334_v32 }
  0x8c   :  { %v76_v2 = vmul.f32 %v68_v49, %v68_v49 }
  0x8d   :  { %v320_v17 = vpop.permute.xlu1 %57  ;;  %v322_v18 = vpop.permute.xlu0 %52 }
  0x8e   :  { %v70_v11 = vsub.f32 %v322_v18, %v334_v32 }
  0x92   :  { %v94_v20 = vpop.permute.xlu1 %93  ;;  %v90_v21 = vpop.permute.xlu0 %89 }
  0x93   :  { %v125_v33 = vsub.f32 %v94_v20, %v331_v28  ;;  %v124_v34 = vsub.f32 %v90_v21, %v331_v28  ;;  %v75_v21 = vmul.f32 %v67_v58, %v67_v58 }
  0x95   :  { %v133_v47 = vmul.f32 %v125_v33, %v125_v33  ;;  %v132_v48 = vmul.f32 %v124_v34, %v124_v34  ;;  %v77_v33 = vmul.f32 %v69_v1, %v69_v1  ;;  %v78_v34 = vmul.f32 %v70_v11, %v70_v11 }
  0x96   :  { %v98_v24 = vpop.permute.xlu1 %97  ;;  %v102_v25 = vpop.permute.xlu0 %101 }
  0x97   :  { %v126_v44 = vsub.f32 %v98_v24, %v331_v28  ;;  %v141_v61 = vadd.f32 %v133_v47, %v73_v54  ;;  %v140_v62 = vadd.f32 %v132_v48, %v72_v53  ;;  %v127_v3 = vsub.f32 %v102_v25, %v331_v28 }
  0x99   :  { %v134_v59 = vmul.f32 %v126_v44, %v126_v44  ;;  %v135_v23 = vmul.f32 %v127_v3, %v127_v3 }
  0x9a   :  { %v106_v29 = vpop.permute.xlu1 %105  ;;  %v110_v30 = vpop.permute.xlu0 %109 }
  0x9b   :  { %v128_v45 = vsub.f32 %v106_v29, %v331_v28  ;;  %v142_v12 = vadd.f32 %v134_v59, %v74_v57  ;;  %v129_v14 = vsub.f32 %v110_v30, %v331_v28 }
  0x9d   :  { %v136_v60 = vmul.f32 %v128_v45, %v128_v45  ;;  %v137_v38 = vmul.f32 %v129_v14, %v129_v14  ;;  %v143_v45 = vadd.f32 %v135_v23, %v75_v21 }
  0x9e   :  { %v114_v35 = vpop.permute.xlu1 %113  ;;  %v338_v36 = vpop.permute.xlu0 %117 }
  0x9f   :  { %v130_v4 = vsub.f32 %v114_v35, %v331_v28  ;;  %v144_v13 = vadd.f32 %v136_v60, %v76_v2  ;;  %v131_v40 = vsub.f32 %v338_v36, %v331_v28  ;;  %v215_v36 = vadd.s32 40, %v324_v22 }
  0xa0   :  { %v145_v42 = vadd.f32 %v137_v38, %v77_v33 }
  0xa1   :  { %v138_v24 = vmul.f32 %v130_v4, %v130_v4  ;;  %v139_v46 = vmul.f32 %v131_v40, %v131_v40  ;;  %vm237_vm7 = vcmp.eq.s32.totalorder %v215_v36, %v340_v37 }
  0xa3   :  { %v150_v50 = vpop.permute.xlu1 %149  ;;  %v154_v51 = vpop.permute.xlu0 %153  ;;  %v146_v47 = vadd.f32 %v138_v24, %v78_v34 }
  0xa4   :  { %v184_v55 = vsub.f32 %v150_v50, %v345_v41  ;;  %v185_v56 = vsub.f32 %v154_v51, %v345_v41  ;;  %v71_v51 = vsub.f32 %v320_v17, %v334_v32 }
  0xa6   :  { %v192_v63 = vmul.f32 %v184_v55, %v184_v55  ;;  %v193_v0 = vmul.f32 %v185_v56, %v185_v56  ;;  %v79_v59 = vmul.f32 %v71_v51, %v71_v51 }
  0xa7   :  { %v158_v5 = vpop.permute.xlu1 %157  ;;  %v166_v6 = vpop.permute.xlu0 %165 }
  0xa8   :  { %v200_v7 = vadd.f32 %v192_v63, %v140_v62  ;;  %v201_v8 = vadd.f32 %v193_v0, %v141_v61  ;;  %v186_v9 = vsub.f32 %v158_v5, %v345_v41  ;;  %v188_v10 = vsub.f32 %v166_v6, %v345_v41 }
  0xa9   :  { %v147_v0 = vadd.f32 %v139_v46, %v79_v59 }
  0xaa   :  { %v240_v15 = vsub.f32 0.0, %v200_v7  ;;  %v241_v16 = vsub.f32 0.0, %v201_v8  ;;  %v194_v19 = vmul.f32 %v186_v9, %v186_v9  ;;  %v196_v20 = vmul.f32 %v188_v10, %v188_v10 }
  0xab   :  { %v162_v25 = vpop.permute.xlu1 %161  ;;  %v174_v27 = vpop.permute.xlu0 %173 }
  0xac   :  { %v248_v29 = vsel %vm232_vm1, -1e+30, %v240_v15  ;;  %v249_v18 = vsel %vm233_vm2, -1e+30, %v241_v16  ;;  %v202_v31 = vadd.f32 %v194_v19, %v142_v12  ;;  %v204_v30 = vadd.f32 %v196_v20, %v144_v13 }
  0xad   :  { %257 = vst.msk [vmem:[%s439_s2] sm:$0xff] %vm256_vm0, %v248_v29  ;;  %258 = vst.msk [vmem:[%s439_s2 + $0x8] sm:$0xff] %vm256_vm0, %v249_v18  ;;  %v187_v35 = vsub.f32 %v162_v25, %v345_v41  ;;  %v190_v39 = vsub.f32 %v174_v27, %v345_v41 }
  0xae   :  { %v242_v43 = vsub.f32 0.0, %v202_v31  ;;  %v244_v44 = vsub.f32 0.0, %v204_v30 }
  0xaf   :  { %v195_v48 = vmul.f32 %v187_v35, %v187_v35  ;;  %v198_v49 = vmul.f32 %v190_v39, %v190_v39  ;;  %v170_v50 = vpop.permute.xlu1 %169 }
  0xb0   :  { %v250_v53 = vsel %vm234_vm3, -1e+30, %v242_v43  ;;  %v252_v54 = vsel %vm236_vm4, -1e+30, %v244_v44  ;;  %v189_v28 = vsub.f32 %v170_v50, %v345_v41 }
  0xb1   :  { %259 = vst.msk [vmem:[%s439_s2 + $0x10] sm:$0xff] %vm256_vm0, %v250_v53  ;;  %261 = vst.msk [vmem:[%s439_s2 + $0x20] sm:$0xff] %vm256_vm0, %v252_v54  ;;  %v203_v17 = vadd.f32 %v195_v48, %v143_v45  ;;  %v206_v32 = vadd.f32 %v198_v49, %v146_v47 }
  0xb2   :  { %v197_v55 = vmul.f32 %v189_v28, %v189_v28 }
  0xb3   :  { %v243_v56 = vsub.f32 0.0, %v203_v17  ;;  %v246_v57 = vsub.f32 0.0, %v206_v32  ;;  %v178_v58 = vpop.permute.xlu1 %177 }
  0xb4   :  { %v205_v60 = vadd.f32 %v197_v55, %v145_v42  ;;  %v191_v61 = vsub.f32 %v178_v58, %v345_v41 }
  0xb5   :  { %v251_v62 = vsel %vm235_vm5, -1e+30, %v243_v56  ;;  %v254_v63 = vsel %vm238_vm6, -1e+30, %v246_v57 }
  0xb6   :  { %260 = vst.msk [vmem:[%s439_s2 + $0x18] sm:$0xff] %vm256_vm0, %v251_v62  ;;  %263 = vst.msk [vmem:[%s439_s2 + $0x30] sm:$0xff] %vm256_vm0, %v254_v63  ;;  %v245_v1 = vsub.f32 0.0, %v205_v60  ;;  %v199_v2 = vmul.f32 %v191_v61, %v191_v61 }
  0xb8   :  { %v253_v41 = vsel %vm237_vm7, -1e+30, %v245_v1  ;;  %v207_v3 = vadd.f32 %v199_v2, %v147_v0 }
  0xb9   :  { %262 = vst.msk [vmem:[%s439_s2 + $0x28] sm:$0xff] %vm256_vm0, %v253_v41 }
  0xba   :  { %v247_v22 = vsub.f32 0.0, %v207_v3 }
  0xbc   :  { %v255_v4 = vsel %vm239_vm8, -1e+30, %v247_v22 }
  0xbd   :  { %264 = vst.msk [vmem:[%s439_s2 + $0x38] sm:$0xff] %vm256_vm0, %v255_v4 }

// kernel: gravnet_block_forward.4
= control target key start
LH: loop header
LB: loop body
LE: loop exit
PB: predicated region body
PF: predicated region fallthrough
CT: control target
= control target key end

     0   :  { %v28_v0 = vlaneseq  ;;  %vm32_vm0 = vcmask 130048   ;;  %vm214_vm1 = vcmask 261120   ;;  %s758_s1 = inlined_call_operand.vmem [shape: f32[50,32], index: 1, kind: input, shape index: {}]   ;;  %s759_s0 = inlined_call_operand.vmem [shape: f32[64,16], index: 0, kind: input, shape index: {}]   ;;  %s760_s2 = inlined_call_operand.vmem [shape: f32[64,32], index: 2, kind: output, shape index: {0}]   ;;  %s761_s3 = inlined_call_operand.vmem [shape: f32[1,2,32], index: 3, kind: output, shape index: {1}]  }
   0x1   :  { %v21_v1 = vld [vmem:[%s758_s1] sm:$0xff]  ;;  %v22_v2 = vld [vmem:[%s758_s1 + $0x8] sm:$0xff]  ;;  %v27_v7 = vld [vmem:[%s758_s1 + $0x30] sm:$0x3] }
   0x2   :  { %v29_v3 = vshrl.u32 %v28_v0, 7  ;;  %v552_v4 = vpack.c.bf16 %v22_v2, %v21_v1  ;;  %v13_v5 = vld [vmem:[%s759_s0] sm:$0xff]  ;;  %v14_v8 = vld [vmem:[%s759_s0 + $0x8] sm:$0xff]  ;;  %v15_v10 = vld [vmem:[%s759_s0 + $0x10] sm:$0xff] }
   0x3   :  { %520 = vmatprep.mubr.msk.f32.mxu0 %vm32_vm0, %v13_v5  ;;  %v16_v11 = vld [vmem:[%s759_s0 + $0x18] sm:$0xff]  ;;  %v17_v12 = vld [vmem:[%s759_s0 + $0x20] sm:$0xff]  ;;  %v18_v13 = vld [vmem:[%s759_s0 + $0x28] sm:$0xff] }
   0x4   :  { %553 = vmatprep.subr.bf16.mxu0 %v552_v4  ;;  %v212_v6 = vsub.s32 1, %v29_v3  ;;  %v19_v14 = vld [vmem:[%s759_s0 + $0x30] sm:$0xff]  ;;  %v20_v15 = vld [vmem:[%s759_s0 + $0x38] sm:$0xff]  ;;  %v25_v19 = vld [vmem:[%s758_s1 + $0x20] sm:$0xff]  ;;  %v30_v22 = vsub.s32 0, %v29_v3 }
   0x5   :  { %555 = vmatpush3.bf16.msra.mxu0 %v552_v4  ;;  %v23_v16 = vld [vmem:[%s758_s1 + $0x10] sm:$0xff]  ;;  %v24_v17 = vld [vmem:[%s758_s1 + $0x18] sm:$0xff]  ;;  %v26_v20 = vld [vmem:[%s758_s1 + $0x28] sm:$0xff] }
   0x6   :  { %v632_v9 = vrot.slane %v27_v7, %v212_v6  ;;  %v556_v18 = vpack.c.bf16 %v24_v17, %v23_v16  ;;  %v560_v21 = vpack.c.bf16 %v26_v20, %v25_v19  ;;  %v31_v23 = vrot.slane %v27_v7, %v30_v22 }
   0x8   :  { %521 = vmatmul.mubr.msk.f32.vlgmr.msra.gmra.mrb[0].mxu0 %vm32_vm0, %v14_v8  ;;  %557 = vmatprep.subr.bf16.mxu1 %v556_v18 }
   0x9   :  { %523 = vmatprep.mubr.msk.f32.mxu0 %vm32_vm0, %v15_v10  ;;  %559 = vmatpush3.bf16.msra.mxu1 %v556_v18 }
   0xa   :  { %561 = vmatprep.subr.bf16.mxu1 %v560_v21 }
   0xc   :  { %524 = vmatmul.mubr.msk.f32.gmra.mrb[2].mxu0 %vm32_vm0, %v16_v11 }
   0xd   :  { %526 = vmatprep.mubr.msk.f32.mxu0 %vm32_vm0, %v17_v12  ;;  %563 = vmatpush3.bf16.msra.mxu1 %v560_v21 }
  0x10   :  { %527 = vmatmul.mubr.msk.f32.gmra.mrb[4].mxu0 %vm32_vm0, %v18_v13 }
  0x11   :  { %529 = vmatprep.mubr.msk.f32.mxu0 %vm32_vm0, %v19_v14 }
  0x14   :  { %530 = vmatmul.mubr.msk.f32.gmra.mrb[6].mxu0 %vm32_vm0, %v20_v15 }
  0xdb   :  { %v522_v24 = vpop.f32.mrb[0].mxu0 }
  0xdc   :  { %v129_v25 = vadd.f32 %v522_v24, %v31_v23  ;;  %v123_v26 = vpop.f32.mrb[1].mxu0 }
  0xdd   :  { %v124_v27 = vadd.f32 %v123_v26, %v31_v23 }
  0xde   :  { %v171_v28 = vmin.f32 %v129_v25, 0.0  ;;  %vm163_vm3 = vcmp.gt.f32.partialorder %v129_v25, 0.0 }
  0xdf   :  { %v170_v29 = vmin.f32 %v124_v27, 0.0  ;;  %v525_v30 = vpop.f32.mrb[2].mxu0  ;;  %vm162_vm2 = vcmp.gt.f32.partialorder %v124_v27, 0.0 }
  0xe0   :  { %v180_v31 = vmul.f32 1.442695, %v171_v28  ;;  %v139_v32 = vadd.f32 %v525_v30, %v31_v23  ;;  %v133_v33 = vpop.f32.mrb[3].mxu0 }
  0xe1   :  { %v178_v34 = vmul.f32 1.442695, %v170_v29  ;;  %v134_v35 = vadd.f32 %v133_v33, %v31_v23 }
  0xe2   :  { %564 = vpow2.f32 %v180_v31  ;;  %v173_v36 = vmin.f32 %v139_v32, 0.0  ;;  %vm165_vm5 = vcmp.gt.f32.partialorder %v139_v32, 0.0 }
  0xe3   :  { %566 = vpow2.f32 %v178_v34  ;;  %v172_v37 = vmin.f32 %v134_v35, 0.0  ;;  %v528_v38 = vpop.f32.mrb[4].mxu0  ;;  %vm164_vm4 = vcmp.gt.f32.partialorder %v134_v35, 0.0 }
  0xe4   :  { %v184_v39 = vmul.f32 1.442695, %v173_v36  ;;  %v149_v40 = vadd.f32 %v528_v38, %v31_v23  ;;  %v143_v41 = vpop.f32.mrb[5].mxu0 }
  0xe5   :  { %v182_v42 = vmul.f32 1.442695, %v172_v37  ;;  %v144_v43 = vadd.f32 %v143_v41, %v31_v23 }
  0xe6   :  { %568 = vpow2.f32 %v184_v39  ;;  %v175_v44 = vmin.f32 %v149_v40, 0.0  ;;  %vm167_vm7 = vcmp.gt.f32.partialorder %v149_v40, 0.0 }
  0xe7   :  { %570 = vpow2.f32 %v182_v42  ;;  %v174_v45 = vmin.f32 %v144_v43, 0.0  ;;  %v531_v46 = vpop.f32.mrb[6].mxu0  ;;  %vm166_vm6 = vcmp.gt.f32.partialorder %v144_v43, 0.0 }
  0xe8   :  { %v188_v47 = vmul.f32 1.442695, %v175_v44  ;;  %v159_v48 = vadd.f32 %v531_v46, %v31_v23  ;;  %v153_v49 = vpop.f32.mrb[7].mxu0 }
  0xe9   :  { %v186_v50 = vmul.f32 1.442695, %v174_v45  ;;  %v154_v51 = vadd.f32 %v153_v49, %v31_v23 }
  0xea   :  { %572 = vpow2.f32 %v188_v47  ;;  %v177_v52 = vmin.f32 %v159_v48, 0.0  ;;  %vm169_vm9 = vcmp.gt.f32.partialorder %v159_v48, 0.0 }
  0xeb   :  { %574 = vpow2.f32 %v186_v50  ;;  %v176_v53 = vmin.f32 %v154_v51, 0.0  ;;  %vm168_vm8 = vcmp.gt.f32.partialorder %v154_v51, 0.0 }
  0xec   :  { %v565_v54 = vpop.eup %564  ;;  %v192_v55 = vmul.f32 1.442695, %v177_v52 }
  0xed   :  { %v567_v56 = vpop.eup %566  ;;  %v190_v57 = vmul.f32 1.442695, %v176_v53  ;;  %v471_v58 = vadd.f32 -1.0, %v565_v54 }
  0xee   :  { %576 = vpow2.f32 %v192_v55  ;;  %v470_v59 = vadd.f32 -1.0, %v567_v56 }
  0xef   :  { %578 = vpow2.f32 %v190_v57  ;;  %v203_v63 = vsel %vm163_vm3, %v129_v25, %v471_v58  ;;  %vm450_vm3 = vcmask 1040384  }
  0xf0   :  { %v569_v60 = vpop.eup %568  ;;  %v202_v61 = vsel %vm162_vm2, %v124_v27, %v470_v59 }
  0xf1   :  { %v571_v62 = vpop.eup %570  ;;  %540 = vmatprep.mubr.msk.f32.mxu1 %vm214_vm1, %v202_v61  ;;  %v473_v0 = vadd.f32 -1.0, %v569_v60 }
  0xf2   :  { %541 = vmatmul.mubr.msk.f32.vlgmr.msra.gmra.mrb[0].mxu1 %vm214_vm1, %v203_v63  ;;  %v472_v1 = vadd.f32 -1.0, %v571_v62 }
  0xf3   :  { %v205_v5 = vsel %vm165_vm5, %v139_v32, %v473_v0 }
  0xf4   :  { %v573_v2 = vpop.eup %572  ;;  %v204_v3 = vsel %vm164_vm4, %v134_v35, %v472_v1  ;;  %vm452_vm4 = vcmask 254976  }
  0xf5   :  { %v575_v4 = vpop.eup %574  ;;  %543 = vmatprep.mubr.msk.f32.mxu1 %vm214_vm1, %v204_v3  ;;  %v475_v6 = vadd.f32 -1.0, %v573_v2 }
  0xf6   :  { %544 = vmatmul.mubr.msk.f32.gmra.mrb[2].mxu1 %vm214_vm1, %v205_v5  ;;  %v474_v7 = vadd.f32 -1.0, %v575_v4 }
  0xf7   :  { %v207_v12 = vsel %vm167_vm7, %v149_v40, %v475_v6 }
  0xf8   :  { %v577_v8 = vpop.eup %576  ;;  %v206_v10 = vsel %vm166_vm6, %v144_v43, %v474_v7 }
  0xf9   :  { %v579_v11 = vpop.eup %578  ;;  %546 = vmatprep.mubr.msk.f32.mxu1 %vm214_vm1, %v206_v10  ;;  %v477_v13 = vadd.f32 -1.0, %v577_v8 }
  0xfa   :  { %547 = vmatmul.mubr.msk.f32.gmra.mrb[4].mxu1 %vm214_vm1, %v207_v12  ;;  %v476_v14 = vadd.f32 -1.0, %v579_v11 }
  0xfb   :  { %v209_v16 = vsel %vm169_vm9, %v159_v48, %v477_v13 }
  0xfc   :  { %v208_v15 = vsel %vm168_vm8, %v154_v51, %v476_v14 }
  0xfd   :  { %549 = vmatprep.mubr.msk.f32.mxu1 %vm214_vm1, %v208_v15 }
  0xfe   :  { %550 = vmatmul.mubr.msk.f32.gmra.mrb[6].mxu1 %vm214_vm1, %v209_v16 }
 0x1c5   :  { %v542_v17 = vpop.f32.mrb[0].mxu1 }
 0x1c6   :  { %v311_v18 = vadd.f32 %v542_v17, %v632_v9  ;;  %v305_v19 = vpop.f32.mrb[1].mxu1 }
 0x1c7   :  { %v306_v20 = vadd.f32 %v305_v19, %v632_v9 }
 0x1c8   :  { %v353_v21 = vmin.f32 %v311_v18, 0.0  ;;  %vm345_vm10 = vcmp.gt.f32.partialorder %v311_v18, 0.0 }
 0x1c9   :  { %v352_v22 = vmin.f32 %v306_v20, 0.0  ;;  %v545_v23 = vpop.f32.mrb[2].mxu1  ;;  %vm344_vm11 = vcmp.gt.f32.partialorder %v306_v20, 0.0 }
 0x1ca   :  { %v362_v24 = vmul.f32 1.442695, %v353_v21  ;;  %v321_v25 = vadd.f32 %v545_v23, %v632_v9  ;;  %v315_v26 = vpop.f32.mrb[3].mxu1 }
 0x1cb   :  { %v360_v27 = vmul.f32 1.442695, %v352_v22  ;;  %v316_v28 = vadd.f32 %v315_v26, %v632_v9 }
 0x1cc   :  { %580 = vpow2.f32 %v362_v24  ;;  %v355_v29 = vmin.f32 %v321_v25, 0.0  ;;  %vm347_vm12 = vcmp.gt.f32.partialorder %v321_v25, 0.0 }
 0x1cd   :  { %582 = vpow2.f32 %v360_v27  ;;  %v354_v30 = vmin.f32 %v316_v28, 0.0  ;;  %v548_v31 = vpop.f32.mrb[4].mxu1  ;;  %vm346_vm13 = vcmp.gt.f32.partialorder %v316_v28, 0.0 }
 0x1ce   :  { %v366_v32 = vmul.f32 1.442695, %v355_v29  ;;  %v684_v33 = vadd.f32 %v548_v31, %v632_v9  ;;  %v325_v34 = vpop.f32.mrb[5].mxu1 }
 0x1cf   :  { %v364_v35 = vmul.f32 1.442695, %v354_v30  ;;  %v687_v36 = vadd.f32 %v325_v34, %v632_v9 }
 0x1d0   :  { %584 = vpow2.f32 %v366_v32  ;;  %v357_v37 = vmin.f32 %v684_v33, 0.0  ;;  %vm349_vm14 = vcmp.gt.f32.partialorder %v684_v33, 0.0 }
 0x1d1   :  { %586 = vpow2.f32 %v364_v35  ;;  %v356_v38 = vmin.f32 %v687_v36, 0.0  ;;  %v551_v39 = vpop.f32.mrb[6].mxu1  ;;  %vm348_vm15 = vcmp.gt.f32.partialorder %v687_v36, 0.0 }
 0x1d2   :  { %v370_v40 = vmul.f32 1.442695, %v357_v37  ;;  %v692_v41 = vadd.f32 %v551_v39, %v632_v9  ;;  %v335_v42 = vpop.f32.mrb[7].mxu1 }
 0x1d3   :  { %v368_v43 = vmul.f32 1.442695, %v356_v38  ;;  %v695_v44 = vadd.f32 %v335_v42, %v632_v9 }
 0x1d4   :  { %588 = vpow2.f32 %v370_v40  ;;  %v359_v45 = vmin.f32 %v692_v41, 0.0  ;;  %vm351_vm0 = vcmp.gt.f32.partialorder %v692_v41, 0.0 }
 0x1d5   :  { %590 = vpow2.f32 %v368_v43  ;;  %v358_v46 = vmin.f32 %v695_v44, 0.0  ;;  %vm350_vm2 = vcmp.gt.f32.partialorder %v695_v44, 0.0 }
 0x1d6   :  { %v581_v47 = vpop.eup %580  ;;  %v374_v48 = vmul.f32 1.442695, %v359_v45 }
 0x1d7   :  { %v583_v49 = vpop.eup %582  ;;  %v487_v50 = vadd.f32 -1.0, %v581_v47  ;;  %v372_v51 = vmul.f32 1.442695, %v358_v46 }
 0x1d8   :  { %v486_v52 = vadd.f32 -1.0, %v583_v49  ;;  %592 = vpow2.f32 %v374_v48 }
 0x1d9   :  { %v385_v53 = vsel %vm345_vm10, %v311_v18, %v487_v50  ;;  %594 = vpow2.f32 %v372_v51 }
 0x1da   :  { %v585_v54 = vpop.eup %584  ;;  %393 = vst.msk [vmem:[%s760_s2 + $0x8] sm:$0xff] %vm214_vm1, %v385_v53  ;;  %v401_v9 = vsel %vm214_vm1, %v385_v53, 0.0  ;;  %v422_v55 = vmul.f32 %v385_v53, %v385_v53  ;;  %v384_v56 = vsel %vm344_vm11, %v306_v20, %v486_v52 }
 0x1db   :  { %v587_v57 = vpop.eup %586  ;;  %392 = vst.msk [vmem:[%s760_s2] sm:$0xff] %vm214_vm1, %v384_v56  ;;  %v400_v58 = vsel %vm214_vm1, %v384_v56, 0.0  ;;  %v421_v59 = vmul.f32 %v384_v56, %v384_v56  ;;  %v489_v60 = vadd.f32 -1.0, %v585_v54 }
 0x1dc   :  { %v430_v61 = vsel %vm214_vm1, %v422_v55, 0.0  ;;  %v402_v62 = vadd.f32 %v401_v9, %v400_v58  ;;  %v488_v63 = vadd.f32 -1.0, %v587_v57 }
 0x1dd   :  { %v429_v0 = vsel %vm214_vm1, %v421_v59, 0.0  ;;  %v387_v1 = vsel %vm347_vm12, %v321_v25, %v489_v60 }
 0x1de   :  { %v589_v2 = vpop.eup %588  ;;  %v431_v3 = vadd.f32 %v430_v61, %v429_v0  ;;  %395 = vst.msk [vmem:[%s760_s2 + $0x18] sm:$0xff] %vm214_vm1, %v387_v1  ;;  %v424_v4 = vmul.f32 %v387_v1, %v387_v1  ;;  %v386_v5 = vsel %vm346_vm13, %v316_v28, %v488_v63  ;;  %v405_v13 = vsel %vm214_vm1, %v387_v1, 0.0 }
 0x1df   :  { %v591_v6 = vpop.eup %590  ;;  %394 = vst.msk [vmem:[%s760_s2 + $0x10] sm:$0xff] %vm214_vm1, %v386_v5  ;;  %v403_v7 = vsel %vm214_vm1, %v386_v5, 0.0  ;;  %v423_v8 = vmul.f32 %v386_v5, %v386_v5  ;;  %v491_v10 = vadd.f32 -1.0, %v589_v2 }
 0x1e0   :  { %v404_v11 = vadd.f32 %v403_v7, %v402_v62  ;;  %v490_v12 = vadd.f32 -1.0, %v591_v6  ;;  %v434_v17 = vsel %vm214_vm1, %v424_v4, 0.0 }
 0x1e1   :  { %v432_v14 = vsel %vm214_vm1, %v423_v8, 0.0  ;;  %v389_v15 = vsel %vm349_vm14, %v684_v33, %v491_v10 }
 0x1e2   :  { %v593_v16 = vpop.eup %592  ;;  %v433_v18 = vadd.f32 %v432_v14, %v431_v3  ;;  %397 = vst.msk [vmem:[%s760_s2 + $0x28] sm:$0xff] %vm214_vm1, %v389_v15  ;;  %v426_v19 = vmul.f32 %v389_v15, %v389_v15  ;;  %v388_v20 = vsel %vm348_vm15, %v687_v36, %v490_v12  ;;  %v406_v22 = vadd.f32 %v405_v13, %v404_v11 }
 0x1e3   :  { %v595_v21 = vpop.eup %594  ;;  %396 = vst.msk [vmem:[%s760_s2 + $0x20] sm:$0xff] %vm214_vm1, %v388_v20  ;;  %v407_v23 = vsel %vm214_vm1, %v388_v20, 0.0  ;;  %v425_v24 = vmul.f32 %v388_v20, %v388_v20  ;;  %v493_v25 = vadd.f32 -1.0, %v593_v16  ;;  %v409_v31 = vsel %vm214_vm1, %v389_v15, 0.0 }
 0x1e4   :  { %v435_v26 = vadd.f32 %v434_v17, %v433_v18  ;;  %v492_v27 = vadd.f32 -1.0, %v595_v21  ;;  %v408_v28 = vadd.f32 %v407_v23, %v406_v22  ;;  %v438_v32 = vsel %vm214_vm1, %v426_v19, 0.0 }
 0x1e5   :  { %v436_v29 = vsel %vm214_vm1, %v425_v24, 0.0  ;;  %v391_v30 = vsel %vm351_vm0, %v692_v41, %v493_v25 }
 0x1e6   :  { %v437_v33 = vadd.f32 %v436_v29, %v435_v26  ;;  %399 = vst.msk [vmem:[%s760_s2 + $0x38] sm:$0xff] %vm214_vm1, %v391_v30  ;;  %v390_v34 = vsel %vm350_vm2, %v695_v44, %v492_v27  ;;  %v428_v35 = vmul.f32 %v391_v30, %v391_v30  ;;  %v410_v36 = vadd.f32 %v409_v31, %v408_v28 }
 0x1e7   :  { %398 = vst.msk [vmem:[%s760_s2 + $0x30] sm:$0xff] %vm214_vm1, %v390_v34  ;;  %v411_v37 = vsel %vm214_vm1, %v390_v34, 0.0  ;;  %v427_v38 = vmul.f32 %v390_v34, %v390_v34  ;;  %v413_v42 = vsel %vm214_vm1, %v391_v30, 0.0 }
 0x1e8   :  { %v439_v39 = vadd.f32 %v438_v32, %v437_v33  ;;  %v412_v40 = vadd.f32 %v411_v37, %v410_v36  ;;  %v442_v45 = vsel %vm214_vm1, %v428_v35, 0.0 }
 0x1e9   :  { %v440_v41 = vsel %vm214_vm1, %v427_v38, 0.0 }
 0x1ea   :  { %v441_v43 = vadd.f32 %v440_v41, %v439_v39  ;;  %v414_v44 = vadd.f32 %v413_v42, %v412_v40 }
 0x1ec   :  { %v443_v46 = vadd.f32 %v442_v45, %v441_v43  ;;  %v415_v47 = vrot.slane %v414_v44, 4 }
 0x1ee   :  { %v444_v48 = vrot.slane %v443_v46, 4  ;;  %v416_v49 = vadd.f32 %v415_v47, %v414_v44 }
 0x1f0   :  { %v445_v50 = vadd.f32 %v444_v48, %v443_v46  ;;  %v417_v51 = vrot.slane %v416_v49, 2 }
 0x1f2   :  { %v446_v52 = vrot.slane %v445_v50, 2  ;;  %v418_v53 = vadd.f32 %v417_v51, %v416_v49 }
 0x1f4   :  { %v447_v54 = vadd.f32 %v446_v52, %v445_v50  ;;  %v419_v9 = vrot.slane %v418_v53, 1 }
 0x1f6   :  { %v448_v55 = vrot.slane %v447_v54, 1  ;;  %v420_v56 = vadd.f32 %v419_v9, %v418_v53 }
 0x1f8   :  { %v449_v57 = vadd.f32 %v448_v55, %v447_v54 }
 0x1fa   :  { %v451_v58 = vsel %vm450_vm3, %v420_v56, %v449_v57 }
 0x1fb   :  { %453 = vst.msk [vmem:[%s761_s3] sm:$0x3] %vm452_vm4, %v451_v58 }

// kernel: gravnet_block_forward.7
= control target key start
LH: loop header
LB: loop body
LE: loop exit
PB: predicated region body
PF: predicated region fallthrough
CT: control target
= control target key end

     0   :  { %vm244_vm0 = vcmask 261120   ;;  %s1819_s29 = smov 64   ;;  %s2407_s2 = inlined_call_operand.vmem [shape: f32[227,32], index: 2, kind: input, shape index: {}]   ;;  %s2408_s1 = inlined_call_operand.vmem [shape: f32[8,64,32], index: 1, kind: input, shape index: {}]   ;;  %s2409_s0 = inlined_call_operand.vmem [shape: f32[64,128], index: 0, kind: input, shape index: {}]   ;;  %s2410_s3 = inlined_call_operand.vmem [shape: f32[64,32], index: 3, kind: output, shape index: {0}]   ;;  %s2411_s4 = inlined_call_operand.vmem [shape: f32[1,2,32], index: 4, kind: output, shape index: {1}]  }
   0x1   :  { %v219_v0 = vld [vmem:[%s2407_s2 + $0x20] sm:$0xff]  ;;  %v220_v1 = vld [vmem:[%s2407_s2 + $0x28] sm:$0xff]  ;;  %v221_v2 = vld [vmem:[%s2407_s2 + $0x30] sm:$0xff] }
   0x2   :  { %v1694_v3 = vpack.c.bf16 %v220_v1, %v219_v0  ;;  %v222_v4 = vld [vmem:[%s2407_s2 + $0x38] sm:$0xff]  ;;  %v24_v5 = vld [vmem:[%s2408_s1] sm:$0xff]  ;;  %v216_v15 = vld [vmem:[%s2407_s2 + $0x8] sm:$0xff] }
   0x3   :  { %v1342_v6 = vld [vmem:[%s2408_s1 + $0x40] sm:$0xff]  ;;  %v1698_v7 = vpack.c.bf16 %v222_v4, %v221_v2  ;;  %v25_v16 = vld [vmem:[%s2408_s1 + $0x8] sm:$0xff]  ;;  %v26_v27 = vld [vmem:[%s2408_s1 + $0x10] sm:$0xff] }
   0x4   :  { %v41_v8 = vadd.f32 %v1342_v6, %v24_v5  ;;  %v49_v9 = vmax.f32 %v24_v5, %v1342_v6  ;;  %v1350_v10 = vld [vmem:[%s2408_s1 + $0x80] sm:$0xff]  ;;  %1695 = vmatprep.subr.bf16.mxu0 %v1694_v3  ;;  %1750 = vmatprep.subr.bf16.mxu1 %v1694_v3  ;;  %v1343_v19 = vld [vmem:[%s2408_s1 + $0x48] sm:$0xff]  ;;  %v1344_v28 = vld [vmem:[%s2408_s1 + $0x50] sm:$0xff] }
   0x5   :  { %v1358_v11 = vld [vmem:[%s2408_s1 + $0xc0] sm:$0xff]  ;;  %1697 = vmatpush3.bf16.msra.mxu0 %v1694_v3  ;;  %1752 = vmatpush3.bf16.msra.mxu1 %v1694_v3  ;;  %v1351_v20 = vld [vmem:[%s2408_s1 + $0x88] sm:$0xff]  ;;  %v42_v24 = vadd.f32 %v1343_v19, %v25_v16  ;;  %v50_v25 = vmax.f32 %v25_v16, %v1343_v19  ;;  %v1352_v33 = vld [vmem:[%s2408_s1 + $0x90] sm:$0xff]  ;;  %v51_v37 = vmax.f32 %v26_v27, %v1344_v28 }
   0x6   :  { %v66_v12 = vadd.f32 %v1350_v10, %v41_v8  ;;  %v74_v13 = vmax.f32 %v49_v9, %v1350_v10  ;;  %v215_v14 = vld [vmem:[%s2407_s2] sm:$0xff]  ;;  %1699 = vmatprep.subr.bf16.mxu0 %v1698_v7  ;;  %1751 = vmatprep.subr.bf16.mxu1 %v1698_v7  ;;  %v1359_v26 = vld [vmem:[%s2408_s1 + $0xc8] sm:$0xff]  ;;  %v43_v38 = vadd.f32 %v1344_v28, %v26_v27  ;;  %v1360_v44 = vld [vmem:[%s2408_s1 + $0xd0] sm:$0xff] }
   0x7   :  { %v1366_v17 = vld [vmem:[%s2408_s1 + $0x100] sm:$0xff]  ;;  %v1881_v18 = vpack.c.bf16 %v216_v15, %v215_v14  ;;  %v67_v31 = vadd.f32 %v1351_v20, %v42_v24  ;;  %v75_v32 = vmax.f32 %v50_v25, %v1351_v20  ;;  %v1367_v36 = vld [vmem:[%s2408_s1 + $0x108] sm:$0xff]  ;;  %v27_v45 = vld [vmem:[%s2408_s1 + $0x18] sm:$0xff]  ;;  %v76_v47 = vmax.f32 %v51_v37, %v1352_v33 }
   0x8   :  { %v91_v21 = vadd.f32 %v1358_v11, %v66_v12  ;;  %v99_v22 = vmax.f32 %v74_v13, %v1358_v11  ;;  %v1374_v23 = vld [vmem:[%s2408_s1 + $0x140] sm:$0xff]  ;;  %v1375_v43 = vld [vmem:[%s2408_s1 + $0x148] sm:$0xff]  ;;  %v1368_v48 = vld [vmem:[%s2408_s1 + $0x110] sm:$0xff]  ;;  %v68_v50 = vadd.f32 %v1352_v33, %v43_v38 }
   0x9   :  { %1701 = vmatpush3.bf16.msra.mxu0 %v1698_v7  ;;  %v1382_v34 = vld [vmem:[%s2408_s1 + $0x180] sm:$0xff]  ;;  %1753 = vmatpush3.bf16.msra.mxu1 %v1698_v7  ;;  %v92_v41 = vadd.f32 %v1359_v26, %v67_v31  ;;  %v100_v42 = vmax.f32 %v75_v32, %v1359_v26  ;;  %v1383_v46 = vld [vmem:[%s2408_s1 + $0x188] sm:$0xff]  ;;  %v1345_v49 = vld [vmem:[%s2408_s1 + $0x58] sm:$0xff]  ;;  %v101_v58 = vmax.f32 %v76_v47, %v1360_v44 }
   0xa   :  { %v116_v29 = vadd.f32 %v1366_v17, %v91_v21  ;;  %v124_v30 = vmax.f32 %v99_v22, %v1366_v17  ;;  %v1390_v35 = vld [vmem:[%s2408_s1 + $0x1c0] sm:$0xff]  ;;  %1703 = vmatprep.subr.bf16.mxu0 %v1881_v18  ;;  %v217_v55 = vld [vmem:[%s2407_s2 + $0x10] sm:$0xff]  ;;  %v218_v56 = vld [vmem:[%s2407_s2 + $0x18] sm:$0xff]  ;;  %v52_v60 = vmax.f32 %v27_v45, %v1345_v49  ;;  %v93_v63 = vadd.f32 %v1360_v44, %v68_v50 }
   0xb   :  { %v117_v53 = vadd.f32 %v1367_v36, %v92_v41  ;;  %v125_v54 = vmax.f32 %v100_v42, %v1367_v36  ;;  %v1353_v57 = vld [vmem:[%s2408_s1 + $0x98] sm:$0xff]  ;;  %v1376_v59 = vld [vmem:[%s2408_s1 + $0x150] sm:$0xff]  ;;  %v223_v61 = vld [vmem:[%s2407_s2 + $0x40] sm:$0xff]  ;;  %v44_v0 = vadd.f32 %v1345_v49, %v27_v45  ;;  %v126_v9 = vmax.f32 %v101_v58, %v1368_v48 }
   0xc   :  { %v141_v39 = vadd.f32 %v1374_v23, %v116_v29  ;;  %v149_v40 = vmax.f32 %v124_v30, %v1374_v23  ;;  %v224_v62 = vld [vmem:[%s2407_s2 + $0x48] sm:$0xff]  ;;  %v1361_v5 = vld [vmem:[%s2408_s1 + $0xd8] sm:$0xff]  ;;  %v28_v6 = vld [vmem:[%s2408_s1 + $0x20] sm:$0xff]  ;;  %v1965_v11 = vpack.c.bf16 %v218_v56, %v217_v55  ;;  %v77_v12 = vmax.f32 %v52_v60, %v1353_v57 }
   0xd   :  { %v142_v3 = vadd.f32 %v1375_v43, %v117_v53  ;;  %v150_v4 = vmax.f32 %v125_v54, %v1375_v43  ;;  %v1346_v7 = vld [vmem:[%s2408_s1 + $0x60] sm:$0xff]  ;;  %v1391_v8 = vld [vmem:[%s2408_s1 + $0x1c8] sm:$0xff]  ;;  %v1384_v10 = vld [vmem:[%s2408_s1 + $0x190] sm:$0xff]  ;;  %v118_v13 = vadd.f32 %v1368_v48, %v93_v63  ;;  %v1971_v17 = vpack.c.bf16 %v224_v62, %v223_v61 }
   0xe   :  { %v166_v51 = vadd.f32 %v1382_v34, %v141_v39  ;;  %v174_v52 = vmax.f32 %v149_v40, %v1382_v34  ;;  %v1369_v16 = vld [vmem:[%s2408_s1 + $0x118] sm:$0xff]  ;;  %v69_v19 = vadd.f32 %v1353_v57, %v44_v0  ;;  %v1354_v20 = vld [vmem:[%s2408_s1 + $0xa0] sm:$0xff]  ;;  %v225_v21 = vld [vmem:[%s2407_s2 + $0x50] sm:$0xff]  ;;  %v151_v22 = vmax.f32 %v126_v9, %v1376_v59 }
   0xf   :  { %v167_v14 = vadd.f32 %v1383_v46, %v142_v3  ;;  %v175_v15 = vmax.f32 %v150_v4, %v1383_v46  ;;  %v102_v23 = vmax.f32 %v77_v12, %v1361_v5  ;;  %v143_v24 = vadd.f32 %v1376_v59, %v118_v13  ;;  %v226_v26 = vld [vmem:[%s2407_s2 + $0x58] sm:$0xff]  ;;  %v29_v27 = vld [vmem:[%s2408_s1 + $0x28] sm:$0xff]  ;;  %v1392_v32 = vld [vmem:[%s2408_s1 + $0x1d0] sm:$0xff] }
  0x10   :  { %v191_v1 = vadd.f32 %v1390_v35, %v166_v51  ;;  %v199_v2 = vmax.f32 %v174_v52, %v1390_v35  ;;  %v45_v25 = vadd.f32 %v1346_v7, %v28_v6  ;;  %v1347_v28 = vld [vmem:[%s2408_s1 + $0x68] sm:$0xff]  ;;  %v1377_v33 = vld [vmem:[%s2408_s1 + $0x158] sm:$0xff]  ;;  %v94_v34 = vadd.f32 %v1361_v5, %v69_v19  ;;  %v1999_v35 = vld [vmem:[%s2408_s1 + $0xe0] sm:$0xff] }
  0x11   :  { %v192_v30 = vadd.f32 %v1391_v8, %v167_v14  ;;  %v200_v31 = vmax.f32 %v175_v15, %v1391_v8  ;;  %v176_v36 = vmax.f32 %v151_v22, %v1384_v10  ;;  %v127_v37 = vmax.f32 %v102_v23, %v1369_v16  ;;  %v1385_v38 = vld [vmem:[%s2408_s1 + $0x198] sm:$0xff]  ;;  %v1355_v41 = vld [vmem:[%s2408_s1 + $0xa8] sm:$0xff]  ;;  %v1370_v43 = vld [vmem:[%s2408_s1 + $0x120] sm:$0xff] }
  0x12   :  { %1562 = vmatprep.mubr.msk.f32.mxu0 %vm244_vm0, %v199_v2  ;;  %v1988_v29 = vmul.f32 0.125, %v191_v1  ;;  %v168_v39 = vadd.f32 %v1384_v10, %v143_v24  ;;  %v70_v40 = vadd.f32 %v1354_v20, %v45_v25  ;;  %v119_v42 = vadd.f32 %v1369_v16, %v94_v34  ;;  %v2016_v46 = vld [vmem:[%s2408_s1 + $0x30] sm:$0xff]  ;;  %v1393_v52 = vld [vmem:[%s2408_s1 + $0x1d8] sm:$0xff]  ;;  %v1363_v54 = vld [vmem:[%s2408_s1 + $0xe8] sm:$0xff] }
  0x13   :  { %1563 = vmatmul.mubr.msk.f32.vlgmr.msra.gmra.mrb[0].mxu0 %vm244_vm0, %v200_v31  ;;  %v2011_v44 = vpack.c.bf16 %v226_v26, %v225_v21  ;;  %v46_v45 = vadd.f32 %v1347_v28, %v29_v27  ;;  %v2021_v47 = vld [vmem:[%s2408_s1 + $0x70] sm:$0xff]  ;;  %v53_v48 = vmax.f32 %v28_v6, %v1346_v7  ;;  %v2023_v49 = vmul.f32 0.125, %v192_v30  ;;  %v1371_v58 = vld [vmem:[%s2408_s1 + $0x128] sm:$0xff]  ;;  %v2050_v60 = vld [vmem:[%s2408_s1 + $0x38] sm:$0xff] }
  0x14   :  { %1705 = vmatpush3.bf16.msra.mxu0 %v1881_v18  ;;  %v201_v50 = vmax.f32 %v176_v36, %v1392_v32  ;;  %v152_v51 = vmax.f32 %v127_v37, %v1377_v33  ;;  %v95_v53 = vadd.f32 %v1999_v35, %v70_v40  ;;  %v1356_v55 = vld [vmem:[%s2408_s1 + $0xb0] sm:$0xff]  ;;  %v144_v56 = vadd.f32 %v1377_v33, %v119_v42  ;;  %v2040_v18 = vld [vmem:[%s2408_s1 + $0x160] sm:$0xff]  ;;  %v2061_v2 = vld [vmem:[%s2408_s1 + $0x78] sm:$0xff] }
  0x15   :  { %1707 = vmatprep.subr.bf16.mxu0 %v1965_v11  ;;  %v71_v57 = vadd.f32 %v1355_v41, %v46_v45  ;;  %v47_v59 = vadd.f32 %v2021_v47, %v2016_v46  ;;  %v78_v61 = vmax.f32 %v53_v48, %v1354_v20  ;;  %v193_v63 = vadd.f32 %v1392_v32, %v168_v39  ;;  %v2056_v1 = vld [vmem:[%s2408_s1 + $0xf0] sm:$0xff]  ;;  %v2066_v3 = vld [vmem:[%s2408_s1 + $0xb8] sm:$0xff]  ;;  %v1386_v6 = vld [vmem:[%s2408_s1 + $0x1a0] sm:$0xff] }
  0x16   :  { %1565 = vmatprep.mubr.msk.f32.mxu0 %vm244_vm0, %v201_v50  ;;  %v177_v62 = vmax.f32 %v152_v51, %v1385_v38  ;;  %v120_v0 = vadd.f32 %v1370_v43, %v95_v53  ;;  %v54_v4 = vmax.f32 %v29_v27, %v1347_v28  ;;  %v169_v5 = vadd.f32 %v1385_v38, %v144_v56  ;;  %v1379_v13 = vld [vmem:[%s2408_s1 + $0x168] sm:$0xff]  ;;  %v1372_v14 = vld [vmem:[%s2408_s1 + $0x130] sm:$0xff]  ;;  %v2084_v15 = vld [vmem:[%s2408_s1 + $0xf8] sm:$0xff] }
  0x17   :  { %v96_v7 = vadd.f32 %v1363_v54, %v71_v57  ;;  %v72_v8 = vadd.f32 %v1356_v55, %v47_v59  ;;  %v48_v9 = vadd.f32 %v2061_v2, %v2050_v60  ;;  %v103_v16 = vmax.f32 %v78_v61, %v1999_v35  ;;  %v2091_v20 = vld [vmem:[%s2408_s1 + $0x1e0] sm:$0xff]  ;;  %v1387_v22 = vld [vmem:[%s2408_s1 + $0x1a8] sm:$0xff]  ;;  %v2102_v26 = vld [vmem:[%s2408_s1 + $0x170] sm:$0xff] }
  0x18   :  { %v202_v10 = vmax.f32 %v177_v62, %v1393_v52  ;;  %1709 = vmatpush3.bf16.msra.mxu0 %v1965_v11  ;;  %v145_v12 = vadd.f32 %v2040_v18, %v120_v0  ;;  %v79_v19 = vmax.f32 %v54_v4, %v1355_v41  ;;  %v194_v11 = vadd.f32 %v1393_v52, %v169_v5  ;;  %v2107_v27 = vld [vmem:[%s2408_s1 + $0x138] sm:$0xff]  ;;  %v2112_v28 = vld [vmem:[%s2409_s0] sm:$0xff]  ;;  %v2122_v37 = vld [vmem:[%s2409_s0 + $0x10] sm:$0xff] }
  0x19   :  { %1711 = vmatprep.subr.bf16.mxu0 %v1971_v17  ;;  %v121_v21 = vadd.f32 %v1371_v58, %v96_v7  ;;  %v97_v23 = vadd.f32 %v2056_v1, %v72_v8  ;;  %v73_v24 = vadd.f32 %v2066_v3, %v48_v9  ;;  %v128_v30 = vmax.f32 %v103_v16, %v1370_v43  ;;  %v1388_v39 = vld [vmem:[%s2408_s1 + $0x1b0] sm:$0xff]  ;;  %v2136_v40 = vld [vmem:[%s2408_s1 + $0x178] sm:$0xff]  ;;  %v231_v56 = vld [vmem:[%s2407_s2 + $0x80] sm:$0xff] }
  0x1a   :  { %1566 = vmatmul.mubr.msk.f32.gmra.mrb[2].mxu0 %vm244_vm0, %v202_v10  ;;  %v170_v25 = vadd.f32 %v1386_v6, %v145_v12  ;;  %v104_v31 = vmax.f32 %v79_v19, %v1363_v54  ;;  %v55_v32 = vmax.f32 %v2016_v46, %v2021_v47  ;;  %v209_v33 = vmul.f32 0.125, %v193_v63  ;;  %652 = vrot.lane.b32.xlu0 %v2112_v28, %s1819_s29  ;;  %v1396_v47 = vld [vmem:[%s2408_s1 + $0x1f0] sm:$0xff]  ;;  %v1389_v52 = vld [vmem:[%s2408_s1 + $0x1b8] sm:$0xff]  ;;  %v2169_v61 = vld [vmem:[%s2409_s0 + $0x8] sm:$0xff] }
  0x1b   :  { %1582 = vmatprep.mubr.msk.f32.mxu0 %vm244_vm0, %v1988_v29  ;;  %v146_v34 = vadd.f32 %v1379_v13, %v121_v21  ;;  %v122_v35 = vadd.f32 %v1372_v14, %v97_v23  ;;  %v98_v36 = vadd.f32 %v2084_v15, %v73_v24  ;;  %v1395_v29 = vld [vmem:[%s2408_s1 + $0x1e8] sm:$0xff]  ;;  %v153_v41 = vmax.f32 %v128_v30, %v2040_v18  ;;  %v234_v4 = vld [vmem:[%s2407_s2 + $0x98] sm:$0xff] }
  0x1c   :  { %v195_v38 = vadd.f32 %v2091_v20, %v170_v25  ;;  %v129_v42 = vmax.f32 %v104_v31, %v1371_v58  ;;  %v80_v43 = vmax.f32 %v55_v32, %v1356_v55  ;;  %656 = vrot.lane.b32.xlu1 %v2122_v37, %s1819_s29  ;;  %v56_v50 = vmax.f32 %v2050_v60, %v2061_v2  ;;  %v232_v18 = vld [vmem:[%s2407_s2 + $0x88] sm:$0xff]  ;;  %v1397_v60 = vld [vmem:[%s2408_s1 + $0x1f8] sm:$0xff]  ;;  %v233_v2 = vld [vmem:[%s2407_s2 + $0x90] sm:$0xff] }
  0x1d   :  { %v171_v45 = vadd.f32 %v1387_v22, %v146_v34  ;;  %v147_v46 = vadd.f32 %v2102_v26, %v122_v35  ;;  %v123_v48 = vadd.f32 %v2107_v27, %v98_v36  ;;  %v210_v51 = vmul.f32 0.125, %v194_v11  ;;  %v2204_v19 = vld [vmem:[%s2409_s0 + $0x28] sm:$0xff]  ;;  %v230_v34 = vld [vmem:[%s2407_s2 + $0x78] sm:$0xff] }
  0x1e   :  { %1583 = vmatmul.mubr.msk.f32.vlgmr.msra.gmra.mrb[0].mxu0 %vm244_vm0, %v2023_v49  ;;  %v178_v53 = vmax.f32 %v153_v41, %v1386_v6  ;;  %v154_v54 = vmax.f32 %v129_v42, %v1379_v13  ;;  %v105_v55 = vmax.f32 %v80_v43, %v2056_v1  ;;  %v211_v49 = vmul.f32 0.125, %v195_v38  ;;  %654 = vrot.lane.b32.xlu0 %v2169_v61, %s1819_s29 }
  0x1f   :  { %1713 = vmatpush3.bf16.msra.mxu0 %v1971_v17  ;;  %1585 = vmatprep.mubr.msk.f32.mxu0 %vm244_vm0, %v209_v33  ;;  %v196_v57 = vadd.f32 %v1395_v29, %v171_v45  ;;  %v172_v58 = vadd.f32 %v1388_v39, %v147_v46  ;;  %v148_v59 = vadd.f32 %v2136_v40, %v123_v48  ;;  %v2175_v17 = vld [vmem:[%s2409_s0 + $0x18] sm:$0xff]  ;;  %v229_v33 = vld [vmem:[%s2407_s2 + $0x70] sm:$0xff]  ;;  %v640_v46 = vlaneseq }
  0x20   :  { %1715 = vmatprep.subr.bf16.mxu0 %v2011_v44  ;;  %v203_v62 = vmax.f32 %v178_v53, %v2091_v20  ;;  %v179_v63 = vmax.f32 %v154_v54, %v1387_v22  ;;  %v130_v0 = vmax.f32 %v105_v55, %v1372_v14  ;;  %v81_v1 = vmax.f32 %v56_v50, %v2066_v3  ;;  %v2198_v14 = vld [vmem:[%s2409_s0 + $0x20] sm:$0xff]  ;;  %v228_v20 = vld [vmem:[%s2407_s2 + $0x68] sm:$0xff] }
  0x21   :  { %v197_v5 = vadd.f32 %v1396_v47, %v172_v58  ;;  %v173_v6 = vadd.f32 %v1389_v52, %v148_v59  ;;  %658 = vrot.lane.b32.xlu1 %v2175_v17, %s1819_s29  ;;  %v1718_v7 = vpack.c.bf16 %v232_v18, %v231_v56  ;;  %v212_v3 = vmul.f32 0.125, %v196_v57  ;;  %v237_v18 = vld [vmem:[%s2407_s2 + $0xb0] sm:$0xff] }
  0x22   :  { %1586 = vmatmul.mubr.msk.f32.gmra.mrb[2].mxu0 %vm244_vm0, %v210_v51  ;;  %1568 = vmatprep.mubr.msk.f32.mxu1 %vm244_vm0, %v203_v62  ;;  %v204_v8 = vmax.f32 %v179_v63, %v1395_v29  ;;  %v155_v9 = vmax.f32 %v130_v0, %v2102_v26  ;;  %v106_v10 = vmax.f32 %v81_v1, %v2084_v15  ;;  %v2224_v26 = vld [vmem:[%s2409_s0 + $0x30] sm:$0xff]  ;;  %v235_v29 = vld [vmem:[%s2407_s2 + $0xa0] sm:$0xff] }
  0x23   :  { %1588 = vmatprep.mubr.msk.f32.mxu0 %vm244_vm0, %v211_v49  ;;  %1717 = vmatpush3.bf16.msra.mxu0 %v2011_v44  ;;  %v213_v12 = vmul.f32 0.125, %v197_v5  ;;  %v198_v13 = vadd.f32 %v1397_v60, %v173_v6  ;;  %v1722_v16 = vpack.c.bf16 %v234_v4, %v233_v2  ;;  %v227_v44 = vld [vmem:[%s2407_s2 + $0x60] sm:$0xff]  ;;  %v1730_v35 = vpack.c.bf16 %v230_v34, %v229_v33  ;;  %v238_v49 = vld [vmem:[%s2407_s2 + $0xb8] sm:$0xff] }
  0x24   :  { %1569 = vmatmul.mubr.msk.f32.vlgmr.msra.gmra.mrb[0].mxu1 %vm244_vm0, %v204_v8  ;;  %v180_v15 = vmax.f32 %v155_v9, %v1388_v39  ;;  %v131_v11 = vmax.f32 %v106_v10, %v2107_v27  ;;  %1719 = vmatprep.subr.bf16.mxu1 %v1718_v7  ;;  %v1726_v24 = vpack.c.bf16 %v228_v20, %v227_v44  ;;  %v2229_v27 = vld [vmem:[%s2409_s0 + $0x38] sm:$0xff]  ;;  %v236_v39 = vld [vmem:[%s2407_s2 + $0xa8] sm:$0xff] }
  0x25   :  { %660 = vrot.lane.b32.xlu0 %v2198_v14, %s1819_s29  ;;  %662 = vrot.lane.b32.xlu1 %v2204_v19, %s1819_s29  ;;  %v214_v21 = vmul.f32 0.125, %v198_v13 }
  0x26   :  { %1589 = vmatmul.mubr.msk.f32.gmra.mrb[4].mxu0 %vm244_vm0, %v212_v3  ;;  %v205_v22 = vmax.f32 %v180_v15, %v1396_v47  ;;  %v156_v23 = vmax.f32 %v131_v11, %v2136_v40  ;;  %1721 = vmatpush3.bf16.msra.mxu1 %v1718_v7  ;;  %v1734_v40 = vpack.c.bf16 %v236_v39, %v235_v29  ;;  %v2273_v47 = vshrl.u32 %v640_v46, 7 }
  0x27   :  { %1591 = vmatprep.mubr.msk.f32.mxu0 %vm244_vm0, %v213_v12  ;;  %1723 = vmatprep.subr.bf16.mxu1 %v1722_v16 }
  0x28   :  { %1571 = vmatprep.mubr.msk.f32.mxu1 %vm244_vm0, %v205_v22  ;;  %v181_v25 = vmax.f32 %v156_v23, %v1389_v52  ;;  %v642_v51 = vsub.s32 0, %v2273_v47  ;;  %v2279_v52 = vld [vmem:[%s2407_s2 + $0xe0] sm:$0x7]  ;;  %v1033_v15 = vsub.s32 1, %v2273_v47 }
  0x29   :  { %664 = vrot.lane.b32.xlu0 %v2224_v26, %s1819_s29  ;;  %666 = vrot.lane.b32.xlu1 %v2229_v27, %s1819_s29 }
  0x2a   :  { %1592 = vmatmul.mubr.msk.f32.gmra.mrb[6].mxu0 %vm244_vm0, %v214_v21  ;;  %v206_v30 = vmax.f32 %v181_v25, %v1397_v60  ;;  %1725 = vmatpush3.bf16.msra.mxu1 %v1722_v16  ;;  %v643_v53 = vrot.slane %v2279_v52, %v642_v51  ;;  %v1738_v60 = vpack.c.bf16 %v238_v49, %v237_v18 }
  0x2b   :  { %1602 = vmatprep.mubr.msk.f32.mxu0 %vm244_vm0, %v2112_v28  ;;  %1727 = vmatprep.subr.bf16.mxu1 %v1726_v24  ;;  %v1034_v11 = vrot.slane %v2279_v52, %v1033_v15 }
  0x2c   :  { %1572 = vmatmul.mubr.msk.f32.gmra.mrb[2].mxu1 %vm244_vm0, %v206_v30 }
  0x2e   :  { %1603 = vmatmul.mubr.msk.f32.vlgmr.msra.gmra.mrb[0].mxu0 %vm244_vm0, %v2169_v61 }
  0x2f   :  { %1605 = vmatprep.mubr.msk.f32.mxu0 %vm244_vm0, %v2122_v37 }
  0x32   :  { %1606 = vmatmul.mubr.msk.f32.gmra.mrb[2].mxu0 %vm244_vm0, %v2175_v17 }
  0x33   :  { %1608 = vmatprep.mubr.msk.f32.mxu0 %vm244_vm0, %v2198_v14 }
  0x36   :  { %1609 = vmatmul.mubr.msk.f32.gmra.mrb[4].mxu0 %vm244_vm0, %v2204_v19 }
  0x37   :  { %1611 = vmatprep.mubr.msk.f32.mxu0 %vm244_vm0, %v2224_v26 }
  0x3a   :  { %1612 = vmatmul.mubr.msk.f32.gmra.mrb[6].mxu0 %vm244_vm0, %v2229_v27 }
  0x8c   :  { %v653_v31 = vpop.permute.xlu0 %652 }
  0x8d   :  { %1622 = vmatprep.mubr.msk.f32.mxu1 %vm244_vm0, %v653_v31 }
  0x8e   :  { %v657_v32 = vpop.permute.xlu1 %656 }
  0x90   :  { %v655_v36 = vpop.permute.xlu0 %654 }
  0x91   :  { %1623 = vmatmul.mubr.msk.f32.vlgmr.msra.gmra.mrb[4].mxu1 %vm244_vm0, %v655_v36 }
  0x92   :  { %1625 = vmatprep.mubr.msk.f32.mxu1 %vm244_vm0, %v657_v32  ;;  %1729 = vmatpush3.bf16.msra.mxu1 %v1726_v24 }
  0x93   :  { %v659_v38 = vpop.permute.xlu1 %658  ;;  %1731 = vmatprep.subr.bf16.mxu1 %v1730_v35 }
  0x95   :  { %1626 = vmatmul.mubr.msk.f32.gmra.mrb[6].mxu1 %vm244_vm0, %v659_v38 }
  0x96   :  { %1733 = vmatpush3.bf16.msra.mxu1 %v1730_v35 }
  0x97   :  { %v661_v41 = vpop.permute.xlu0 %660  ;;  %v663_v42 = vpop.permute.xlu1 %662  ;;  %1735 = vmatprep.subr.bf16.mxu1 %v1734_v40 }
  0x98   :  { %1628 = vmatprep.mubr.msk.f32.mxu1 %vm244_vm0, %v661_v41 }
  0x99   :  { %1629 = vmatmul.mubr.msk.f32.gmra.mrb[8].mxu1 %vm244_vm0, %v663_v42 }
  0x9b   :  { %v665_v43 = vpop.permute.xlu0 %664  ;;  %v667_v45 = vpop.permute.xlu1 %666 }
  0x9c   :  { %1631 = vmatprep.mubr.msk.f32.mxu1 %vm244_vm0, %v665_v43 }
  0x9d   :  { %1632 = vmatmul.mubr.msk.f32.gmra.mrb[10].mxu1 %vm244_vm0, %v667_v45 }
  0xf7   :  { %v1570_v48 = vpop.f32.mrb[0].mxu1 }
  0xf8   :  { %v355_v50 = vpop.f32.mrb[1].mxu1 }
  0xff   :  { %v1573_v54 = vpop.f32.mrb[2].mxu1 }
 0x100   :  { %v365_v55 = vpop.f32.mrb[3].mxu1 }
 0x101   :  { %v1604_v56 = vpop.f32.mrb[0].mxu0 }
 0x102   :  { %v593_v57 = vpop.f32.mrb[1].mxu0  ;;  %v645_v59 = vadd.f32 %v1604_v56, %v643_v53 }
 0x103   :  { %v644_v58 = vadd.f32 %v643_v53, %v593_v57 }
 0x105   :  { %v1607_v62 = vpop.f32.mrb[2].mxu0  ;;  %1642 = vmatprep.mubr.msk.f32.mxu1 %vm244_vm0, %v644_v58 }
 0x106   :  { %v603_v63 = vpop.f32.mrb[3].mxu0  ;;  %1643 = vmatmul.mubr.msk.f32.vlgmr.msra.gmra.mrb[4].mxu1 %vm244_vm0, %v645_v59  ;;  %v647_v1 = vadd.f32 %v1607_v62, %v643_v53 }
 0x107   :  { %v646_v0 = vadd.f32 %v643_v53, %v603_v63  ;;  %1737 = vmatpush3.bf16.msra.mxu1 %v1734_v40 }
 0x108   :  { %1739 = vmatprep.subr.bf16.mxu1 %v1738_v60 }
 0x109   :  { %v1610_v2 = vpop.f32.mrb[4].mxu0  ;;  %1645 = vmatprep.mubr.msk.f32.mxu1 %vm244_vm0, %v646_v0 }
 0x10a   :  { %v1754_v4 = vadd.f32 %v1610_v2, %v1570_v48  ;;  %v613_v5 = vpop.f32.mrb[5].mxu0  ;;  %1646 = vmatmul.mubr.msk.f32.gmra.mrb[6].mxu1 %vm244_vm0, %v647_v1 }
 0x10b   :  { %v1755_v6 = vadd.f32 %v613_v5, %v355_v50  ;;  %1741 = vmatpush3.bf16.msra.mxu1 %v1738_v60 }
 0x10c   :  { %v649_v8 = vadd.f32 %v1754_v4, %v643_v53 }
 0x10d   :  { %v648_v7 = vadd.f32 %v1755_v6, %v643_v53  ;;  %v1613_v3 = vpop.f32.mrb[6].mxu0 }
 0x10e   :  { %v1756_v9 = vadd.f32 %v1613_v3, %v1573_v54  ;;  %v623_v10 = vpop.f32.mrb[7].mxu0 }
 0x10f   :  { %v1757_v12 = vadd.f32 %v623_v10, %v365_v55  ;;  %1648 = vmatprep.mubr.msk.f32.mxu1 %vm244_vm0, %v648_v7 }
 0x110   :  { %1649 = vmatmul.mubr.msk.f32.gmra.mrb[8].mxu1 %vm244_vm0, %v649_v8  ;;  %v651_v16 = vadd.f32 %v1756_v9, %v643_v53 }
 0x111   :  { %v650_v13 = vadd.f32 %v1757_v12, %v643_v53 }
 0x113   :  { %1651 = vmatprep.mubr.msk.f32.mxu1 %vm244_vm0, %v650_v13 }
 0x114   :  { %1652 = vmatmul.mubr.msk.f32.gmra.mrb[10].mxu1 %vm244_vm0, %v651_v16 }
 0x115   :  { %1662 = vmatprep.mubr.msk.f32.mxu1 %vm244_vm0, %v2112_v28  ;;  %v239_v28 = vld [vmem:[%s2407_s2 + $0xc0] sm:$0xff] }
 0x118   :  { %1663 = vmatmul.mubr.msk.f32.vlgmr.msra.gmra.mrb[4].mxu1 %vm244_vm0, %v2169_v61 }
 0x119   :  { %1665 = vmatprep.mubr.msk.f32.mxu1 %vm244_vm0, %v2122_v37  ;;  %v240_v37 = vld [vmem:[%s2407_s2 + $0xc8] sm:$0xff] }
 0x11a   :  { %v1742_v61 = vpack.c.bf16 %v240_v37, %v239_v28 }
 0x11c   :  { %1666 = vmatmul.mubr.msk.f32.gmra.mrb[6].mxu1 %vm244_vm0, %v2175_v17  ;;  %1743 = vmatprep.subr.bf16.mxu0 %v1742_v61  ;;  %v241_v17 = vld [vmem:[%s2407_s2 + $0xd0] sm:$0xff] }
 0x11d   :  { %1668 = vmatprep.mubr.msk.f32.mxu1 %vm244_vm0, %v2198_v14  ;;  %1745 = vmatpush3.bf16.msra.mxu0 %v1742_v61  ;;  %v242_v14 = vld [vmem:[%s2407_s2 + $0xd8] sm:$0xff]  ;;  %v1093_v61 = vsub.s32 2, %v2273_v47 }
 0x120   :  { %1669 = vmatmul.mubr.msk.f32.gmra.mrb[8].mxu1 %vm244_vm0, %v2204_v19  ;;  %v1746_v19 = vpack.c.bf16 %v242_v14, %v241_v17  ;;  %v1094_v17 = vrot.slane %v2279_v52, %v1093_v61 }
 0x121   :  { %1671 = vmatprep.mubr.msk.f32.mxu1 %vm244_vm0, %v2224_v26 }
 0x122   :  { %1747 = vmatprep.subr.bf16.mxu0 %v1746_v19 }
 0x123   :  { %1749 = vmatpush3.bf16.msra.mxu0 %v1746_v19 }
 0x124   :  { %1672 = vmatmul.mubr.msk.f32.gmra.mrb[10].mxu1 %vm244_vm0, %v2229_v27 }
 0x1eb   :  { %v1664_v44 = vpop.f32.mrb[4].mxu1 }
 0x1ec   :  { %v1036_v20 = vadd.f32 %v1664_v44, %v1034_v11  ;;  %v984_v21 = vpop.f32.mrb[5].mxu1 }
 0x1ed   :  { %v1035_v22 = vadd.f32 %v1034_v11, %v984_v21 }
 0x1ee   :  { %v1052_v23 = vmin.f32 %v1036_v20, 0.0  ;;  %vm1044_vm2 = vcmp.gt.f32.partialorder %v1036_v20, 0.0 }
 0x1ef   :  { %v1051_v24 = vmin.f32 %v1035_v22, 0.0  ;;  %v1667_v25 = vpop.f32.mrb[6].mxu1  ;;  %vm1043_vm1 = vcmp.gt.f32.partialorder %v1035_v22, 0.0 }
 0x1f0   :  { %v1061_v26 = vmul.f32 1.442695, %v1052_v23  ;;  %v1038_v27 = vadd.f32 %v1667_v25, %v1034_v11  ;;  %v994_v30 = vpop.f32.mrb[7].mxu1 }
 0x1f1   :  { %v1059_v31 = vmul.f32 1.442695, %v1051_v24  ;;  %v1037_v32 = vadd.f32 %v1034_v11, %v994_v30 }
 0x1f2   :  { %1787 = vpow2.f32 %v1061_v26  ;;  %v1054_v33 = vmin.f32 %v1038_v27, 0.0  ;;  %vm1046_vm4 = vcmp.gt.f32.partialorder %v1038_v27, 0.0 }
 0x1f3   :  { %1789 = vpow2.f32 %v1059_v31  ;;  %v1053_v34 = vmin.f32 %v1037_v32, 0.0  ;;  %v1670_v35 = vpop.f32.mrb[8].mxu1  ;;  %vm1045_vm3 = vcmp.gt.f32.partialorder %v1037_v32, 0.0 }
 0x1f4   :  { %v1065_v36 = vmul.f32 1.442695, %v1054_v33  ;;  %v1040_v38 = vadd.f32 %v1670_v35, %v1034_v11  ;;  %v1004_v29 = vpop.f32.mrb[9].mxu1 }
 0x1f5   :  { %v1063_v39 = vmul.f32 1.442695, %v1053_v34  ;;  %v1039_v40 = vadd.f32 %v1034_v11, %v1004_v29 }
 0x1f6   :  { %1791 = vpow2.f32 %v1065_v36  ;;  %v1056_v41 = vmin.f32 %v1040_v38, 0.0  ;;  %vm1048_vm6 = vcmp.gt.f32.partialorder %v1040_v38, 0.0 }
 0x1f7   :  { %1793 = vpow2.f32 %v1063_v39  ;;  %v1055_v42 = vmin.f32 %v1039_v40, 0.0  ;;  %v1673_v43 = vpop.f32.mrb[10].mxu1  ;;  %vm1047_vm5 = vcmp.gt.f32.partialorder %v1039_v40, 0.0 }
 0x1f8   :  { %v1069_v45 = vmul.f32 1.442695, %v1056_v41  ;;  %v1042_v46 = vadd.f32 %v1673_v43, %v1034_v11  ;;  %v1014_v48 = vpop.f32.mrb[11].mxu1 }
 0x1f9   :  { %v1067_v50 = vmul.f32 1.442695, %v1055_v42  ;;  %v1041_v51 = vadd.f32 %v1034_v11, %v1014_v48 }
 0x1fa   :  { %1795 = vpow2.f32 %v1069_v45  ;;  %v1058_v53 = vmin.f32 %v1042_v46, 0.0  ;;  %vm1050_vm8 = vcmp.gt.f32.partialorder %v1042_v46, 0.0 }
 0x1fb   :  { %1797 = vpow2.f32 %v1067_v50  ;;  %v1057_v54 = vmin.f32 %v1041_v51, 0.0  ;;  %vm1049_vm7 = vcmp.gt.f32.partialorder %v1041_v51, 0.0 }
 0x1fc   :  { %v1788_v55 = vpop.eup %1787  ;;  %v1073_v56 = vmul.f32 1.442695, %v1058_v53 }
 0x1fd   :  { %v1790_v18 = vpop.eup %1789  ;;  %v1447_v49 = vadd.f32 -1.0, %v1788_v55  ;;  %v1071_v57 = vmul.f32 1.442695, %v1057_v54 }
 0x1fe   :  { %1799 = vpow2.f32 %v1073_v56  ;;  %v1446_v58 = vadd.f32 -1.0, %v1790_v18 }
 0x1ff   :  { %1801 = vpow2.f32 %v1071_v57  ;;  %v1084_v63 = vsel %vm1044_vm2, %v1036_v20, %v1447_v49  ;;  %vm1330_vm2 = vcmask 1040384  }
 0x200   :  { %v1792_v59 = vpop.eup %1791  ;;  %v1083_v60 = vsel %vm1043_vm1, %v1035_v22, %v1446_v58 }
 0x201   :  { %v1794_v62 = vpop.eup %1793  ;;  %1682 = vmatprep.mubr.msk.f32.mxu0 %vm244_vm0, %v1083_v60  ;;  %v1449_v0 = vadd.f32 -1.0, %v1792_v59 }
 0x202   :  { %1683 = vmatmul.mubr.msk.f32.vlgmr.msra.gmra.mrb[8].mxu0 %vm244_vm0, %v1084_v63  ;;  %v1448_v1 = vadd.f32 -1.0, %v1794_v62 }
 0x203   :  { %v1086_v6 = vsel %vm1046_vm4, %v1038_v27, %v1449_v0 }
 0x204   :  { %v1796_v2 = vpop.eup %1795  ;;  %v1085_v4 = vsel %vm1045_vm3, %v1037_v32, %v1448_v1  ;;  %vm1332_vm3 = vcmask 254976  }
 0x205   :  { %v1798_v5 = vpop.eup %1797  ;;  %1685 = vmatprep.mubr.msk.f32.mxu0 %vm244_vm0, %v1085_v4  ;;  %v1451_v7 = vadd.f32 -1.0, %v1796_v2 }
 0x206   :  { %1686 = vmatmul.mubr.msk.f32.gmra.mrb[10].mxu0 %vm244_vm0, %v1086_v6  ;;  %v1450_v3 = vadd.f32 -1.0, %v1798_v5 }
 0x207   :  { %v1088_v12 = vsel %vm1048_vm6, %v1040_v38, %v1451_v7 }
 0x208   :  { %v1800_v8 = vpop.eup %1799  ;;  %v1087_v9 = vsel %vm1047_vm5, %v1039_v40, %v1450_v3 }
 0x209   :  { %v1802_v10 = vpop.eup %1801  ;;  %1688 = vmatprep.mubr.msk.f32.mxu0 %vm244_vm0, %v1087_v9  ;;  %v1453_v13 = vadd.f32 -1.0, %v1800_v8 }
 0x20a   :  { %1689 = vmatmul.mubr.msk.f32.gmra.mrb[12].mxu0 %vm244_vm0, %v1088_v12  ;;  %v1452_v16 = vadd.f32 -1.0, %v1802_v10 }
 0x20b   :  { %v1090_v37 = vsel %vm1050_vm8, %v1042_v46, %v1453_v13 }
 0x20c   :  { %v1089_v28 = vsel %vm1049_vm7, %v1041_v51, %v1452_v16 }
 0x20d   :  { %1691 = vmatprep.mubr.msk.f32.mxu0 %vm244_vm0, %v1089_v28 }
 0x20e   :  { %1692 = vmatmul.mubr.msk.f32.gmra.mrb[14].mxu0 %vm244_vm0, %v1090_v37 }
 0x2d5   :  { %v1684_v14 = vpop.f32.mrb[8].mxu0 }
 0x2d6   :  { %v1191_v19 = vadd.f32 %v1684_v14, %v1094_v17  ;;  %v1185_v15 = vpop.f32.mrb[9].mxu0 }
 0x2d7   :  { %v1186_v11 = vadd.f32 %v1185_v15, %v1094_v17 }
 0x2d8   :  { %v1233_v44 = vmin.f32 %v1191_v19, 0.0  ;;  %vm1225_vm9 = vcmp.gt.f32.partialorder %v1191_v19, 0.0 }
 0x2d9   :  { %v1232_v20 = vmin.f32 %v1186_v11, 0.0  ;;  %v1687_v21 = vpop.f32.mrb[10].mxu0  ;;  %vm1224_vm10 = vcmp.gt.f32.partialorder %v1186_v11, 0.0 }
 0x2da   :  { %v1242_v22 = vmul.f32 1.442695, %v1233_v44  ;;  %v1201_v23 = vadd.f32 %v1687_v21, %v1094_v17  ;;  %v1195_v24 = vpop.f32.mrb[11].mxu0 }
 0x2db   :  { %v1240_v25 = vmul.f32 1.442695, %v1232_v20  ;;  %v1196_v26 = vadd.f32 %v1195_v24, %v1094_v17 }
 0x2dc   :  { %1803 = vpow2.f32 %v1242_v22  ;;  %v1235_v27 = vmin.f32 %v1201_v23, 0.0  ;;  %vm1227_vm11 = vcmp.gt.f32.partialorder %v1201_v23, 0.0 }
 0x2dd   :  { %1805 = vpow2.f32 %v1240_v25  ;;  %v1234_v30 = vmin.f32 %v1196_v26, 0.0  ;;  %v1690_v31 = vpop.f32.mrb[12].mxu0  ;;  %vm1226_vm12 = vcmp.gt.f32.partialorder %v1196_v26, 0.0 }
 0x2de   :  { %v1246_v47 = vmul.f32 1.442695, %v1235_v27  ;;  %v2336_v32 = vadd.f32 %v1690_v31, %v1094_v17  ;;  %v1205_v52 = vpop.f32.mrb[13].mxu0 }
 0x2df   :  { %v1244_v33 = vmul.f32 1.442695, %v1234_v30  ;;  %v2338_v34 = vadd.f32 %v1205_v52, %v1094_v17 }
 0x2e0   :  { %1807 = vpow2.f32 %v1246_v47  ;;  %v1237_v35 = vmin.f32 %v2336_v32, 0.0  ;;  %vm1229_vm13 = vcmp.gt.f32.partialorder %v2336_v32, 0.0 }
 0x2e1   :  { %1809 = vpow2.f32 %v1244_v33  ;;  %v1236_v36 = vmin.f32 %v2338_v34, 0.0  ;;  %v1693_v38 = vpop.f32.mrb[14].mxu0  ;;  %vm1228_vm14 = vcmp.gt.f32.partialorder %v2338_v34, 0.0 }
 0x2e2   :  { %v1250_v29 = vmul.f32 1.442695, %v1237_v35  ;;  %v2342_v39 = vadd.f32 %v1693_v38, %v1094_v17  ;;  %v1215_v40 = vpop.f32.mrb[15].mxu0 }
 0x2e3   :  { %v1248_v41 = vmul.f32 1.442695, %v1236_v36  ;;  %v2344_v42 = vadd.f32 %v1215_v40, %v1094_v17 }
 0x2e4   :  { %1811 = vpow2.f32 %v1250_v29  ;;  %v1239_v43 = vmin.f32 %v2342_v39, 0.0  ;;  %vm1231_vm15 = vcmp.gt.f32.partialorder %v2342_v39, 0.0 }
 0x2e5   :  { %1813 = vpow2.f32 %v1248_v41  ;;  %v1238_v45 = vmin.f32 %v2344_v42, 0.0  ;;  %vm1230_vm1 = vcmp.gt.f32.partialorder %v2344_v42, 0.0 }
 0x2e6   :  { %v1804_v46 = vpop.eup %1803  ;;  %v1254_v48 = vmul.f32 1.442695, %v1239_v43 }
 0x2e7   :  { %v1806_v50 = vpop.eup %1805  ;;  %v1463_v51 = vadd.f32 -1.0, %v1804_v46  ;;  %v1252_v53 = vmul.f32 1.442695, %v1238_v45 }
 0x2e8   :  { %v1462_v54 = vadd.f32 -1.0, %v1806_v50  ;;  %1815 = vpow2.f32 %v1254_v48 }
 0x2e9   :  { %v1265_v55 = vsel %vm1225_vm9, %v1191_v19, %v1463_v51  ;;  %1817 = vpow2.f32 %v1252_v53 }
 0x2ea   :  { %v1808_v56 = vpop.eup %1807  ;;  %1273 = vst.msk [vmem:[%s2410_s3 + $0x8] sm:$0xff] %vm244_vm0, %v1265_v55  ;;  %v1281_v18 = vsel %vm244_vm0, %v1265_v55, 0.0  ;;  %v1302_v49 = vmul.f32 %v1265_v55, %v1265_v55  ;;  %v1264_v57 = vsel %vm1224_vm10, %v1186_v11, %v1462_v54 }
 0x2eb   :  { %v1810_v58 = vpop.eup %1809  ;;  %1272 = vst.msk [vmem:[%s2410_s3] sm:$0xff] %vm244_vm0, %v1264_v57  ;;  %v1280_v59 = vsel %vm244_vm0, %v1264_v57, 0.0  ;;  %v1301_v60 = vmul.f32 %v1264_v57, %v1264_v57  ;;  %v1465_v62 = vadd.f32 -1.0, %v1808_v56 }
 0x2ec   :  { %v1310_v63 = vsel %vm244_vm0, %v1302_v49, 0.0  ;;  %v1282_v0 = vadd.f32 %v1281_v18, %v1280_v59  ;;  %v1464_v1 = vadd.f32 -1.0, %v1810_v58 }
 0x2ed   :  { %v1309_v2 = vsel %vm244_vm0, %v1301_v60, 0.0  ;;  %v1267_v4 = vsel %vm1227_vm11, %v1201_v23, %v1465_v62 }
 0x2ee   :  { %v1812_v5 = vpop.eup %1811  ;;  %v1311_v6 = vadd.f32 %v1310_v63, %v1309_v2  ;;  %1275 = vst.msk [vmem:[%s2410_s3 + $0x18] sm:$0xff] %vm244_vm0, %v1267_v4  ;;  %v1304_v7 = vmul.f32 %v1267_v4, %v1267_v4  ;;  %v1266_v3 = vsel %vm1226_vm12, %v1196_v26, %v1464_v1  ;;  %v1285_v28 = vsel %vm244_vm0, %v1267_v4, 0.0 }
 0x2ef   :  { %v1814_v8 = vpop.eup %1813  ;;  %1274 = vst.msk [vmem:[%s2410_s3 + $0x10] sm:$0xff] %vm244_vm0, %v1266_v3  ;;  %v1283_v9 = vsel %vm244_vm0, %v1266_v3, 0.0  ;;  %v1303_v10 = vmul.f32 %v1266_v3, %v1266_v3  ;;  %v1467_v12 = vadd.f32 -1.0, %v1812_v5 }
 0x2f0   :  { %v1284_v13 = vadd.f32 %v1283_v9, %v1282_v0  ;;  %v1466_v16 = vadd.f32 -1.0, %v1814_v8  ;;  %v1314_v14 = vsel %vm244_vm0, %v1304_v7, 0.0 }
 0x2f1   :  { %v1312_v37 = vsel %vm244_vm0, %v1303_v10, 0.0  ;;  %v1269_v61 = vsel %vm1229_vm13, %v2336_v32, %v1467_v12 }
 0x2f2   :  { %v1816_v17 = vpop.eup %1815  ;;  %v1313_v19 = vadd.f32 %v1312_v37, %v1311_v6  ;;  %1277 = vst.msk [vmem:[%s2410_s3 + $0x28] sm:$0xff] %vm244_vm0, %v1269_v61  ;;  %v1306_v15 = vmul.f32 %v1269_v61, %v1269_v61  ;;  %v1268_v11 = vsel %vm1228_vm14, %v2338_v34, %v1466_v16  ;;  %v1286_v20 = vadd.f32 %v1285_v28, %v1284_v13 }
 0x2f3   :  { %v1818_v44 = vpop.eup %1817  ;;  %1276 = vst.msk [vmem:[%s2410_s3 + $0x20] sm:$0xff] %vm244_vm0, %v1268_v11  ;;  %v1287_v21 = vsel %vm244_vm0, %v1268_v11, 0.0  ;;  %v1305_v22 = vmul.f32 %v1268_v11, %v1268_v11  ;;  %v1469_v23 = vadd.f32 -1.0, %v1816_v17  ;;  %v1289_v31 = vsel %vm244_vm0, %v1269_v61, 0.0 }
 0x2f4   :  { %v1315_v24 = vadd.f32 %v1314_v14, %v1313_v19  ;;  %v1468_v25 = vadd.f32 -1.0, %v1818_v44  ;;  %v1288_v26 = vadd.f32 %v1287_v21, %v1286_v20  ;;  %v1318_v47 = vsel %vm244_vm0, %v1306_v15, 0.0 }
 0x2f5   :  { %v1316_v27 = vsel %vm244_vm0, %v1305_v22, 0.0  ;;  %v1271_v30 = vsel %vm1231_vm15, %v2342_v39, %v1469_v23 }
 0x2f6   :  { %v1317_v32 = vadd.f32 %v1316_v27, %v1315_v24  ;;  %1279 = vst.msk [vmem:[%s2410_s3 + $0x38] sm:$0xff] %vm244_vm0, %v1271_v30  ;;  %v1270_v52 = vsel %vm1230_vm1, %v2344_v42, %v1468_v25  ;;  %v1308_v33 = vmul.f32 %v1271_v30, %v1271_v30  ;;  %v1290_v34 = vadd.f32 %v1289_v31, %v1288_v26 }
 0x2f7   :  { %1278 = vst.msk [vmem:[%s2410_s3 + $0x30] sm:$0xff] %vm244_vm0, %v1270_v52  ;;  %v1291_v35 = vsel %vm244_vm0, %v1270_v52, 0.0  ;;  %v1307_v36 = vmul.f32 %v1270_v52, %v1270_v52  ;;  %v1293_v40 = vsel %vm244_vm0, %v1271_v30, 0.0 }
 0x2f8   :  { %v1319_v38 = vadd.f32 %v1318_v47, %v1317_v32  ;;  %v1292_v29 = vadd.f32 %v1291_v35, %v1290_v34  ;;  %v1322_v43 = vsel %vm244_vm0, %v1308_v33, 0.0 }
 0x2f9   :  { %v1320_v39 = vsel %vm244_vm0, %v1307_v36, 0.0 }
 0x2fa   :  { %v1321_v41 = vadd.f32 %v1320_v39, %v1319_v38  ;;  %v1294_v42 = vadd.f32 %v1293_v40, %v1292_v29 }
 0x2fc   :  { %v1323_v45 = vadd.f32 %v1322_v43, %v1321_v41  ;;  %v1295_v46 = vrot.slane %v1294_v42, 4 }
 0x2fe   :  { %v1324_v48 = vrot.slane %v1323_v45, 4  ;;  %v1296_v50 = vadd.f32 %v1295_v46, %v1294_v42 }
 0x300   :  { %v1325_v51 = vadd.f32 %v1324_v48, %v1323_v45  ;;  %v1297_v53 = vrot.slane %v1296_v50, 2 }
 0x302   :  { %v1326_v54 = vrot.slane %v1325_v51, 2  ;;  %v1298_v55 = vadd.f32 %v1297_v53, %v1296_v50 }
 0x304   :  { %v1327_v56 = vadd.f32 %v1326_v54, %v1325_v51  ;;  %v1299_v18 = vrot.slane %v1298_v55, 1 }
 0x306   :  { %v1328_v49 = vrot.slane %v1327_v56, 1  ;;  %v1300_v57 = vadd.f32 %v1299_v18, %v1298_v55 }
 0x308   :  { %v1329_v58 = vadd.f32 %v1328_v49, %v1327_v56 }
 0x30a   :  { %v1331_v59 = vsel %vm1330_vm2, %v1300_v57, %v1329_v58 }
 0x30b   :  { %1333 = vst.msk [vmem:[%s2411_s4] sm:$0x3] %vm1332_vm3, %v1331_v59 }

</bundles_post_ra>
